<compile_context>
chip_gen: v7x
topology: tpu7x:2x2x1
jax: 0.10.0
libtpu: 0.0.40
codegen_flags: <defaults>
</compile_context>

<pallas_src>
import math
import numpy as np

import jax
import jax.numpy as jnp
from jax.experimental import pallas as pl
from jax.experimental.pallas import tpu as pltpu

# ---------------------------------------------------------------------------
# Problem sizes (consistent with the module)
# ---------------------------------------------------------------------------
NUM_NODES = 16                   # N  (nodes per graph)
NUM_BUNDLES = 4                  # B
BUNDLE_DIM = 2                   # D  (kernel specialized to D == 2)
CHANNELS = 4                     # c = dim // (B * D)
DIM = NUM_BUNDLES * BUNDLE_DIM * CHANNELS        # 32
HIDDEN_MULT = 2
HIDDEN = DIM * HIDDEN_MULT                       # 64 (FeedForward hidden)
INPUT_DIM = 2 * DIM                              # 64 (cat([h_x, h]))
NUM_EIGS = 12
MAX_EIGS = 8                     # K
TAU0 = 0.1

NUM_GRAPHS = 64                  # G   (graphs batched per forward)
GRAPHS_PER_BLOCK = 16            # GB  (graphs per grid step -> 256 rows/step)
ROWS_PER_BLOCK = GRAPHS_PER_BLOCK * NUM_NODES    # 256
GBK = GRAPHS_PER_BLOCK * MAX_EIGS                # 128 (block-diag spectral width)

# FF weight slab layout (rows; bf16; lane width = HIDDEN == 2*DIM == 64)
FFW_W1A_ROW = 0
FFW_W1B_ROW = DIM                     # 32
FFW_W2_ROW = 2 * DIM                  # 64
FFW_B1_ROW = 2 * DIM + HIDDEN         # 128 (16-sublane aligned for bf16 packing)
FFW_B2_ROW = FFW_B1_ROW + 16          # 144
FFW_ROWS = FFW_B2_ROW + 16            # 160
FFW_COLS = HIDDEN                     # 64
assert 2 * DIM <= FFW_COLS

# ---------------------------------------------------------------------------
# Compile-time constants (hoisted once; plain numpy -> no per-call XLA ops)
# ---------------------------------------------------------------------------
_f = np.arange(DIM)
_b = _f // (BUNDLE_DIM * CHANNELS)
_d = (_f % (BUNDLE_DIM * CHANNELS)) // CHANNELS
_c = _f % CHANNELS
# feature f=(b,d,c) -> (b, 1-d, c): the in-bundle d-swap permutation.
SWAP_IDX = ((_b * BUNDLE_DIM + (1 - _d)) * CHANNELS + _c).astype(np.int32)
EYE_GB = np.eye(GRAPHS_PER_BLOCK, dtype=np.float32)


def _erf(x):
    # Abramowitz & Stegun 7.1.26 polynomial erf (abs err < 1.5e-7); uses only
    # exp/mul/add/select which are guaranteed to lower on the VPU/EUP.
    a1, a2, a3, a4, a5 = 0.254829592, -0.284496736, 1.421413741, -1.453152027, 1.061405429
    p = 0.3275911
    ax = jnp.abs(x)
    t = 1.0 / (1.0 + p * ax)
    poly = ((((a5 * t + a4) * t + a3) * t + a2) * t + a1) * t
    y = 1.0 - poly * jnp.exp(-ax * ax)
    return jnp.where(x < 0.0, -y, y)


def _gelu_exact(x):
    # nn.GELU() default (approximate='none'): x * 0.5 * (1 + erf(x / sqrt(2)))
    return 0.5 * x * (1.0 + _erf(x * (1.0 / math.sqrt(2.0))))


# ---------------------------------------------------------------------------
# Pallas kernel — one graph-block (256 rows) per grid step, no scratch,
# no in-kernel lane permutation, single output store.
# ---------------------------------------------------------------------------
def spec_bunn_kernel(elem_ref, ublk_ref, utexpo_ref, ffw_ref, out_ref):
    f32, bf16 = jnp.float32, jnp.bfloat16

    x      = elem_ref[0]           # [R, DIM] node features
    x_swap = elem_ref[1]           # [R, DIM] x with d <-> 1-d (pre-permuted)
    A      = elem_ref[2]           # [R, DIM] R[n,b,d,d]
    B1     = elem_ref[3]           # [R, DIM] R[n,b,d,1-d]   (first rotation)
    B2     = elem_ref[4]           # [R, DIM] R[n,b,1-d,d]   (second rotation, R^T)

    # --- first bundle rotation (pure VPU, exact) ---------------------------
    h_x = A * x + B1 * x_swap                                         # [R, DIM] f32

    # --- spectral evolution: block-diagonal per-graph projection -----------
    uT   = utexpo_ref[:, 0:ROWS_PER_BLOCK]                            # [GBK, R]
    expo = utexpo_ref[:, ROWS_PER_BLOCK:ROWS_PER_BLOCK + DIM]         # [GBK, DIM]
    proj = jnp.dot(uT, h_x, preferred_element_type=f32)               # [GBK, DIM]
    evol = proj * expo
    h_spec = jnp.dot(ublk_ref[...], evol, preferred_element_type=f32)  # [R, DIM]

    # --- FeedForward on concat([h_x, h_spec]) with W1 pre-split ------------
    w1a = ffw_ref[FFW_W1A_ROW:FFW_W1A_ROW + DIM, 0:HIDDEN]            # [DIM, HIDDEN] bf16
    w1b = ffw_ref[FFW_W1B_ROW:FFW_W1B_ROW + DIM, 0:HIDDEN]            # [DIM, HIDDEN] bf16
    w2c = ffw_ref[FFW_W2_ROW:FFW_W2_ROW + HIDDEN, 0:2 * DIM]          # [HIDDEN, 2*DIM] bf16
    b1  = ffw_ref[FFW_B1_ROW:FFW_B1_ROW + 1, 0:HIDDEN].astype(f32)    # [1, HIDDEN]
    b2c = ffw_ref[FFW_B2_ROW:FFW_B2_ROW + 1, 0:2 * DIM].astype(f32)   # [1, 2*DIM]

    z = (jnp.dot(h_x.astype(bf16), w1a, preferred_element_type=f32)
         + jnp.dot(h_spec.astype(bf16), w1b, preferred_element_type=f32)
         + b1)
    z = _gelu_exact(z)                        # dropout = identity (eval mode)

    # W2 is concatenated with its column-swapped copy so the second rotation's
    # d-swap needs no in-kernel lane movement: h2[:, DIM:] == h_ff at swap(f).
    h2 = jnp.dot(z.astype(bf16), w2c, preferred_element_type=f32) + b2c   # [R, 2*DIM]
    h_ff = h2[:, 0:DIM]
    h_ffs = h2[:, DIM:2 * DIM]

    # --- second bundle rotation with R^T ------------------------------------
    out_ref[...] = A * h_ff + B2 * h_ffs


# ---------------------------------------------------------------------------
# Wrapper: pure data/layout prep (slab packing, block-diag U, swapped W2/b2)
# ---------------------------------------------------------------------------
@jax.jit
def spec_bunn_sep_forward(x, node_rep, eig_vecs, eig_vals, tau, w1, b1, w2, b2):
    """x: [G,N,DIM], node_rep: [G,N,B,D,D], eig_vecs: [G,N,num_eigs], eig_vals: [G,num_eigs]."""
    G, N = x.shape[0], x.shape[1]
    assert N == NUM_NODES and BUNDLE_DIM == 2
    assert G % GRAPHS_PER_BLOCK == 0
    nb = G // GRAPHS_PER_BLOCK
    rows = G * N
    K = MAX_EIGS

    # ---- elementwise slab [5, rows, DIM]: {x, x_swap, A, B1, B2} -----------
    xf = x.reshape(rows, DIM).astype(jnp.float32)
    x_swap = xf[:, SWAP_IDX]                       # layout plumbing, not compute
    nr = node_rep.reshape(rows, NUM_BUNDLES, BUNDLE_DIM, BUNDLE_DIM).astype(jnp.float32)

    def expand(coef_nbd):                          # [rows, B, D] -> [rows, DIM]
        return jnp.broadcast_to(
            coef_nbd[:, :, :, None],
            (rows, NUM_BUNDLES, BUNDLE_DIM, CHANNELS)).reshape(rows, DIM)

    a_slab = expand(jnp.stack([nr[:, :, 0, 0], nr[:, :, 1, 1]], axis=2))
    b1_slab = expand(jnp.stack([nr[:, :, 0, 1], nr[:, :, 1, 0]], axis=2))
    b2_slab = expand(jnp.stack([nr[:, :, 1, 0], nr[:, :, 0, 1]], axis=2))
    elem = jnp.stack([xf, x_swap, a_slab, b1_slab, b2_slab], axis=0)

    # ---- block-diagonal spectral operators (per graph-block) ---------------
    u = eig_vecs[:, :, :K].astype(jnp.float32)                        # [G, N, K]
    u_bd = jnp.einsum('bgnk,gh->bgnhk',
                      u.reshape(nb, GRAPHS_PER_BLOCK, N, K),
                      jnp.asarray(EYE_GB))                            # [nb,GB,N,GB,K]
    u_blk = u_bd.reshape(rows, GBK)                                   # [rows, 128]
    uT_blk = jnp.swapaxes(u_bd.reshape(nb, ROWS_PER_BLOCK, GBK), 1, 2)  # [nb,128,256]

    lam = eig_vals[:, :K].astype(jnp.float32)                         # [G, K]
    expo_gkb = jnp.exp(-lam[:, :, None] * jnp.maximum(tau, 0.0)[None, None, :])  # [G,K,B]
    expo = jnp.broadcast_to(
        expo_gkb[:, :, :, None],
        (G, K, NUM_BUNDLES, BUNDLE_DIM * CHANNELS)).reshape(nb, GBK, DIM)
    utexpo = jnp.concatenate([uT_blk, expo], axis=2)                  # [nb, 128, 288]
    utexpo = utexpo.reshape(nb * GBK, ROWS_PER_BLOCK + DIM)

    # ---- FF weight slab (bf16 operands; fold 2nd-rotation swap into W2/b2) --
    w2s = w2[:, SWAP_IDX]
    b2s = b2[SWAP_IDX]
    ffw = jnp.zeros((FFW_ROWS, FFW_COLS), jnp.float32)
    ffw = ffw.at[FFW_W1A_ROW:FFW_W1A_ROW + 2 * DIM, 0:HIDDEN].set(w1)
    ffw = ffw.at[FFW_W2_ROW:FFW_W2_ROW + HIDDEN, 0:2 * DIM].set(
        jnp.concatenate([w2, w2s], axis=1))
    ffw = ffw.at[FFW_B1_ROW, 0:HIDDEN].set(b1)
    ffw = ffw.at[FFW_B2_ROW, 0:2 * DIM].set(jnp.concatenate([b2, b2s], axis=0))
    ffw = ffw.astype(jnp.bfloat16)

    cost = pl.CostEstimate(
        flops=int(2 * rows * GBK * DIM * 2          # spectral proj + reconstruct
                  + 2 * rows * DIM * HIDDEN * 2     # FF1 (two halves of split W1)
                  + 2 * rows * HIDDEN * 2 * DIM     # FF2 (W2 || W2_swapped)
                  + 8 * rows * DIM),                # bundle rotations
        transcendentals=int(rows * HIDDEN),
        bytes_accessed=int(elem.size * 4 + u_blk.size * 4 + utexpo.size * 4
                           + ffw.size * 2 + rows * DIM * 4),
    )

    out = pl.pallas_call(
        spec_bunn_kernel,
        out_shape=jax.ShapeDtypeStruct((rows, DIM), jnp.float32),
        grid=(nb,),
        in_specs=[
            pl.BlockSpec((5, ROWS_PER_BLOCK, DIM), lambda i: (0, i, 0)),
            pl.BlockSpec((ROWS_PER_BLOCK, GBK), lambda i: (i, 0)),
            pl.BlockSpec((GBK, ROWS_PER_BLOCK + DIM), lambda i: (i, 0)),
            pl.BlockSpec((FFW_ROWS, FFW_COLS), lambda i: (0, 0)),
        ],
        out_specs=pl.BlockSpec((ROWS_PER_BLOCK, DIM), lambda i: (i, 0)),
        compiler_params=pltpu.CompilerParams(
            dimension_semantics=("parallel",)),
        cost_estimate=cost,
    )(elem, u_blk, utexpo, ffw)
    # TODO(synk): for full lane density (128-wide activations / unmasked vst),
    # additionally pack 4 graphs along the feature axis or use a transposed
    # [DIM, rows] layout; current activations occupy 32 (or 64) of 128 lanes.
    return out.reshape(G, N, DIM)


# ---------------------------------------------------------------------------
# Pure-JAX reference (mirrors the PyTorch forward) for a correctness check
# ---------------------------------------------------------------------------
def reference_forward(x, node_rep, eig_vecs, eig_vals, tau, w1, b1, w2, b2):
    hp = jax.lax.Precision.HIGHEST

    def one(xg, nrg, ug, lg):
        N = xg.shape[0]
        vf = xg.reshape(N, NUM_BUNDLES, BUNDLE_DIM, -1)
        vf = jnp.einsum('abcd,abde->abce', nrg, vf, precision=hp)
        h = vf.reshape(N, DIM)
        h_x = h
        u = ug[:, :MAX_EIGS]
        proj = jnp.einsum('kn,nd->kd', u.T, h, precision=hp)
        proj = proj.reshape(MAX_EIGS, NUM_BUNDLES, BUNDLE_DIM, -1)
        lam = lg[:MAX_EIGS]
        expo = jnp.exp(-lam[:, None] * jax.nn.relu(tau)[None, :])
        evol = proj * expo[:, :, None, None]
        unproj = jnp.einsum('nk,kbdc->nbdc', u, evol, precision=hp)
        h = unproj.reshape(N, DIM)
        comb = jnp.concatenate([h_x, h], axis=1)
        z = jax.nn.gelu(jnp.dot(comb, w1, precision=hp) + b1, approximate=False)
        hf = jnp.dot(z, w2, precision=hp) + b2
        vf = hf.reshape(N, NUM_BUNDLES, BUNDLE_DIM, -1)
        vf = jnp.einsum('abcd,abde->abce', jnp.swapaxes(nrg, 2, 3), vf, precision=hp)
        return vf.reshape(N, DIM)

    return jax.vmap(one)(x, node_rep, eig_vecs, eig_vals)


if __name__ == "__main__":
    key = jax.random.PRNGKey(0)
    k = jax.random.split(key, 9)
    G = NUM_GRAPHS
    x = jax.random.normal(k[0], (G, NUM_NODES, DIM), jnp.float32)
    node_rep = jax.random.normal(
        k[1], (G, NUM_NODES, NUM_BUNDLES, BUNDLE_DIM, BUNDLE_DIM), jnp.float32)
    eig_vecs = jax.random.normal(k[2], (G, NUM_NODES, NUM_EIGS), jnp.float32) / jnp.sqrt(NUM_NODES)
    eig_vals = jnp.abs(jax.random.normal(k[3], (G, NUM_EIGS), jnp.float32))
    # tau parameter (learn_tau=True, tau_method='fixed'): rand([num_bundles]) - 0.5 + tau
    tau = jax.random.uniform(k[4], (NUM_BUNDLES,), jnp.float32) - 0.5 + TAU0
    # FeedForwardModule(dim, input_dim_multiplier=2, hidden_dim_multiplier=2) weights
    w1 = jax.random.normal(k[5], (INPUT_DIM, HIDDEN), jnp.float32) * 0.1
    b1 = jax.random.normal(k[6], (HIDDEN,), jnp.float32) * 0.1
    w2 = jax.random.normal(k[7], (HIDDEN, DIM), jnp.float32) * 0.1
    b2 = jax.random.normal(k[8], (DIM,), jnp.float32) * 0.1

    out = spec_bunn_sep_forward(x, node_rep, eig_vecs, eig_vals, tau, w1, b1, w2, b2)
    out = jax.block_until_ready(out)

    ref = reference_forward(x, node_rep, eig_vecs, eig_vals, tau, w1, b1, w2, b2)
    assert out.shape == (G, NUM_NODES, DIM)
    max_err = float(jnp.max(jnp.abs(out - ref)))
    # Tolerance accounts for the bf16-operand MXU path in the FeedForward matmuls
    # (f32 accumulation); the rotations and spectral path remain f32.
    assert jnp.allclose(out, ref, rtol=5e-2, atol=5e-2), f"max abs err = {max_err}"
    print("KERNEL_OK")
</pallas_src>

<mosaic_0001>
module attributes {stable_mosaic.version = 11 : i64} {
  func.func @spec_bunn_kernel(%arg0: i32, %arg1: memref<5x256x32xf32, #tpu.memory_space<vmem>>, %arg2: memref<256x128xf32, #tpu.memory_space<vmem>>, %arg3: memref<128x288xf32, #tpu.memory_space<vmem>>, %arg4: memref<160x64xbf16, #tpu.memory_space<vmem>>, %arg5: memref<256x32xf32, #tpu.memory_space<vmem>>) attributes {dimension_semantics = [#tpu.dimension_semantics<parallel>], iteration_bounds = array<i64: 4>, scalar_prefetch = 0 : i64, scratch_operands = 0 : i64, tpu.core_type = #tpu.core_type<tc>, window_params = [{transform_indices = @transform_0, window_bounds = array<i64: 5, 256, 32>}, {transform_indices = @transform_1, window_bounds = array<i64: 256, 128>}, {transform_indices = @transform_2, window_bounds = array<i64: 128, 288>}, {pipeline_mode = #tpu.pipeline_mode<synchronous>, transform_indices = @transform_3, window_bounds = array<i64: 160, 64>}, {transform_indices = @transform_4, window_bounds = array<i64: 256, 32>}]} {
    %c0 = arith.constant 0 : index
    %c0_0 = arith.constant 0 : index
    %c0_1 = arith.constant 0 : index
    %0 = vector.load %arg1[%c0, %c0_0, %c0_1] : memref<5x256x32xf32, #tpu.memory_space<vmem>>, vector<1x256x32xf32>
    %1 = vector.shape_cast %0 : vector<1x256x32xf32> to vector<256x32xf32>
    %c1 = arith.constant 1 : index
    %c0_2 = arith.constant 0 : index
    %c0_3 = arith.constant 0 : index
    %2 = vector.load %arg1[%c1, %c0_2, %c0_3] : memref<5x256x32xf32, #tpu.memory_space<vmem>>, vector<1x256x32xf32>
    %3 = vector.shape_cast %2 : vector<1x256x32xf32> to vector<256x32xf32>
    %c2 = arith.constant 2 : index
    %c0_4 = arith.constant 0 : index
    %c0_5 = arith.constant 0 : index
    %4 = vector.load %arg1[%c2, %c0_4, %c0_5] : memref<5x256x32xf32, #tpu.memory_space<vmem>>, vector<1x256x32xf32>
    %5 = vector.shape_cast %4 : vector<1x256x32xf32> to vector<256x32xf32>
    %c3 = arith.constant 3 : index
    %c0_6 = arith.constant 0 : index
    %c0_7 = arith.constant 0 : index
    %6 = vector.load %arg1[%c3, %c0_6, %c0_7] : memref<5x256x32xf32, #tpu.memory_space<vmem>>, vector<1x256x32xf32>
    %7 = vector.shape_cast %6 : vector<1x256x32xf32> to vector<256x32xf32>
    %c4 = arith.constant 4 : index
    %c0_8 = arith.constant 0 : index
    %c0_9 = arith.constant 0 : index
    %8 = vector.load %arg1[%c4, %c0_8, %c0_9] : memref<5x256x32xf32, #tpu.memory_space<vmem>>, vector<1x256x32xf32>
    %9 = vector.shape_cast %8 : vector<1x256x32xf32> to vector<256x32xf32>
    %10 = arith.mulf %5, %1 : vector<256x32xf32>
    %11 = arith.mulf %7, %3 : vector<256x32xf32>
    %12 = arith.addf %10, %11 : vector<256x32xf32>
    %c0_10 = arith.constant 0 : index
    %c0_11 = arith.constant 0 : index
    %13 = vector.load %arg3[%c0_10, %c0_11] : memref<128x288xf32, #tpu.memory_space<vmem>>, vector<128x256xf32>
    %c0_12 = arith.constant 0 : index
    %c256 = arith.constant 256 : index
    %14 = vector.load %arg3[%c0_12, %c256] : memref<128x288xf32, #tpu.memory_space<vmem>>, vector<128x32xf32>
    %cst = arith.constant dense<0.000000e+00> : vector<128x32xf32>
    %15 = tpu.matmul %13, %12, %cst {dimension_numbers = #tpu.dot_dimension_numbers<[1], [0], [0], [1], [0, 0, 1, 1], [], []>} : vector<128x256xf32>, vector<256x32xf32>, vector<128x32xf32> -> vector<128x32xf32>
    %16 = arith.mulf %15, %14 : vector<128x32xf32>
    %c0_13 = arith.constant 0 : index
    %c0_14 = arith.constant 0 : index
    %17 = vector.load %arg2[%c0_13, %c0_14] : memref<256x128xf32, #tpu.memory_space<vmem>>, vector<256x128xf32>
    %cst_15 = arith.constant dense<0.000000e+00> : vector<256x32xf32>
    %18 = tpu.matmul %17, %16, %cst_15 {dimension_numbers = #tpu.dot_dimension_numbers<[1], [0], [0], [1], [0, 0, 1, 1], [], []>} : vector<256x128xf32>, vector<128x32xf32>, vector<256x32xf32> -> vector<256x32xf32>
    %c0_16 = arith.constant 0 : index
    %c0_17 = arith.constant 0 : index
    %19 = vector.load %arg4[%c0_16, %c0_17] : memref<160x64xbf16, #tpu.memory_space<vmem>>, vector<32x64xbf16>
    %c32 = arith.constant 32 : index
    %c0_18 = arith.constant 0 : index
    %20 = vector.load %arg4[%c32, %c0_18] : memref<160x64xbf16, #tpu.memory_space<vmem>>, vector<32x64xbf16>
    %c64 = arith.constant 64 : index
    %c0_19 = arith.constant 0 : index
    %21 = vector.load %arg4[%c64, %c0_19] : memref<160x64xbf16, #tpu.memory_space<vmem>>, vector<64x64xbf16>
    %c128 = arith.constant 128 : index
    %c0_20 = arith.constant 0 : index
    %22 = vector.load %arg4[%c128, %c0_20] : memref<160x64xbf16, #tpu.memory_space<vmem>>, vector<1x64xbf16>
    %23 = arith.extf %22 : vector<1x64xbf16> to vector<1x64xf32>
    %c144 = arith.constant 144 : index
    %c0_21 = arith.constant 0 : index
    %24 = vector.load %arg4[%c144, %c0_21] : memref<160x64xbf16, #tpu.memory_space<vmem>>, vector<1x64xbf16>
    %25 = arith.extf %24 : vector<1x64xbf16> to vector<1x64xf32>
    %26 = arith.truncf %12 : vector<256x32xf32> to vector<256x32xbf16>
    %cst_22 = arith.constant dense<0.000000e+00> : vector<256x64xf32>
    %27 = tpu.matmul %26, %19, %cst_22 {dimension_numbers = #tpu.dot_dimension_numbers<[1], [0], [0], [1], [0, 0, 1, 1], [], []>} : vector<256x32xbf16>, vector<32x64xbf16>, vector<256x64xf32> -> vector<256x64xf32>
    %28 = arith.truncf %18 : vector<256x32xf32> to vector<256x32xbf16>
    %cst_23 = arith.constant dense<0.000000e+00> : vector<256x64xf32>
    %29 = tpu.matmul %28, %20, %cst_23 {dimension_numbers = #tpu.dot_dimension_numbers<[1], [0], [0], [1], [0, 0, 1, 1], [], []>} : vector<256x32xbf16>, vector<32x64xbf16>, vector<256x64xf32> -> vector<256x64xf32>
    %30 = arith.addf %27, %29 : vector<256x64xf32>
    %31 = vector.broadcast %23 : vector<1x64xf32> to vector<256x64xf32>
    %32 = arith.addf %30, %31 : vector<256x64xf32>
    %cst_24 = arith.constant 5.000000e-01 : f32
    %33 = vector.broadcast %cst_24 : f32 to vector<256x64xf32>
    %34 = arith.mulf %33, %32 : vector<256x64xf32>
    %cst_25 = arith.constant 0.707106769 : f32
    %35 = vector.broadcast %cst_25 : f32 to vector<256x64xf32>
    %36 = arith.mulf %32, %35 : vector<256x64xf32>
    %37 = math.absf %36 : vector<256x64xf32>
    %cst_26 = arith.constant 0.327591091 : f32
    %38 = vector.broadcast %cst_26 : f32 to vector<256x64xf32>
    %39 = arith.mulf %38, %37 : vector<256x64xf32>
    %cst_27 = arith.constant 1.000000e+00 : f32
    %40 = vector.broadcast %cst_27 : f32 to vector<256x64xf32>
    %41 = arith.addf %40, %39 : vector<256x64xf32>
    %cst_28 = arith.constant 1.000000e+00 : f32
    %42 = vector.broadcast %cst_28 : f32 to vector<256x64xf32>
    %43 = arith.divf %42, %41 : vector<256x64xf32>
    %cst_29 = arith.constant 1.06140542 : f32
    %44 = vector.broadcast %cst_29 : f32 to vector<256x64xf32>
    %45 = arith.mulf %44, %43 : vector<256x64xf32>
    %cst_30 = arith.constant -1.45315206 : f32
    %46 = vector.broadcast %cst_30 : f32 to vector<256x64xf32>
    %47 = arith.addf %45, %46 : vector<256x64xf32>
    %48 = arith.mulf %47, %43 : vector<256x64xf32>
    %cst_31 = arith.constant 1.42141378 : f32
    %49 = vector.broadcast %cst_31 : f32 to vector<256x64xf32>
    %50 = arith.addf %48, %49 : vector<256x64xf32>
    %51 = arith.mulf %50, %43 : vector<256x64xf32>
    %cst_32 = arith.constant -0.284496725 : f32
    %52 = vector.broadcast %cst_32 : f32 to vector<256x64xf32>
    %53 = arith.addf %51, %52 : vector<256x64xf32>
    %54 = arith.mulf %53, %43 : vector<256x64xf32>
    %cst_33 = arith.constant 0.254829586 : f32
    %55 = vector.broadcast %cst_33 : f32 to vector<256x64xf32>
    %56 = arith.addf %54, %55 : vector<256x64xf32>
    %57 = arith.mulf %56, %43 : vector<256x64xf32>
    %cst_34 = arith.constant 0.000000e+00 : f32
    %58 = vector.broadcast %cst_34 : f32 to vector<256x64xf32>
    %59 = arith.subf %58, %37 : vector<256x64xf32>
    %60 = arith.mulf %59, %37 : vector<256x64xf32>
    %61 = math.exp %60 : vector<256x64xf32>
    %62 = arith.mulf %57, %61 : vector<256x64xf32>
    %cst_35 = arith.constant 1.000000e+00 : f32
    %63 = vector.broadcast %cst_35 : f32 to vector<256x64xf32>
    %64 = arith.subf %63, %62 : vector<256x64xf32>
    %cst_36 = arith.constant 0.000000e+00 : f32
    %65 = vector.broadcast %cst_36 : f32 to vector<256x64xf32>
    %66 = arith.cmpf olt, %36, %65 : vector<256x64xf32>
    %cst_37 = arith.constant 0.000000e+00 : f32
    %67 = vector.broadcast %cst_37 : f32 to vector<256x64xf32>
    %68 = arith.subf %67, %64 : vector<256x64xf32>
    %69 = arith.select %66, %68, %64 : vector<256x64xi1>, vector<256x64xf32>
    %cst_38 = arith.constant 1.000000e+00 : f32
    %70 = vector.broadcast %cst_38 : f32 to vector<256x64xf32>
    %71 = arith.addf %70, %69 : vector<256x64xf32>
    %72 = arith.mulf %34, %71 : vector<256x64xf32>
    %73 = arith.truncf %72 : vector<256x64xf32> to vector<256x64xbf16>
    %cst_39 = arith.constant dense<0.000000e+00> : vector<256x64xf32>
    %74 = tpu.matmul %73, %21, %cst_39 {dimension_numbers = #tpu.dot_dimension_numbers<[1], [0], [0], [1], [0, 0, 1, 1], [], []>} : vector<256x64xbf16>, vector<64x64xbf16>, vector<256x64xf32> -> vector<256x64xf32>
    %75 = vector.broadcast %25 : vector<1x64xf32> to vector<256x64xf32>
    %76 = arith.addf %74, %75 : vector<256x64xf32>
    %77 = vector.extract_strided_slice %76 {offsets = [0, 0], sizes = [256, 32], strides = [1, 1]} : vector<256x64xf32> to vector<256x32xf32>
    %78 = vector.extract_strided_slice %76 {offsets = [0, 32], sizes = [256, 32], strides = [1, 1]} : vector<256x64xf32> to vector<256x32xf32>
    %79 = arith.mulf %5, %77 : vector<256x32xf32>
    %80 = arith.mulf %9, %78 : vector<256x32xf32>
    %81 = arith.addf %79, %80 : vector<256x32xf32>
    %c0_40 = arith.constant 0 : index
    %c0_41 = arith.constant 0 : index
    %82 = vector.load %arg5[%c0_40, %c0_41] : memref<256x32xf32, #tpu.memory_space<vmem>>, vector<256x32xf32>
    tpu.vector_store %arg5[%c0_40, %c0_41], %81 {strides = array<i32>} : memref<256x32xf32, #tpu.memory_space<vmem>>, vector<256x32xf32>,
    return
  }
  func.func @transform_0(%arg0: i32) -> (i32, i32, i32) {
    %c0_i32 = arith.constant 0 : i32
    %c0_i32_0 = arith.constant 0 : i32
    %c0_i32_1 = arith.constant 0 : i32
    return %c0_i32, %arg0, %c0_i32_0 : i32, i32, i32
  }
  func.func @transform_1(%arg0: i32) -> (i32, i32) {
    %c0_i32 = arith.constant 0 : i32
    %c0_i32_0 = arith.constant 0 : i32
    return %arg0, %c0_i32 : i32, i32
  }
  func.func @transform_2(%arg0: i32) -> (i32, i32) {
    %c0_i32 = arith.constant 0 : i32
    %c0_i32_0 = arith.constant 0 : i32
    return %arg0, %c0_i32 : i32, i32
  }
  func.func @transform_3(%arg0: i32) -> (i32, i32) {
    %c0_i32 = arith.constant 0 : i32
    %c0_i32_0 = arith.constant 0 : i32
    %c0_i32_1 = arith.constant 0 : i32
    return %c0_i32, %c0_i32_0 : i32, i32
  }
  func.func @transform_4(%arg0: i32) -> (i32, i32) {
    %c0_i32 = arith.constant 0 : i32
    %c0_i32_0 = arith.constant 0 : i32
    return %arg0, %c0_i32 : i32, i32
  }
}

</mosaic_0001>

<bundles_post_ra>
// kernel: spec_bunn_sep_forward.1
= control target key start
LH: loop header
LB: loop body
LE: loop exit
PB: predicated region body
PF: predicated region fallthrough
CT: control target
= control target key end

     0   :  { %s4570_s15 = smov 0   ;;  %s4572_s16 = smov 0   ;;  %s6510_s0 = inlined_call_operand.vmem [shape: f32[5,1024,32], index: 0, kind: input, shape index: {}]   ;;  %s6511_s1 = inlined_call_operand.vmem [shape: f32[1024,128], index: 1, kind: input, shape index: {}]   ;;  %s6512_s2 = inlined_call_operand.vmem [shape: f32[512,288], index: 2, kind: input, shape index: {}]   ;;  %s6513_s3 = inlined_call_operand.vmem [shape: bf16[160,64], index: 3, kind: input, shape index: {}]   ;;  %s6514_s4 = inlined_call_operand.vmem [shape: f32[1024,32], index: 4, kind: output, shape index: {}]  }
   0x1   :  { %s4574_s17 = smov 0  }
   0x2 LB: > { %s3636_s18 = sadd.s32 4294967295, %s4542_s17   ;;  %s4587_s19 = sadd.s32 1, %s4542_s17   ;;  %s4542_s17 = sphi %s4574_s17, %s6557_s17   ;;  %s4538_s16 = sphi %s4572_s16, %s6556_s16   ;;  %s4534_s15 = sphi %s4570_s15, %s6555_s15  }
   0x3   : > { %s18_s20 = ssub.s32 %s4542_s17, %s4587_s19  ;;  %s21_s21 = sadd.s32 1, %s4538_s16 }
   0x4   : > { %p19_p0 = scmp.eq.s32.totalorder %s18_s20, 0  ;;  %p28_p1 = scmp.ne.s32.totalorder %s4538_s16, %s4534_s15 }
   0x5   : > { %p29_p2 = scmp.eq.s32.totalorder %s4542_s17, 0  ;;  %p3639_p4 = scmp.ge.s32.totalorder %s4542_s17, 4 }
   0x6   : > { %s4596_s22 = scalar_select %p19_p0, %s4538_s16, %s21_s21  }
   0x7   : > { %p30_p3 = por %p29_p2, %p28_p1  ;;  %156 = sbr.rel (%p3639_p4) target bundleno = 99 (0x63), region = 20 }
   0xe   : > { %159 = sbr.rel (!%p30_p3) target bundleno = 99 (0x63), region = 24  ;;  %s161_s23 = sand.u32 (%p30_p3), 1, %s4538_s16  }
   0xf   : > { %s3835_s24 = sshll.u32 (%p30_p3), %s4542_s17, 8  ;;  %s4324_s25 = smul.u32 (%p30_p3), 1280, %s161_s23 }
  0x10   : > { %s4604_s28 = scalar_lea.vmem (%p30_p3), %s6510_s0, %s3835_s24 }
  0x11   : > { %v512_v0 = vld [vmem:[%s4604_s28] sm:$0xff] (%p30_p3)  ;;  %v514_v1 = vld [vmem:[%s4604_s28 + $0x8] sm:$0xff] (%p30_p3)  ;;  %v516_v2 = vld [vmem:[%s4604_s28 + $0x10] sm:$0xff] (%p30_p3)  ;;  %s4612_s29 = scalar_lea.vmem (%p30_p3), [#allocation2], %s4324_s25 }
  0x12   : > { %v518_v3 = vld [vmem:[%s4604_s28 + $0x18] sm:$0xff] (%p30_p3)  ;;  %v520_v4 = vld [vmem:[%s4604_s28 + $0x20] sm:$0xff] (%p30_p3)  ;;  %v522_v5 = vld [vmem:[%s4604_s28 + $0x28] sm:$0xff] (%p30_p3)  ;;  %513 = vst [vmem:[%s4612_s29] sm:$0xff] (%p30_p3), %v512_v0 }
  0x13   : > { %515 = vst [vmem:[%s4612_s29 + $0x8] sm:$0xff] (%p30_p3), %v514_v1  ;;  %517 = vst [vmem:[%s4612_s29 + $0x10] sm:$0xff] (%p30_p3), %v516_v2  ;;  %v524_v6 = vld [vmem:[%s4604_s28 + $0x30] sm:$0xff] (%p30_p3)  ;;  %v526_v7 = vld [vmem:[%s4604_s28 + $0x38] sm:$0xff] (%p30_p3) }
  0x14   : > { %519 = vst [vmem:[%s4612_s29 + $0x18] sm:$0xff] (%p30_p3), %v518_v3  ;;  %521 = vst [vmem:[%s4612_s29 + $0x20] sm:$0xff] (%p30_p3), %v520_v4  ;;  %v528_v8 = vld [vmem:[%s4604_s28 + $0x40] sm:$0xff] (%p30_p3)  ;;  %v530_v9 = vld [vmem:[%s4604_s28 + $0x48] sm:$0xff] (%p30_p3) }
  0x15   : > { %523 = vst [vmem:[%s4612_s29 + $0x28] sm:$0xff] %v522_v5  ;;  %525 = vst [vmem:[%s4612_s29 + $0x30] sm:$0xff] %v524_v6  ;;  %v532_v10 = vld [vmem:[%s4604_s28 + $0x50] sm:$0xff]  ;;  %v534_v11 = vld [vmem:[%s4604_s28 + $0x58] sm:$0xff] }
  0x16   : > { %527 = vst [vmem:[%s4612_s29 + $0x38] sm:$0xff] %v526_v7  ;;  %529 = vst [vmem:[%s4612_s29 + $0x40] sm:$0xff] %v528_v8  ;;  %v536_v12 = vld [vmem:[%s4604_s28 + $0x60] sm:$0xff]  ;;  %v538_v13 = vld [vmem:[%s4604_s28 + $0x68] sm:$0xff] }
  0x17   : > { %531 = vst [vmem:[%s4612_s29 + $0x48] sm:$0xff] %v530_v9  ;;  %533 = vst [vmem:[%s4612_s29 + $0x50] sm:$0xff] %v532_v10  ;;  %v540_v14 = vld [vmem:[%s4604_s28 + $0x70] sm:$0xff]  ;;  %v542_v15 = vld [vmem:[%s4604_s28 + $0x78] sm:$0xff] }
  0x18   : > { %535 = vst [vmem:[%s4612_s29 + $0x58] sm:$0xff] %v534_v11  ;;  %537 = vst [vmem:[%s4612_s29 + $0x60] sm:$0xff] %v536_v12  ;;  %v544_v16 = vld [vmem:[%s4604_s28 + $0x80] sm:$0xff]  ;;  %v546_v17 = vld [vmem:[%s4604_s28 + $0x88] sm:$0xff] }
  0x19   : > { %539 = vst [vmem:[%s4612_s29 + $0x68] sm:$0xff] %v538_v13  ;;  %541 = vst [vmem:[%s4612_s29 + $0x70] sm:$0xff] %v540_v14  ;;  %v548_v18 = vld [vmem:[%s4604_s28 + $0x90] sm:$0xff]  ;;  %v550_v19 = vld [vmem:[%s4604_s28 + $0x98] sm:$0xff] }
  0x1a   : > { %543 = vst [vmem:[%s4612_s29 + $0x78] sm:$0xff] %v542_v15  ;;  %545 = vst [vmem:[%s4612_s29 + $0x80] sm:$0xff] %v544_v16  ;;  %v552_v20 = vld [vmem:[%s4604_s28 + $0xa0] sm:$0xff]  ;;  %v554_v21 = vld [vmem:[%s4604_s28 + $0xa8] sm:$0xff] }
  0x1b   : > { %547 = vst [vmem:[%s4612_s29 + $0x88] sm:$0xff] %v546_v17  ;;  %549 = vst [vmem:[%s4612_s29 + $0x90] sm:$0xff] %v548_v18  ;;  %v556_v22 = vld [vmem:[%s4604_s28 + $0xb0] sm:$0xff]  ;;  %v558_v23 = vld [vmem:[%s4604_s28 + $0xb8] sm:$0xff] }
  0x1c   : > { %551 = vst [vmem:[%s4612_s29 + $0x98] sm:$0xff] %v550_v19  ;;  %553 = vst [vmem:[%s4612_s29 + $0xa0] sm:$0xff] %v552_v20  ;;  %v560_v24 = vld [vmem:[%s4604_s28 + $0xc0] sm:$0xff]  ;;  %v562_v25 = vld [vmem:[%s4604_s28 + $0xc8] sm:$0xff] }
  0x1d   : > { %555 = vst [vmem:[%s4612_s29 + $0xa8] sm:$0xff] %v554_v21  ;;  %557 = vst [vmem:[%s4612_s29 + $0xb0] sm:$0xff] %v556_v22  ;;  %v564_v26 = vld [vmem:[%s4604_s28 + $0xd0] sm:$0xff]  ;;  %v566_v27 = vld [vmem:[%s4604_s28 + $0xd8] sm:$0xff] }
  0x1e   : > { %559 = vst [vmem:[%s4612_s29 + $0xb8] sm:$0xff] %v558_v23  ;;  %561 = vst [vmem:[%s4612_s29 + $0xc0] sm:$0xff] %v560_v24  ;;  %v568_v28 = vld [vmem:[%s4604_s28 + $0xe0] sm:$0xff]  ;;  %v570_v29 = vld [vmem:[%s4604_s28 + $0xe8] sm:$0xff] }
  0x1f   : > { %563 = vst [vmem:[%s4612_s29 + $0xc8] sm:$0xff] %v562_v25  ;;  %565 = vst [vmem:[%s4612_s29 + $0xd0] sm:$0xff] %v564_v26  ;;  %v572_v30 = vld [vmem:[%s4604_s28 + $0xf0] sm:$0xff]  ;;  %v574_v31 = vld [vmem:[%s4604_s28 + $0xf8] sm:$0xff] }
  0x20   : > { %567 = vst [vmem:[%s4612_s29 + $0xd8] sm:$0xff] %v566_v27  ;;  %569 = vst [vmem:[%s4612_s29 + $0xe0] sm:$0xff] %v568_v28  ;;  %v576_v32 = vld [vmem:[%s4604_s28 + $0x400] sm:$0xff]  ;;  %v578_v33 = vld [vmem:[%s4604_s28 + $0x408] sm:$0xff] }
  0x21   : > { %571 = vst [vmem:[%s4612_s29 + $0xe8] sm:$0xff] %v570_v29  ;;  %573 = vst [vmem:[%s4612_s29 + $0xf0] sm:$0xff] %v572_v30  ;;  %v580_v34 = vld [vmem:[%s4604_s28 + $0x410] sm:$0xff]  ;;  %v582_v35 = vld [vmem:[%s4604_s28 + $0x418] sm:$0xff] }
  0x22   : > { %575 = vst [vmem:[%s4612_s29 + $0xf8] sm:$0xff] %v574_v31  ;;  %577 = vst [vmem:[%s4612_s29 + $0x100] sm:$0xff] %v576_v32  ;;  %v584_v36 = vld [vmem:[%s4604_s28 + $0x420] sm:$0xff]  ;;  %v586_v37 = vld [vmem:[%s4604_s28 + $0x428] sm:$0xff] }
  0x23   : > { %579 = vst [vmem:[%s4612_s29 + $0x108] sm:$0xff] %v578_v33  ;;  %581 = vst [vmem:[%s4612_s29 + $0x110] sm:$0xff] %v580_v34  ;;  %v588_v38 = vld [vmem:[%s4604_s28 + $0x430] sm:$0xff]  ;;  %v590_v39 = vld [vmem:[%s4604_s28 + $0x438] sm:$0xff] }
  0x24   : > { %583 = vst [vmem:[%s4612_s29 + $0x118] sm:$0xff] %v582_v35  ;;  %585 = vst [vmem:[%s4612_s29 + $0x120] sm:$0xff] %v584_v36  ;;  %v592_v40 = vld [vmem:[%s4604_s28 + $0x440] sm:$0xff]  ;;  %v594_v41 = vld [vmem:[%s4604_s28 + $0x448] sm:$0xff] }
  0x25   : > { %587 = vst [vmem:[%s4612_s29 + $0x128] sm:$0xff] %v586_v37  ;;  %589 = vst [vmem:[%s4612_s29 + $0x130] sm:$0xff] %v588_v38  ;;  %v596_v42 = vld [vmem:[%s4604_s28 + $0x450] sm:$0xff]  ;;  %v598_v43 = vld [vmem:[%s4604_s28 + $0x458] sm:$0xff] }
  0x26   : > { %591 = vst [vmem:[%s4612_s29 + $0x138] sm:$0xff] %v590_v39  ;;  %593 = vst [vmem:[%s4612_s29 + $0x140] sm:$0xff] %v592_v40  ;;  %v600_v44 = vld [vmem:[%s4604_s28 + $0x460] sm:$0xff]  ;;  %v602_v45 = vld [vmem:[%s4604_s28 + $0x468] sm:$0xff] }
  0x27   : > { %595 = vst [vmem:[%s4612_s29 + $0x148] sm:$0xff] %v594_v41  ;;  %597 = vst [vmem:[%s4612_s29 + $0x150] sm:$0xff] %v596_v42  ;;  %v604_v46 = vld [vmem:[%s4604_s28 + $0x470] sm:$0xff]  ;;  %v606_v47 = vld [vmem:[%s4604_s28 + $0x478] sm:$0xff] }
  0x28   : > { %599 = vst [vmem:[%s4612_s29 + $0x158] sm:$0xff] %v598_v43  ;;  %601 = vst [vmem:[%s4612_s29 + $0x160] sm:$0xff] %v600_v44  ;;  %v608_v48 = vld [vmem:[%s4604_s28 + $0x480] sm:$0xff]  ;;  %v610_v49 = vld [vmem:[%s4604_s28 + $0x488] sm:$0xff] }
  0x29   : > { %603 = vst [vmem:[%s4612_s29 + $0x168] sm:$0xff] %v602_v45  ;;  %605 = vst [vmem:[%s4612_s29 + $0x170] sm:$0xff] %v604_v46  ;;  %v612_v50 = vld [vmem:[%s4604_s28 + $0x490] sm:$0xff]  ;;  %v614_v51 = vld [vmem:[%s4604_s28 + $0x498] sm:$0xff] }
  0x2a   : > { %607 = vst [vmem:[%s4612_s29 + $0x178] sm:$0xff] %v606_v47  ;;  %609 = vst [vmem:[%s4612_s29 + $0x180] sm:$0xff] %v608_v48  ;;  %v616_v52 = vld [vmem:[%s4604_s28 + $0x4a0] sm:$0xff]  ;;  %v618_v53 = vld [vmem:[%s4604_s28 + $0x4a8] sm:$0xff] }
  0x2b   : > { %611 = vst [vmem:[%s4612_s29 + $0x188] sm:$0xff] %v610_v49  ;;  %613 = vst [vmem:[%s4612_s29 + $0x190] sm:$0xff] %v612_v50  ;;  %v620_v54 = vld [vmem:[%s4604_s28 + $0x4b0] sm:$0xff]  ;;  %v622_v55 = vld [vmem:[%s4604_s28 + $0x4b8] sm:$0xff] }
  0x2c   : > { %615 = vst [vmem:[%s4612_s29 + $0x198] sm:$0xff] %v614_v51  ;;  %617 = vst [vmem:[%s4612_s29 + $0x1a0] sm:$0xff] %v616_v52  ;;  %v624_v56 = vld [vmem:[%s4604_s28 + $0x4c0] sm:$0xff]  ;;  %v626_v57 = vld [vmem:[%s4604_s28 + $0x4c8] sm:$0xff] }
  0x2d   : > { %619 = vst [vmem:[%s4612_s29 + $0x1a8] sm:$0xff] %v618_v53  ;;  %621 = vst [vmem:[%s4612_s29 + $0x1b0] sm:$0xff] %v620_v54  ;;  %v628_v58 = vld [vmem:[%s4604_s28 + $0x4d0] sm:$0xff]  ;;  %v630_v59 = vld [vmem:[%s4604_s28 + $0x4d8] sm:$0xff] }
  0x2e   : > { %623 = vst [vmem:[%s4612_s29 + $0x1b8] sm:$0xff] %v622_v55  ;;  %625 = vst [vmem:[%s4612_s29 + $0x1c0] sm:$0xff] %v624_v56  ;;  %v632_v60 = vld [vmem:[%s4604_s28 + $0x4e0] sm:$0xff]  ;;  %v634_v61 = vld [vmem:[%s4604_s28 + $0x4e8] sm:$0xff] }
  0x2f   : > { %627 = vst [vmem:[%s4612_s29 + $0x1c8] sm:$0xff] %v626_v57  ;;  %629 = vst [vmem:[%s4612_s29 + $0x1d0] sm:$0xff] %v628_v58  ;;  %v636_v62 = vld [vmem:[%s4604_s28 + $0x4f0] sm:$0xff]  ;;  %v638_v63 = vld [vmem:[%s4604_s28 + $0x4f8] sm:$0xff] }
  0x30   : > { %631 = vst [vmem:[%s4612_s29 + $0x1d8] sm:$0xff] %v630_v59  ;;  %633 = vst [vmem:[%s4612_s29 + $0x1e0] sm:$0xff] %v632_v60  ;;  %v640_v0 = vld [vmem:[%s4604_s28 + $0x800] sm:$0xff]  ;;  %v642_v1 = vld [vmem:[%s4604_s28 + $0x808] sm:$0xff] }
  0x31   : > { %635 = vst [vmem:[%s4612_s29 + $0x1e8] sm:$0xff] %v634_v61  ;;  %637 = vst [vmem:[%s4612_s29 + $0x1f0] sm:$0xff] %v636_v62  ;;  %v644_v2 = vld [vmem:[%s4604_s28 + $0x810] sm:$0xff]  ;;  %v646_v3 = vld [vmem:[%s4604_s28 + $0x818] sm:$0xff] }
  0x32   : > { %639 = vst [vmem:[%s4612_s29 + $0x1f8] sm:$0xff] %v638_v63  ;;  %641 = vst [vmem:[%s4612_s29 + $0x200] sm:$0xff] %v640_v0  ;;  %v648_v4 = vld [vmem:[%s4604_s28 + $0x820] sm:$0xff]  ;;  %v650_v5 = vld [vmem:[%s4604_s28 + $0x828] sm:$0xff] }
  0x33   : > { %643 = vst [vmem:[%s4612_s29 + $0x208] sm:$0xff] %v642_v1  ;;  %645 = vst [vmem:[%s4612_s29 + $0x210] sm:$0xff] %v644_v2  ;;  %v652_v6 = vld [vmem:[%s4604_s28 + $0x830] sm:$0xff]  ;;  %v654_v7 = vld [vmem:[%s4604_s28 + $0x838] sm:$0xff] }
  0x34   : > { %647 = vst [vmem:[%s4612_s29 + $0x218] sm:$0xff] %v646_v3  ;;  %649 = vst [vmem:[%s4612_s29 + $0x220] sm:$0xff] %v648_v4  ;;  %v656_v8 = vld [vmem:[%s4604_s28 + $0x840] sm:$0xff]  ;;  %v658_v9 = vld [vmem:[%s4604_s28 + $0x848] sm:$0xff] }
  0x35   : > { %651 = vst [vmem:[%s4612_s29 + $0x228] sm:$0xff] %v650_v5  ;;  %653 = vst [vmem:[%s4612_s29 + $0x230] sm:$0xff] %v652_v6  ;;  %v660_v10 = vld [vmem:[%s4604_s28 + $0x850] sm:$0xff]  ;;  %v662_v11 = vld [vmem:[%s4604_s28 + $0x858] sm:$0xff] }
  0x36   : > { %655 = vst [vmem:[%s4612_s29 + $0x238] sm:$0xff] %v654_v7  ;;  %657 = vst [vmem:[%s4612_s29 + $0x240] sm:$0xff] %v656_v8  ;;  %v664_v12 = vld [vmem:[%s4604_s28 + $0x860] sm:$0xff]  ;;  %v666_v13 = vld [vmem:[%s4604_s28 + $0x868] sm:$0xff] }
  0x37   : > { %659 = vst [vmem:[%s4612_s29 + $0x248] sm:$0xff] %v658_v9  ;;  %661 = vst [vmem:[%s4612_s29 + $0x250] sm:$0xff] %v660_v10  ;;  %v668_v14 = vld [vmem:[%s4604_s28 + $0x870] sm:$0xff]  ;;  %v670_v15 = vld [vmem:[%s4604_s28 + $0x878] sm:$0xff] }
  0x38   : > { %663 = vst [vmem:[%s4612_s29 + $0x258] sm:$0xff] %v662_v11  ;;  %665 = vst [vmem:[%s4612_s29 + $0x260] sm:$0xff] %v664_v12  ;;  %v672_v16 = vld [vmem:[%s4604_s28 + $0x880] sm:$0xff]  ;;  %v674_v17 = vld [vmem:[%s4604_s28 + $0x888] sm:$0xff] }
  0x39   : > { %667 = vst [vmem:[%s4612_s29 + $0x268] sm:$0xff] %v666_v13  ;;  %669 = vst [vmem:[%s4612_s29 + $0x270] sm:$0xff] %v668_v14  ;;  %v676_v18 = vld [vmem:[%s4604_s28 + $0x890] sm:$0xff]  ;;  %v678_v19 = vld [vmem:[%s4604_s28 + $0x898] sm:$0xff] }
  0x3a   : > { %671 = vst [vmem:[%s4612_s29 + $0x278] sm:$0xff] %v670_v15  ;;  %673 = vst [vmem:[%s4612_s29 + $0x280] sm:$0xff] %v672_v16  ;;  %v680_v20 = vld [vmem:[%s4604_s28 + $0x8a0] sm:$0xff]  ;;  %v682_v21 = vld [vmem:[%s4604_s28 + $0x8a8] sm:$0xff] }
  0x3b   : > { %675 = vst [vmem:[%s4612_s29 + $0x288] sm:$0xff] %v674_v17  ;;  %677 = vst [vmem:[%s4612_s29 + $0x290] sm:$0xff] %v676_v18  ;;  %v684_v22 = vld [vmem:[%s4604_s28 + $0x8b0] sm:$0xff]  ;;  %v686_v23 = vld [vmem:[%s4604_s28 + $0x8b8] sm:$0xff] }
  0x3c   : > { %679 = vst [vmem:[%s4612_s29 + $0x298] sm:$0xff] %v678_v19  ;;  %681 = vst [vmem:[%s4612_s29 + $0x2a0] sm:$0xff] %v680_v20  ;;  %v688_v24 = vld [vmem:[%s4604_s28 + $0x8c0] sm:$0xff]  ;;  %v690_v25 = vld [vmem:[%s4604_s28 + $0x8c8] sm:$0xff] }
  0x3d   : > { %683 = vst [vmem:[%s4612_s29 + $0x2a8] sm:$0xff] %v682_v21  ;;  %685 = vst [vmem:[%s4612_s29 + $0x2b0] sm:$0xff] %v684_v22  ;;  %v692_v26 = vld [vmem:[%s4604_s28 + $0x8d0] sm:$0xff]  ;;  %v694_v27 = vld [vmem:[%s4604_s28 + $0x8d8] sm:$0xff] }
  0x3e   : > { %687 = vst [vmem:[%s4612_s29 + $0x2b8] sm:$0xff] %v686_v23  ;;  %689 = vst [vmem:[%s4612_s29 + $0x2c0] sm:$0xff] %v688_v24  ;;  %v696_v28 = vld [vmem:[%s4604_s28 + $0x8e0] sm:$0xff]  ;;  %v698_v29 = vld [vmem:[%s4604_s28 + $0x8e8] sm:$0xff] }
  0x3f   : > { %691 = vst [vmem:[%s4612_s29 + $0x2c8] sm:$0xff] %v690_v25  ;;  %693 = vst [vmem:[%s4612_s29 + $0x2d0] sm:$0xff] %v692_v26  ;;  %v700_v30 = vld [vmem:[%s4604_s28 + $0x8f0] sm:$0xff]  ;;  %v702_v31 = vld [vmem:[%s4604_s28 + $0x8f8] sm:$0xff] }
  0x40   : > { %695 = vst [vmem:[%s4612_s29 + $0x2d8] sm:$0xff] %v694_v27  ;;  %697 = vst [vmem:[%s4612_s29 + $0x2e0] sm:$0xff] %v696_v28  ;;  %v704_v32 = vld [vmem:[%s4604_s28 + $0xc00] sm:$0xff]  ;;  %v706_v33 = vld [vmem:[%s4604_s28 + $0xc08] sm:$0xff] }
  0x41   : > { %699 = vst [vmem:[%s4612_s29 + $0x2e8] sm:$0xff] %v698_v29  ;;  %701 = vst [vmem:[%s4612_s29 + $0x2f0] sm:$0xff] %v700_v30  ;;  %v708_v34 = vld [vmem:[%s4604_s28 + $0xc10] sm:$0xff]  ;;  %v710_v35 = vld [vmem:[%s4604_s28 + $0xc18] sm:$0xff] }
  0x42   : > { %703 = vst [vmem:[%s4612_s29 + $0x2f8] sm:$0xff] %v702_v31  ;;  %705 = vst [vmem:[%s4612_s29 + $0x300] sm:$0xff] %v704_v32  ;;  %v712_v36 = vld [vmem:[%s4604_s28 + $0xc20] sm:$0xff]  ;;  %v714_v37 = vld [vmem:[%s4604_s28 + $0xc28] sm:$0xff] }
  0x43   : > { %707 = vst [vmem:[%s4612_s29 + $0x308] sm:$0xff] %v706_v33  ;;  %709 = vst [vmem:[%s4612_s29 + $0x310] sm:$0xff] %v708_v34  ;;  %v716_v38 = vld [vmem:[%s4604_s28 + $0xc30] sm:$0xff]  ;;  %v718_v39 = vld [vmem:[%s4604_s28 + $0xc38] sm:$0xff] }
  0x44   : > { %711 = vst [vmem:[%s4612_s29 + $0x318] sm:$0xff] %v710_v35  ;;  %713 = vst [vmem:[%s4612_s29 + $0x320] sm:$0xff] %v712_v36  ;;  %v720_v40 = vld [vmem:[%s4604_s28 + $0xc40] sm:$0xff]  ;;  %v722_v41 = vld [vmem:[%s4604_s28 + $0xc48] sm:$0xff] }
  0x45   : > { %715 = vst [vmem:[%s4612_s29 + $0x328] sm:$0xff] %v714_v37  ;;  %717 = vst [vmem:[%s4612_s29 + $0x330] sm:$0xff] %v716_v38  ;;  %v724_v42 = vld [vmem:[%s4604_s28 + $0xc50] sm:$0xff]  ;;  %v726_v43 = vld [vmem:[%s4604_s28 + $0xc58] sm:$0xff] }
  0x46   : > { %719 = vst [vmem:[%s4612_s29 + $0x338] sm:$0xff] %v718_v39  ;;  %721 = vst [vmem:[%s4612_s29 + $0x340] sm:$0xff] %v720_v40  ;;  %v728_v44 = vld [vmem:[%s4604_s28 + $0xc60] sm:$0xff]  ;;  %v730_v45 = vld [vmem:[%s4604_s28 + $0xc68] sm:$0xff] }
  0x47   : > { %723 = vst [vmem:[%s4612_s29 + $0x348] sm:$0xff] %v722_v41  ;;  %725 = vst [vmem:[%s4612_s29 + $0x350] sm:$0xff] %v724_v42  ;;  %v732_v46 = vld [vmem:[%s4604_s28 + $0xc70] sm:$0xff]  ;;  %v734_v47 = vld [vmem:[%s4604_s28 + $0xc78] sm:$0xff] }
  0x48   : > { %727 = vst [vmem:[%s4612_s29 + $0x358] sm:$0xff] %v726_v43  ;;  %729 = vst [vmem:[%s4612_s29 + $0x360] sm:$0xff] %v728_v44  ;;  %v736_v48 = vld [vmem:[%s4604_s28 + $0xc80] sm:$0xff]  ;;  %v738_v49 = vld [vmem:[%s4604_s28 + $0xc88] sm:$0xff] }
  0x49   : > { %731 = vst [vmem:[%s4612_s29 + $0x368] sm:$0xff] %v730_v45  ;;  %733 = vst [vmem:[%s4612_s29 + $0x370] sm:$0xff] %v732_v46  ;;  %v740_v50 = vld [vmem:[%s4604_s28 + $0xc90] sm:$0xff]  ;;  %v742_v51 = vld [vmem:[%s4604_s28 + $0xc98] sm:$0xff] }
  0x4a   : > { %735 = vst [vmem:[%s4612_s29 + $0x378] sm:$0xff] %v734_v47  ;;  %737 = vst [vmem:[%s4612_s29 + $0x380] sm:$0xff] %v736_v48  ;;  %v744_v52 = vld [vmem:[%s4604_s28 + $0xca0] sm:$0xff]  ;;  %v746_v53 = vld [vmem:[%s4604_s28 + $0xca8] sm:$0xff] }
  0x4b   : > { %739 = vst [vmem:[%s4612_s29 + $0x388] sm:$0xff] %v738_v49  ;;  %741 = vst [vmem:[%s4612_s29 + $0x390] sm:$0xff] %v740_v50  ;;  %v748_v54 = vld [vmem:[%s4604_s28 + $0xcb0] sm:$0xff]  ;;  %v750_v55 = vld [vmem:[%s4604_s28 + $0xcb8] sm:$0xff] }
  0x4c   : > { %743 = vst [vmem:[%s4612_s29 + $0x398] sm:$0xff] %v742_v51  ;;  %745 = vst [vmem:[%s4612_s29 + $0x3a0] sm:$0xff] %v744_v52  ;;  %v752_v56 = vld [vmem:[%s4604_s28 + $0xcc0] sm:$0xff]  ;;  %v754_v57 = vld [vmem:[%s4604_s28 + $0xcc8] sm:$0xff] }
  0x4d   : > { %747 = vst [vmem:[%s4612_s29 + $0x3a8] sm:$0xff] %v746_v53  ;;  %749 = vst [vmem:[%s4612_s29 + $0x3b0] sm:$0xff] %v748_v54  ;;  %v756_v58 = vld [vmem:[%s4604_s28 + $0xcd0] sm:$0xff]  ;;  %v758_v59 = vld [vmem:[%s4604_s28 + $0xcd8] sm:$0xff] }
  0x4e   : > { %751 = vst [vmem:[%s4612_s29 + $0x3b8] sm:$0xff] %v750_v55  ;;  %753 = vst [vmem:[%s4612_s29 + $0x3c0] sm:$0xff] %v752_v56  ;;  %v760_v60 = vld [vmem:[%s4604_s28 + $0xce0] sm:$0xff]  ;;  %v762_v61 = vld [vmem:[%s4604_s28 + $0xce8] sm:$0xff] }
  0x4f   : > { %755 = vst [vmem:[%s4612_s29 + $0x3c8] sm:$0xff] %v754_v57  ;;  %757 = vst [vmem:[%s4612_s29 + $0x3d0] sm:$0xff] %v756_v58  ;;  %v764_v62 = vld [vmem:[%s4604_s28 + $0xcf0] sm:$0xff]  ;;  %v766_v63 = vld [vmem:[%s4604_s28 + $0xcf8] sm:$0xff] }
  0x50   : > { %759 = vst [vmem:[%s4612_s29 + $0x3d8] sm:$0xff] %v758_v59  ;;  %761 = vst [vmem:[%s4612_s29 + $0x3e0] sm:$0xff] %v760_v60  ;;  %v768_v0 = vld [vmem:[%s4604_s28 + $0x1000] sm:$0xff]  ;;  %v770_v1 = vld [vmem:[%s4604_s28 + $0x1008] sm:$0xff] }
  0x51   : > { %763 = vst [vmem:[%s4612_s29 + $0x3e8] sm:$0xff] %v762_v61  ;;  %765 = vst [vmem:[%s4612_s29 + $0x3f0] sm:$0xff] %v764_v62  ;;  %v772_v2 = vld [vmem:[%s4604_s28 + $0x1010] sm:$0xff]  ;;  %v774_v3 = vld [vmem:[%s4604_s28 + $0x1018] sm:$0xff] }
  0x52   : > { %767 = vst [vmem:[%s4612_s29 + $0x3f8] sm:$0xff] %v766_v63  ;;  %769 = vst [vmem:[%s4612_s29 + $0x400] sm:$0xff] %v768_v0  ;;  %v776_v4 = vld [vmem:[%s4604_s28 + $0x1020] sm:$0xff]  ;;  %v778_v5 = vld [vmem:[%s4604_s28 + $0x1028] sm:$0xff] }
  0x53   : > { %771 = vst [vmem:[%s4612_s29 + $0x408] sm:$0xff] %v770_v1  ;;  %773 = vst [vmem:[%s4612_s29 + $0x410] sm:$0xff] %v772_v2  ;;  %v780_v6 = vld [vmem:[%s4604_s28 + $0x1030] sm:$0xff]  ;;  %v782_v7 = vld [vmem:[%s4604_s28 + $0x1038] sm:$0xff] }
  0x54   : > { %775 = vst [vmem:[%s4612_s29 + $0x418] sm:$0xff] %v774_v3  ;;  %777 = vst [vmem:[%s4612_s29 + $0x420] sm:$0xff] %v776_v4  ;;  %v784_v8 = vld [vmem:[%s4604_s28 + $0x1040] sm:$0xff]  ;;  %v786_v9 = vld [vmem:[%s4604_s28 + $0x1048] sm:$0xff] }
  0x55   : > { %779 = vst [vmem:[%s4612_s29 + $0x428] sm:$0xff] %v778_v5  ;;  %781 = vst [vmem:[%s4612_s29 + $0x430] sm:$0xff] %v780_v6  ;;  %v788_v10 = vld [vmem:[%s4604_s28 + $0x1050] sm:$0xff]  ;;  %v790_v11 = vld [vmem:[%s4604_s28 + $0x1058] sm:$0xff] }
  0x56   : > { %783 = vst [vmem:[%s4612_s29 + $0x438] sm:$0xff] %v782_v7  ;;  %785 = vst [vmem:[%s4612_s29 + $0x440] sm:$0xff] %v784_v8  ;;  %v792_v12 = vld [vmem:[%s4604_s28 + $0x1060] sm:$0xff]  ;;  %v794_v13 = vld [vmem:[%s4604_s28 + $0x1068] sm:$0xff] }
  0x57   : > { %787 = vst [vmem:[%s4612_s29 + $0x448] sm:$0xff] %v786_v9  ;;  %789 = vst [vmem:[%s4612_s29 + $0x450] sm:$0xff] %v788_v10  ;;  %v796_v14 = vld [vmem:[%s4604_s28 + $0x1070] sm:$0xff]  ;;  %v798_v15 = vld [vmem:[%s4604_s28 + $0x1078] sm:$0xff] }
  0x58   : > { %791 = vst [vmem:[%s4612_s29 + $0x458] sm:$0xff] %v790_v11  ;;  %793 = vst [vmem:[%s4612_s29 + $0x460] sm:$0xff] %v792_v12  ;;  %v800_v16 = vld [vmem:[%s4604_s28 + $0x1080] sm:$0xff]  ;;  %v802_v17 = vld [vmem:[%s4604_s28 + $0x1088] sm:$0xff] }
  0x59   : > { %795 = vst [vmem:[%s4612_s29 + $0x468] sm:$0xff] %v794_v13  ;;  %797 = vst [vmem:[%s4612_s29 + $0x470] sm:$0xff] %v796_v14  ;;  %v804_v18 = vld [vmem:[%s4604_s28 + $0x1090] sm:$0xff]  ;;  %v806_v19 = vld [vmem:[%s4604_s28 + $0x1098] sm:$0xff] }
  0x5a   : > { %799 = vst [vmem:[%s4612_s29 + $0x478] sm:$0xff] %v798_v15  ;;  %801 = vst [vmem:[%s4612_s29 + $0x480] sm:$0xff] %v800_v16  ;;  %v808_v20 = vld [vmem:[%s4604_s28 + $0x10a0] sm:$0xff]  ;;  %v810_v21 = vld [vmem:[%s4604_s28 + $0x10a8] sm:$0xff] }
  0x5b   : > { %803 = vst [vmem:[%s4612_s29 + $0x488] sm:$0xff] %v802_v17  ;;  %805 = vst [vmem:[%s4612_s29 + $0x490] sm:$0xff] %v804_v18  ;;  %v812_v22 = vld [vmem:[%s4604_s28 + $0x10b0] sm:$0xff]  ;;  %v814_v23 = vld [vmem:[%s4604_s28 + $0x10b8] sm:$0xff] }
  0x5c   : > { %807 = vst [vmem:[%s4612_s29 + $0x498] sm:$0xff] %v806_v19  ;;  %809 = vst [vmem:[%s4612_s29 + $0x4a0] sm:$0xff] %v808_v20  ;;  %v816_v24 = vld [vmem:[%s4604_s28 + $0x10c0] sm:$0xff]  ;;  %v818_v25 = vld [vmem:[%s4604_s28 + $0x10c8] sm:$0xff] }
  0x5d   : > { %811 = vst [vmem:[%s4612_s29 + $0x4a8] sm:$0xff] %v810_v21  ;;  %813 = vst [vmem:[%s4612_s29 + $0x4b0] sm:$0xff] %v812_v22  ;;  %v820_v26 = vld [vmem:[%s4604_s28 + $0x10d0] sm:$0xff]  ;;  %v822_v27 = vld [vmem:[%s4604_s28 + $0x10d8] sm:$0xff] }
  0x5e   : > { %815 = vst [vmem:[%s4612_s29 + $0x4b8] sm:$0xff] %v814_v23  ;;  %817 = vst [vmem:[%s4612_s29 + $0x4c0] sm:$0xff] %v816_v24  ;;  %v824_v28 = vld [vmem:[%s4604_s28 + $0x10e0] sm:$0xff]  ;;  %v826_v29 = vld [vmem:[%s4604_s28 + $0x10e8] sm:$0xff] }
  0x5f   : > { %819 = vst [vmem:[%s4612_s29 + $0x4c8] sm:$0xff] %v818_v25  ;;  %821 = vst [vmem:[%s4612_s29 + $0x4d0] sm:$0xff] %v820_v26  ;;  %v828_v30 = vld [vmem:[%s4604_s28 + $0x10f0] sm:$0xff]  ;;  %v830_v31 = vld [vmem:[%s4604_s28 + $0x10f8] sm:$0xff] }
  0x60   : > { %823 = vst [vmem:[%s4612_s29 + $0x4d8] sm:$0xff] %v822_v27  ;;  %825 = vst [vmem:[%s4612_s29 + $0x4e0] sm:$0xff] %v824_v28 }
  0x61   : > { %827 = vst [vmem:[%s4612_s29 + $0x4e8] sm:$0xff] %v826_v29  ;;  %829 = vst [vmem:[%s4612_s29 + $0x4f0] sm:$0xff] %v828_v30 }
  0x62   : > { %831 = vst [vmem:[%s4612_s29 + $0x4f8] sm:$0xff] %v830_v31 }
  0x63 PF: > { %p3642_p5 = scmp.ge.s32.totalorder %s4542_s17, 1  ;;  %p855_p6 = scmp.lt.s32.totalorder %s4542_s17, 5 }
  0x65   : > { %p856_p7 = pnand %p3642_p5, %p855_p6 }
  0x67   : > { %859 = sbr.rel (%p856_p7) target bundleno = 1513 (0x5e9), region = 70 }
  0x6e   : > { %s862_s30 = sand.u32 1, %s4534_s15   ;;  %s5036_s7 = sshll.u32 %s3636_s18, 4  ;;  %vm1709_vm0 = vcmask 261120  }
  0x6f   : > { %s4325_s5 = smul.u32 1280, %s862_s30  ;;  %p906_p8 = scmp.lt.s32.totalorder %s5036_s7, 63 }
  0x70   : > { %s3643_s12 = sshll.u32 %s3636_s18, 5  ;;  %s4544_s21 = smov 96  }
  0x71   : > { %s4931_s6 = scalar_lea.vmem [#allocation2], %s4325_s5  ;;  %s6559_s7 = smov (!%p906_p8, %s5036_s7), 63 }
  0x72   : > { %v935_v32 = vld [vmem:[%s4931_s6 + $0x80] sm:$0xff]  ;;  %v936_v33 = vld [vmem:[%s4931_s6 + $0x88] sm:$0xff]  ;;  %v937_v56 = vld [vmem:[%s4931_s6 + $0x90] sm:$0xff]  ;;  %s4326_s8 = smul.u32 24, %s6559_s7  ;;  %p900_p9 = scmp.lt.s32.totalorder %s3643_s12, 127 }
  0x73   : > { %v3665_v34 = vld [vmem:[%s4931_s6 + $0x180] sm:$0xff]  ;;  %v3666_v35 = vld [vmem:[%s4931_s6 + $0x188] sm:$0xff]  ;;  %v938_v57 = vld [vmem:[%s4931_s6 + $0x98] sm:$0xff] }
  0x74   : > { %v3697_v36 = vld [vmem:[%s4931_s6 + $0x280] sm:$0xff]  ;;  %v3698_v37 = vld [vmem:[%s4931_s6 + $0x288] sm:$0xff]  ;;  %v3667_v60 = vld [vmem:[%s4931_s6 + $0x190] sm:$0xff]  ;;  %s5116_s11 = scalar_lea.vmem %s6512_s2, %s4326_s8  ;;  %s6561_s12 = smov (!%p900_p9, %s3643_s12), 127 }
  0x75   : > { %v3729_v38 = vld [vmem:[%s4931_s6 + $0x380] sm:$0xff]  ;;  %v3730_v39 = vld [vmem:[%s4931_s6 + $0x388] sm:$0xff]  ;;  %v1099_v40 = vmul.f32 %v3697_v36, %v935_v32  ;;  %v1100_v41 = vmul.f32 %v3698_v37, %v936_v33  ;;  %v3668_v61 = vld [vmem:[%s4931_s6 + $0x198] sm:$0xff]  ;;  %s3644_s13 = sshll.u32 %s6561_s12, 3 }
  0x76   : > { %v919_v42 = vld [vmem:[%s4931_s6] sm:$0xff]  ;;  %v1131_v43 = vmul.f32 %v3729_v38, %v3665_v34  ;;  %v1132_v44 = vmul.f32 %v3730_v39, %v3666_v35  ;;  %v920_v45 = vld [vmem:[%s4931_s6 + $0x8] sm:$0xff]  ;;  %v3699_v62 = vld [vmem:[%s4931_s6 + $0x290] sm:$0xff]  ;;  %s5183_s20 = scalar_lea.vmem %s6511_s1, %s3644_s13  ;;  %s6342_s18 = scalar_lea.vmem %s6514_s4, %s3644_s13 }
  0x77   : > { %v3649_v46 = vld [vmem:[%s4931_s6 + $0x100] sm:$0xff]  ;;  %v3650_v47 = vld [vmem:[%s4931_s6 + $0x108] sm:$0xff]  ;;  %v3700_v0 = vld [vmem:[%s4931_s6 + $0x298] sm:$0xff]  ;;  %v1101_v3 = vmul.f32 %v3699_v62, %v937_v56 }
  0x78   : > { %v3681_v48 = vld [vmem:[%s4931_s6 + $0x200] sm:$0xff]  ;;  %v3682_v49 = vld [vmem:[%s4931_s6 + $0x208] sm:$0xff]  ;;  %v1163_v51 = vadd.f32 %v1131_v43, %v1099_v40  ;;  %v1164_v52 = vadd.f32 %v1132_v44, %v1100_v41  ;;  %v3731_v1 = vld [vmem:[%s4931_s6 + $0x390] sm:$0xff]  ;;  %v1102_v6 = vmul.f32 %v3700_v0, %v938_v57 }
  0x79   : > { %v3713_v50 = vld [vmem:[%s4931_s6 + $0x300] sm:$0xff]  ;;  %v3714_v53 = vld [vmem:[%s4931_s6 + $0x308] sm:$0xff]  ;;  %v1083_v54 = vmul.f32 %v3681_v48, %v919_v42  ;;  %v1084_v55 = vmul.f32 %v3682_v49, %v920_v45  ;;  %v3732_v2 = vld [vmem:[%s4931_s6 + $0x398] sm:$0xff]  ;;  %v1133_v7 = vmul.f32 %v3731_v1, %v3667_v60 }
  0x7a   : > { %v1115_v58 = vmul.f32 %v3713_v50, %v3649_v46  ;;  %v1116_v59 = vmul.f32 %v3714_v53, %v3650_v47  ;;  %v4954_v63 = vpack.c.bf16 %v1164_v52, %v1163_v51  ;;  %v921_v8 = vld [vmem:[%s4931_s6 + $0x10] sm:$0xff]  ;;  %v922_v9 = vld [vmem:[%s4931_s6 + $0x18] sm:$0xff]  ;;  %v1134_v11 = vmul.f32 %v3732_v2, %v3668_v61  ;;  %v939_v21 = vld [vmem:[%s4931_s6 + $0xa0] sm:$0xff] }
  0x7b   : > { %v3651_v10 = vld [vmem:[%s4931_s6 + $0x110] sm:$0xff]  ;;  %v3652_v12 = vld [vmem:[%s4931_s6 + $0x118] sm:$0xff]  ;;  %v1165_v16 = vadd.f32 %v1133_v7, %v1101_v3  ;;  %v940_v25 = vld [vmem:[%s4931_s6 + $0xa8] sm:$0xff] }
  0x7c   : > { %v1147_v4 = vadd.f32 %v1115_v58, %v1083_v54  ;;  %v1148_v5 = vadd.f32 %v1116_v59, %v1084_v55  ;;  %4213 = vmatprep.subr.bf16.mxu0 %v4954_v63  ;;  %v3683_v13 = vld [vmem:[%s4931_s6 + $0x210] sm:$0xff]  ;;  %v3684_v14 = vld [vmem:[%s4931_s6 + $0x218] sm:$0xff]  ;;  %4276 = vmatprep.subr.bf16.mxu1 %v4954_v63  ;;  %v1166_v22 = vadd.f32 %v1134_v11, %v1102_v6  ;;  %v3669_v26 = vld [vmem:[%s4931_s6 + $0x1a0] sm:$0xff] }
  0x7d   : > { %v3715_v17 = vld [vmem:[%s4931_s6 + $0x310] sm:$0xff]  ;;  %v3716_v18 = vld [vmem:[%s4931_s6 + $0x318] sm:$0xff]  ;;  %v1085_v19 = vmul.f32 %v3683_v13, %v921_v8  ;;  %v1086_v20 = vmul.f32 %v3684_v14, %v922_v9  ;;  %v3670_v27 = vld [vmem:[%s4931_s6 + $0x1a8] sm:$0xff] }
  0x7e   : > { %v4967_v15 = vpack.c.bf16 %v1148_v5, %v1147_v4  ;;  %v1117_v23 = vmul.f32 %v3715_v17, %v3651_v10  ;;  %v1118_v24 = vmul.f32 %v3716_v18, %v3652_v12  ;;  %v3701_v28 = vld [vmem:[%s4931_s6 + $0x2a0] sm:$0xff]  ;;  %v3702_v29 = vld [vmem:[%s4931_s6 + $0x2a8] sm:$0xff]  ;;  %v4980_v31 = vpack.c.bf16 %v1166_v22, %v1165_v16  ;;  %v941_v53 = vld [vmem:[%s4931_s6 + $0xb0] sm:$0xff] }
  0x7f   : > { %v3733_v30 = vld [vmem:[%s4931_s6 + $0x3a0] sm:$0xff]  ;;  %v3734_v34 = vld [vmem:[%s4931_s6 + $0x3a8] sm:$0xff]  ;;  %v1103_v35 = vmul.f32 %v3701_v28, %v939_v21  ;;  %v1104_v38 = vmul.f32 %v3702_v29, %v940_v25  ;;  %v942_v54 = vld [vmem:[%s4931_s6 + $0xb8] sm:$0xff] }
  0x80   : > { %4215 = vmatpush3.bf16.msra.mxu0 %v4967_v15  ;;  %4284 = vmatpush3.bf16.msra.mxu1 %v4967_v15  ;;  %v1149_v32 = vadd.f32 %v1117_v23, %v1085_v19  ;;  %v1150_v33 = vadd.f32 %v1118_v24, %v1086_v20  ;;  %v923_v36 = vld [vmem:[%s4931_s6 + $0x20] sm:$0xff]  ;;  %v924_v37 = vld [vmem:[%s4931_s6 + $0x28] sm:$0xff]  ;;  %v1135_v39 = vmul.f32 %v3733_v30, %v3669_v26  ;;  %v3671_v55 = vld [vmem:[%s4931_s6 + $0x1b0] sm:$0xff] }
  0x81   : > { %v1136_v40 = vmul.f32 %v3734_v34, %v3670_v27  ;;  %v3653_v41 = vld [vmem:[%s4931_s6 + $0x120] sm:$0xff]  ;;  %v3654_v42 = vld [vmem:[%s4931_s6 + $0x128] sm:$0xff]  ;;  %4217 = vmatprep.subr.bf16.mxu0 %v4980_v31  ;;  %4277 = vmatprep.subr.bf16.mxu1 %v4980_v31  ;;  %v3672_v57 = vld [vmem:[%s4931_s6 + $0x1b8] sm:$0xff] }
  0x82   : > { %v3685_v43 = vld [vmem:[%s4931_s6 + $0x220] sm:$0xff]  ;;  %v4989_v44 = vpack.c.bf16 %v1150_v33, %v1149_v32  ;;  %v3686_v45 = vld [vmem:[%s4931_s6 + $0x228] sm:$0xff]  ;;  %v1167_v49 = vadd.f32 %v1135_v39, %v1103_v35  ;;  %v3703_v58 = vld [vmem:[%s4931_s6 + $0x2b0] sm:$0xff] }
  0x83   : > { %v3717_v46 = vld [vmem:[%s4931_s6 + $0x320] sm:$0xff]  ;;  %v3718_v47 = vld [vmem:[%s4931_s6 + $0x328] sm:$0xff]  ;;  %v1087_v48 = vmul.f32 %v3685_v43, %v923_v36  ;;  %v1168_v50 = vadd.f32 %v1136_v40, %v1104_v38  ;;  %v1088_v51 = vmul.f32 %v3686_v45, %v924_v37  ;;  %v3704_v59 = vld [vmem:[%s4931_s6 + $0x2b8] sm:$0xff]  ;;  %v1105_v1 = vmul.f32 %v3703_v58, %v941_v53 }
  0x84   : > { %v1119_v52 = vmul.f32 %v3717_v46, %v3653_v41  ;;  %4219 = vmatpush3.bf16.msra.mxu0 %v4989_v44  ;;  %v1120_v56 = vmul.f32 %v3718_v47, %v3654_v42  ;;  %4285 = vmatpush3.bf16.msra.mxu1 %v4989_v44  ;;  %v3735_v62 = vld [vmem:[%s4931_s6 + $0x3b0] sm:$0xff]  ;;  %v3736_v0 = vld [vmem:[%s4931_s6 + $0x3b8] sm:$0xff]  ;;  %v1106_v2 = vmul.f32 %v3704_v59, %v942_v54  ;;  %v943_v19 = vld [vmem:[%s4931_s6 + $0xc0] sm:$0xff] }
  0x85   : > { %v5003_v60 = vpack.c.bf16 %v1168_v50, %v1167_v49  ;;  %v925_v3 = vld [vmem:[%s4931_s6 + $0x30] sm:$0xff]  ;;  %v1137_v5 = vmul.f32 %v3735_v62, %v3671_v55  ;;  %v1138_v6 = vmul.f32 %v3736_v0, %v3672_v57  ;;  %v926_v7 = vld [vmem:[%s4931_s6 + $0x38] sm:$0xff]  ;;  %v944_v20 = vld [vmem:[%s4931_s6 + $0xc8] sm:$0xff] }
  0x86   : > { %v1151_v61 = vadd.f32 %v1119_v52, %v1087_v48  ;;  %v1152_v4 = vadd.f32 %v1120_v56, %v1088_v51  ;;  %v3655_v8 = vld [vmem:[%s4931_s6 + $0x130] sm:$0xff]  ;;  %v3656_v9 = vld [vmem:[%s4931_s6 + $0x138] sm:$0xff]  ;;  %v3673_v24 = vld [vmem:[%s4931_s6 + $0x1c0] sm:$0xff] }
  0x87   : > { %4221 = vmatprep.subr.bf16.mxu0 %v5003_v60  ;;  %v3687_v10 = vld [vmem:[%s4931_s6 + $0x230] sm:$0xff]  ;;  %v3688_v11 = vld [vmem:[%s4931_s6 + $0x238] sm:$0xff]  ;;  %4278 = vmatprep.subr.bf16.mxu1 %v5003_v60  ;;  %v1169_v14 = vadd.f32 %v1137_v5, %v1105_v1  ;;  %v1170_v16 = vadd.f32 %v1138_v6, %v1106_v2  ;;  %v3674_v25 = vld [vmem:[%s4931_s6 + $0x1c8] sm:$0xff] }
  0x88   : > { %v3719_v12 = vld [vmem:[%s4931_s6 + $0x330] sm:$0xff]  ;;  %v5016_v13 = vpack.c.bf16 %v1152_v4, %v1151_v61  ;;  %v3720_v17 = vld [vmem:[%s4931_s6 + $0x338] sm:$0xff]  ;;  %v1089_v18 = vmul.f32 %v3687_v10, %v925_v3  ;;  %v1090_v21 = vmul.f32 %v3688_v11, %v926_v7  ;;  %v3705_v26 = vld [vmem:[%s4931_s6 + $0x2c0] sm:$0xff] }
  0x89   : > { %v1121_v22 = vmul.f32 %v3719_v12, %v3655_v8  ;;  %v1122_v23 = vmul.f32 %v3720_v17, %v3656_v9  ;;  %v5025_v27 = vpack.c.bf16 %v1170_v16, %v1169_v14  ;;  %v3706_v28 = vld [vmem:[%s4931_s6 + $0x2c8] sm:$0xff]  ;;  %v3737_v29 = vld [vmem:[%s4931_s6 + $0x3c0] sm:$0xff]  ;;  %v1107_v32 = vmul.f32 %v3705_v26, %v943_v19  ;;  %v945_v51 = vld [vmem:[%s4931_s6 + $0xd0] sm:$0xff] }
  0x8a   : > { %4223 = vmatpush3.bf16.msra.mxu0 %v5016_v13  ;;  %v3738_v30 = vld [vmem:[%s4931_s6 + $0x3c8] sm:$0xff]  ;;  %4286 = vmatpush3.bf16.msra.mxu1 %v5016_v13  ;;  %v1108_v35 = vmul.f32 %v3706_v28, %v944_v20  ;;  %v1139_v36 = vmul.f32 %v3737_v29, %v3673_v24  ;;  %v927_v37 = vld [vmem:[%s4931_s6 + $0x40] sm:$0xff]  ;;  %v946_v55 = vld [vmem:[%s4931_s6 + $0xd8] sm:$0xff] }
  0x8b   : > { %v1153_v33 = vadd.f32 %v1121_v22, %v1089_v18  ;;  %v1154_v34 = vadd.f32 %v1122_v23, %v1090_v21  ;;  %v928_v38 = vld [vmem:[%s4931_s6 + $0x48] sm:$0xff]  ;;  %v3657_v39 = vld [vmem:[%s4931_s6 + $0x140] sm:$0xff]  ;;  %4225 = vmatprep.subr.bf16.mxu0 %v5025_v27  ;;  %v1140_v40 = vmul.f32 %v3738_v30, %v3674_v25  ;;  %4279 = vmatprep.subr.bf16.mxu1 %v5025_v27  ;;  %v3675_v56 = vld [vmem:[%s4931_s6 + $0x1d0] sm:$0xff] }
  0x8c   : > { %v3658_v41 = vld [vmem:[%s4931_s6 + $0x148] sm:$0xff]  ;;  %v3689_v42 = vld [vmem:[%s4931_s6 + $0x240] sm:$0xff]  ;;  %v1171_v46 = vadd.f32 %v1139_v36, %v1107_v32  ;;  %v3676_v57 = vld [vmem:[%s4931_s6 + $0x1d8] sm:$0xff] }
  0x8d   : > { %v3690_v43 = vld [vmem:[%s4931_s6 + $0x248] sm:$0xff]  ;;  %v5043_v45 = vpack.c.bf16 %v1154_v34, %v1153_v33  ;;  %v3721_v47 = vld [vmem:[%s4931_s6 + $0x340] sm:$0xff]  ;;  %v1091_v49 = vmul.f32 %v3689_v42, %v927_v37  ;;  %v1172_v52 = vadd.f32 %v1140_v40, %v1108_v35  ;;  %v3707_v58 = vld [vmem:[%s4931_s6 + $0x2d0] sm:$0xff] }
  0x8e   : > { %v3722_v48 = vld [vmem:[%s4931_s6 + $0x348] sm:$0xff]  ;;  %v1092_v50 = vmul.f32 %v3690_v43, %v928_v38  ;;  %v1123_v53 = vmul.f32 %v3721_v47, %v3657_v39  ;;  %v3708_v59 = vld [vmem:[%s4931_s6 + $0x2d8] sm:$0xff]  ;;  %v3739_v61 = vld [vmem:[%s4931_s6 + $0x3d0] sm:$0xff]  ;;  %v1109_v3 = vmul.f32 %v3707_v58, %v945_v51 }
  0x8f   : > { %v1124_v54 = vmul.f32 %v3722_v48, %v3658_v41  ;;  %4227 = vmatpush3.bf16.msra.mxu0 %v5043_v45  ;;  %4287 = vmatpush3.bf16.msra.mxu1 %v5043_v45  ;;  %v5057_v62 = vpack.c.bf16 %v1172_v52, %v1171_v46  ;;  %v3740_v2 = vld [vmem:[%s4931_s6 + $0x3d8] sm:$0xff]  ;;  %v929_v4 = vld [vmem:[%s4931_s6 + $0x50] sm:$0xff]  ;;  %v1110_v6 = vmul.f32 %v3708_v59, %v946_v55  ;;  %v947_v23 = vld [vmem:[%s4931_s6 + $0xe0] sm:$0xff] }
  0x90   : > { %v1155_v0 = vadd.f32 %v1123_v53, %v1091_v49  ;;  %v930_v5 = vld [vmem:[%s4931_s6 + $0x58] sm:$0xff]  ;;  %v1141_v7 = vmul.f32 %v3739_v61, %v3675_v56  ;;  %v1142_v8 = vmul.f32 %v3740_v2, %v3676_v57  ;;  %v3659_v9 = vld [vmem:[%s4931_s6 + $0x150] sm:$0xff]  ;;  %v948_v24 = vld [vmem:[%s4931_s6 + $0xe8] sm:$0xff] }
  0x91   : > { %v1156_v1 = vadd.f32 %v1124_v54, %v1092_v50  ;;  %v3660_v10 = vld [vmem:[%s4931_s6 + $0x158] sm:$0xff]  ;;  %v3691_v11 = vld [vmem:[%s4931_s6 + $0x250] sm:$0xff]  ;;  %4229 = vmatprep.subr.bf16.mxu0 %v5057_v62  ;;  %4280 = vmatprep.subr.bf16.mxu1 %v5057_v62  ;;  %v3677_v25 = vld [vmem:[%s4931_s6 + $0x1e0] sm:$0xff] }
  0x92   : > { %v3692_v14 = vld [vmem:[%s4931_s6 + $0x258] sm:$0xff]  ;;  %v3723_v16 = vld [vmem:[%s4931_s6 + $0x350] sm:$0xff]  ;;  %v1093_v18 = vmul.f32 %v3691_v11, %v929_v4  ;;  %v1173_v19 = vadd.f32 %v1141_v7, %v1109_v3  ;;  %v1174_v20 = vadd.f32 %v1142_v8, %v1110_v6  ;;  %v3678_v28 = vld [vmem:[%s4931_s6 + $0x1e8] sm:$0xff] }
  0x93   : > { %v5066_v12 = vpack.c.bf16 %v1156_v1, %v1155_v0  ;;  %v3724_v17 = vld [vmem:[%s4931_s6 + $0x358] sm:$0xff]  ;;  %v1094_v21 = vmul.f32 %v3692_v14, %v930_v5  ;;  %v1125_v22 = vmul.f32 %v3723_v16, %v3659_v9  ;;  %v3709_v29 = vld [vmem:[%s4931_s6 + $0x2e0] sm:$0xff]  ;;  %v3710_v30 = vld [vmem:[%s4931_s6 + $0x2e8] sm:$0xff] }
  0x94   : > { %v1126_v26 = vmul.f32 %v3724_v17, %v3660_v10  ;;  %v5085_v32 = vpack.c.bf16 %v1174_v20, %v1173_v19  ;;  %v3741_v34 = vld [vmem:[%s4931_s6 + $0x3e0] sm:$0xff]  ;;  %v3742_v35 = vld [vmem:[%s4931_s6 + $0x3e8] sm:$0xff]  ;;  %v1111_v36 = vmul.f32 %v3709_v29, %v947_v23  ;;  %v1112_v37 = vmul.f32 %v3710_v30, %v948_v24  ;;  %v949_v55 = vld [vmem:[%s4931_s6 + $0xf0] sm:$0xff] }
  0x95   : > { %4231 = vmatpush3.bf16.msra.mxu0 %v5066_v12  ;;  %4288 = vmatpush3.bf16.msra.mxu1 %v5066_v12  ;;  %v1157_v33 = vadd.f32 %v1125_v22, %v1093_v18  ;;  %v931_v38 = vld [vmem:[%s4931_s6 + $0x60] sm:$0xff]  ;;  %v1143_v40 = vmul.f32 %v3741_v34, %v3677_v25  ;;  %v1144_v41 = vmul.f32 %v3742_v35, %v3678_v28  ;;  %v932_v42 = vld [vmem:[%s4931_s6 + $0x68] sm:$0xff]  ;;  %v950_v56 = vld [vmem:[%s4931_s6 + $0xf8] sm:$0xff] }
  0x96   : > { %v1158_v39 = vadd.f32 %v1126_v26, %v1094_v21  ;;  %v3661_v43 = vld [vmem:[%s4931_s6 + $0x160] sm:$0xff]  ;;  %v3662_v46 = vld [vmem:[%s4931_s6 + $0x168] sm:$0xff]  ;;  %4233 = vmatprep.subr.bf16.mxu0 %v5085_v32  ;;  %4281 = vmatprep.subr.bf16.mxu1 %v5085_v32  ;;  %v3679_v61 = vld [vmem:[%s4931_s6 + $0x1f0] sm:$0xff] }
  0x97   : > { %v3693_v47 = vld [vmem:[%s4931_s6 + $0x260] sm:$0xff]  ;;  %v3694_v48 = vld [vmem:[%s4931_s6 + $0x268] sm:$0xff]  ;;  %v1175_v51 = vadd.f32 %v1143_v40, %v1111_v36  ;;  %v1176_v52 = vadd.f32 %v1144_v41, %v1112_v37  ;;  %v3680_v0 = vld [vmem:[%s4931_s6 + $0x1f8] sm:$0xff] }
  0x98   : > { %v3725_v49 = vld [vmem:[%s4931_s6 + $0x360] sm:$0xff]  ;;  %v5099_v50 = vpack.c.bf16 %v1158_v39, %v1157_v33  ;;  %v3726_v53 = vld [vmem:[%s4931_s6 + $0x368] sm:$0xff]  ;;  %v1095_v54 = vmul.f32 %v3693_v47, %v931_v38  ;;  %v1096_v57 = vmul.f32 %v3694_v48, %v932_v42  ;;  %v3711_v1 = vld [vmem:[%s4931_s6 + $0x2f0] sm:$0xff] }
  0x99   : > { %v1127_v58 = vmul.f32 %v3725_v49, %v3661_v43  ;;  %v1128_v59 = vmul.f32 %v3726_v53, %v3662_v46  ;;  %v5108_v2 = vpack.c.bf16 %v1176_v52, %v1175_v51  ;;  %v3712_v3 = vld [vmem:[%s4931_s6 + $0x2f8] sm:$0xff]  ;;  %v3743_v4 = vld [vmem:[%s4931_s6 + $0x3f0] sm:$0xff]  ;;  %v1113_v6 = vmul.f32 %v3711_v1, %v949_v55  ;;  %v1180_v28 = vld [vmem:[%s5116_s11 + $0x8] sm:$0xff] }
  0x9a   : > { %4235 = vmatpush3.bf16.msra.mxu0 %v5099_v50  ;;  %v3744_v5 = vld [vmem:[%s4931_s6 + $0x3f8] sm:$0xff]  ;;  %4289 = vmatpush3.bf16.msra.mxu1 %v5099_v50  ;;  %v1114_v9 = vmul.f32 %v3712_v3, %v950_v56  ;;  %v1145_v10 = vmul.f32 %v3743_v4, %v3679_v61  ;;  %v933_v11 = vld [vmem:[%s4931_s6 + $0x70] sm:$0xff]  ;;  %v1196_v34 = vld [vmem:[%s5116_s11 + $0xc8] sm:$0xff] }
  0x9b   : > { %v1159_v7 = vadd.f32 %v1127_v58, %v1095_v54  ;;  %v1160_v8 = vadd.f32 %v1128_v59, %v1096_v57  ;;  %v934_v14 = vld [vmem:[%s4931_s6 + $0x78] sm:$0xff]  ;;  %v3663_v16 = vld [vmem:[%s4931_s6 + $0x170] sm:$0xff]  ;;  %4237 = vmatprep.subr.bf16.mxu0 %v5108_v2  ;;  %v1146_v17 = vmul.f32 %v3744_v5, %v3680_v0  ;;  %4282 = vmatprep.subr.bf16.mxu1 %v5108_v2  ;;  %v1179_v39 = vld [vmem:[%s5116_s11] sm:$0xff] }
  0x9c   : > { %v3664_v18 = vld [vmem:[%s4931_s6 + $0x178] sm:$0xff]  ;;  %v3695_v19 = vld [vmem:[%s4931_s6 + $0x270] sm:$0xff]  ;;  %v1177_v22 = vadd.f32 %v1145_v10, %v1113_v6  ;;  %1291 = vmatprep.mubr.f32.mxu0 %v1180_v28  ;;  %1331 = vmatprep.mubr.f32.mxu1 %v1196_v34  ;;  %v1195_v40 = vld [vmem:[%s5116_s11 + $0xc0] sm:$0xff] }
  0x9d   : > { %v3696_v20 = vld [vmem:[%s4931_s6 + $0x278] sm:$0xff]  ;;  %v5127_v21 = vpack.c.bf16 %v1160_v8, %v1159_v7  ;;  %v3727_v23 = vld [vmem:[%s4931_s6 + $0x370] sm:$0xff]  ;;  %v1097_v25 = vmul.f32 %v3695_v19, %v933_v11  ;;  %v1178_v29 = vadd.f32 %v1146_v17, %v1114_v9  ;;  %v1182_v41 = vld [vmem:[%s5116_s11 + $0x20] sm:$0xff] }
  0x9e   : > { %v3728_v24 = vld [vmem:[%s4931_s6 + $0x378] sm:$0xff]  ;;  %v1098_v26 = vmul.f32 %v3696_v20, %v934_v14  ;;  %v1129_v30 = vmul.f32 %v3727_v23, %v3663_v16  ;;  %v1198_v42 = vld [vmem:[%s5116_s11 + $0xe0] sm:$0xff]  ;;  %v1183_v49 = vld [vmem:[%s5116_s11 + $0x30] sm:$0xff] }
  0x9f   : > { %v1130_v33 = vmul.f32 %v3728_v24, %v3664_v18  ;;  %4239 = vmatpush3.bf16.msra.mxu0 %v5127_v21  ;;  %4290 = vmatpush3.bf16.msra.mxu1 %v5127_v21  ;;  %v5135_v35 = vpack.c.bf16 %v1178_v29, %v1177_v22  ;;  %v1181_v43 = vld [vmem:[%s5116_s11 + $0x18] sm:$0xff]  ;;  %v1199_v51 = vld [vmem:[%s5116_s11 + $0xf0] sm:$0xff]  ;;  %v1185_v54 = vld [vmem:[%s5116_s11 + $0x48] sm:$0xff] }
  0xa0   : > { %v1161_v36 = vadd.f32 %v1129_v30, %v1097_v25  ;;  %v1184_v46 = vld [vmem:[%s5116_s11 + $0x38] sm:$0xff]  ;;  %v1186_v52 = vld [vmem:[%s5116_s11 + $0x50] sm:$0xff]  ;;  %v1201_v55 = vld [vmem:[%s5116_s11 + $0x108] sm:$0xff] }
  0xa1   : > { %v1162_v37 = vadd.f32 %v1130_v33, %v1098_v26  ;;  %4241 = vmatprep.subr.bf16.mxu0 %v5135_v35  ;;  %4283 = vmatprep.subr.bf16.mxu1 %v5135_v35  ;;  %v1197_v47 = vld [vmem:[%s5116_s11 + $0xd8] sm:$0xff]  ;;  %v1202_v53 = vld [vmem:[%s5116_s11 + $0x110] sm:$0xff]  ;;  %v1188_v56 = vld [vmem:[%s5116_s11 + $0x68] sm:$0xff] }
  0xa2   : > { %v1200_v48 = vld [vmem:[%s5116_s11 + $0xf8] sm:$0xff]  ;;  %v1204_v57 = vld [vmem:[%s5116_s11 + $0x128] sm:$0xff]  ;;  %v1187_v58 = vld [vmem:[%s5116_s11 + $0x60] sm:$0xff] }
  0xa3   : > { %v5138_v38 = vpack.c.bf16 %v1162_v37, %v1161_v36  ;;  %v1203_v59 = vld [vmem:[%s5116_s11 + $0x120] sm:$0xff]  ;;  %v1189_v1 = vld [vmem:[%s5116_s11 + $0x78] sm:$0xff]  ;;  %v1191_v6 = vld [vmem:[%s5116_s11 + $0x90] sm:$0xff] }
  0xa4   : > { %v1190_v61 = vld [vmem:[%s5116_s11 + $0x80] sm:$0xff]  ;;  %v1205_v3 = vld [vmem:[%s5116_s11 + $0x138] sm:$0xff]  ;;  %v1207_v7 = vld [vmem:[%s5116_s11 + $0x150] sm:$0xff] }
  0xa5   : > { %4243 = vmatpush3.bf16.msra.mxu0 %v5138_v38  ;;  %4291 = vmatpush3.bf16.msra.mxu1 %v5138_v38  ;;  %v1206_v0 = vld [vmem:[%s5116_s11 + $0x140] sm:$0xff]  ;;  %v1192_v4 = vld [vmem:[%s5116_s11 + $0x98] sm:$0xff]  ;;  %v1194_v8 = vld [vmem:[%s5116_s11 + $0xb0] sm:$0xff] }
  0xa6   : > { %v1208_v5 = vld [vmem:[%s5116_s11 + $0x158] sm:$0xff]  ;;  %v1210_v9 = vld [vmem:[%s5116_s11 + $0x170] sm:$0xff]  ;;  %v1193_v10 = vld [vmem:[%s5116_s11 + $0xa8] sm:$0xff] }
  0xa7   : > { %v1209_v11 = vld [vmem:[%s5116_s11 + $0x168] sm:$0xff]  ;;  %v1388_v14 = vld [vmem:[%s5183_s20] sm:$0xff]  ;;  %v4352_v16 = vld [vmem:[%s6513_s3 + $0x10] sm:$0xff]  }
  0xa8   : > { %1292 = vmatmul.mubr.f32.vlgmr.msra.gmra.mrb[0].mxu0 %v1179_v39  ;;  %1332 = vmatmul.mubr.f32.vlgmr.msra.gmra.mrb[0].mxu1 %v1195_v40  ;;  %v4353_v17 = vld [vmem:[%s6513_s3 + $0x18] sm:$0xff]   ;;  %v1219_v25 = vld [vmem:[%s5116_s11 + $0xd0] sm:$0xff]  ;;  %v1212_v30 = vld [vmem:[%s5116_s11 + $0x28] sm:$0xff] }
  0xa9   : > { %1296 = vmatprep.mubr.f32.mxu0 %v1182_v41  ;;  %1336 = vmatprep.mubr.f32.mxu1 %v1198_v42  ;;  %v1211_v29 = vld [vmem:[%s5116_s11 + $0x10] sm:$0xff]  ;;  %v1220_v34 = vld [vmem:[%s5116_s11 + $0xe8] sm:$0xff] }
  0xaa   : > { %4100 = vmatprep.subr.bf16.mxu0 %v4352_v16 }
  0xab   : > { %4101 = vmatpush3.bf16.msra.mxu0 %v4352_v16 }
  0xac   : > { %1297 = vmatmul.mubr.f32.gmra.mrb[2].mxu0 %v1181_v43  ;;  %1337 = vmatmul.mubr.f32.gmra.mrb[2].mxu1 %v1197_v47 }
  0xad   : > { %1301 = vmatprep.mubr.f32.mxu0 %v1184_v46  ;;  %1341 = vmatprep.mubr.f32.mxu1 %v1200_v48 }
  0xae   : > { %4102 = vmatprep.subr.bf16.mxu0 %v4353_v17 }
  0xaf   : > { %4103 = vmatpush3.bf16.msra.mxu0 %v4353_v17 }
  0xb0   : > { %1302 = vmatmul.mubr.f32.gmra.mrb[4].mxu0 %v1183_v49  ;;  %1342 = vmatmul.mubr.f32.gmra.mrb[4].mxu1 %v1199_v51 }
  0xb1   : > { %1306 = vmatprep.mubr.f32.mxu0 %v1186_v52  ;;  %1346 = vmatprep.mubr.f32.mxu1 %v1202_v53 }
  0xb4   : > { %1307 = vmatmul.mubr.f32.gmra.mrb[6].mxu0 %v1185_v54  ;;  %1347 = vmatmul.mubr.f32.gmra.mrb[6].mxu1 %v1201_v55  ;;  %v1221_v55 = vld [vmem:[%s5116_s11 + $0x100] sm:$0xff] }
  0xb5   : > { %1311 = vmatprep.mubr.f32.mxu0 %v1188_v56  ;;  %1351 = vmatprep.mubr.f32.mxu1 %v1204_v57 }
  0xb8   : > { %1312 = vmatmul.mubr.f32.gmra.mrb[8].mxu0 %v1187_v58  ;;  %1352 = vmatmul.mubr.f32.gmra.mrb[8].mxu1 %v1203_v59  ;;  %v1213_v58 = vld [vmem:[%s5116_s11 + $0x40] sm:$0xff]  ;;  %v1214_v59 = vld [vmem:[%s5116_s11 + $0x58] sm:$0xff] }
  0xb9   : > { %1316 = vmatprep.mubr.f32.mxu0 %v1190_v61  ;;  %1356 = vmatprep.mubr.f32.mxu1 %v1206_v0  ;;  %v1222_v0 = vld [vmem:[%s5116_s11 + $0x118] sm:$0xff] }
  0xbc   : > { %1317 = vmatmul.mubr.f32.gmra.mrb[10].mxu0 %v1189_v1  ;;  %1357 = vmatmul.mubr.f32.gmra.mrb[10].mxu1 %v1205_v3 }
  0xbd   : > { %1321 = vmatprep.mubr.f32.mxu0 %v1192_v4  ;;  %1361 = vmatprep.mubr.f32.mxu1 %v1208_v5 }
  0xc0   : > { %1322 = vmatmul.mubr.f32.gmra.mrb[12].mxu0 %v1191_v6  ;;  %1362 = vmatmul.mubr.f32.gmra.mrb[12].mxu1 %v1207_v7 }
  0xc1   : > { %1326 = vmatprep.mubr.f32.mxu0 %v1194_v8  ;;  %1366 = vmatprep.mubr.f32.mxu1 %v1210_v9 }
  0xc4   : > { %1327 = vmatmul.mubr.f32.gmra.mrb[14].mxu0 %v1193_v10  ;;  %1367 = vmatmul.mubr.f32.gmra.mrb[14].mxu1 %v1209_v11 }
  0xc5   : > { %4052 = vmatprep.mubr.f32.mxu1 %v1388_v14 }
 0x17b   : > { %v3868_v18 = vpop.f32.mrb[0].mxu0  ;;  %v3892_v19 = vpop.f32.mrb[0].mxu1 }
 0x17c   : > { %v3869_v20 = vpop.f32.mrb[1].mxu0  ;;  %v3893_v22 = vpop.f32.mrb[1].mxu1 }
 0x17d   : > { %v3870_v23 = vadd.f32 %v3869_v20, %v3868_v18  ;;  %v3894_v24 = vadd.f32 %v3893_v22, %v3892_v19  ;;  %v1223_v20 = vld [vmem:[%s5116_s11 + $0x130] sm:$0xff] }
 0x17f   : > { %v3871_v26 = vpop.f32.mrb[2].mxu0  ;;  %v3895_v28 = vpop.f32.mrb[2].mxu1  ;;  %v1380_v39 = vmul.f32 %v3894_v24, %v1219_v25  ;;  %v1372_v41 = vmul.f32 %v3870_v23, %v1211_v29  ;;  %v1215_v24 = vld [vmem:[%s5116_s11 + $0x70] sm:$0xff]  ;;  %v1216_v25 = vld [vmem:[%s5116_s11 + $0x88] sm:$0xff] }
 0x180   : > { %v3872_v33 = vpop.f32.mrb[3].mxu0  ;;  %v3896_v36 = vpop.f32.mrb[3].mxu1 }
 0x181   : > { %v3873_v37 = vadd.f32 %v3872_v33, %v3871_v26  ;;  %v3897_v40 = vadd.f32 %v3896_v36, %v3895_v28  ;;  %v1224_v28 = vld [vmem:[%s5116_s11 + $0x148] sm:$0xff] }
 0x183   : > { %v1373_v42 = vmul.f32 %v3873_v37, %v1212_v30  ;;  %v3874_v43 = vpop.f32.mrb[4].mxu0  ;;  %v1381_v46 = vmul.f32 %v3897_v40, %v1220_v34  ;;  %v3898_v47 = vpop.f32.mrb[4].mxu1 }
 0x184   : > { %v3875_v48 = vpop.f32.mrb[5].mxu0  ;;  %v3899_v49 = vpop.f32.mrb[5].mxu1 }
 0x185   : > { %v3876_v51 = vadd.f32 %v3875_v48, %v3874_v43  ;;  %v4244_v52 = vpack.c.bf16 %v1373_v42, %v1372_v41  ;;  %v3900_v53 = vadd.f32 %v3899_v49, %v3898_v47  ;;  %v5196_v54 = vpack.c.bf16 %v1381_v46, %v1380_v39 }
 0x187   : > { %v3877_v56 = vpop.f32.mrb[6].mxu0  ;;  %4245 = vmatprep.subr.bf16.mxu1 %v4244_v52  ;;  %v3901_v57 = vpop.f32.mrb[6].mxu1  ;;  %v1382_v4 = vmul.f32 %v3900_v53, %v1221_v55  ;;  %v1374_v6 = vmul.f32 %v3876_v51, %v1213_v58  ;;  %v1225_v51 = vld [vmem:[%s5116_s11 + $0x160] sm:$0xff]  ;;  %v1226_v58 = vld [vmem:[%s5116_s11 + $0x178] sm:$0xff] }
 0x188   : > { %v3878_v61 = vpop.f32.mrb[7].mxu0  ;;  %4247 = vmatpush3.bf16.msra.mxu1 %v4244_v52  ;;  %v3902_v1 = vpop.f32.mrb[7].mxu1  ;;  %v1217_v55 = vld [vmem:[%s5116_s11 + $0xa0] sm:$0xff] }
 0x189   : > { %v3879_v3 = vadd.f32 %v3878_v61, %v3877_v56  ;;  %v3903_v5 = vadd.f32 %v3902_v1, %v3901_v57  ;;  %v1218_v56 = vld [vmem:[%s5116_s11 + $0xb8] sm:$0xff] }
 0x18b   : > { %v1375_v7 = vmul.f32 %v3879_v3, %v1214_v59  ;;  %v3880_v8 = vpop.f32.mrb[8].mxu0  ;;  %v1383_v9 = vmul.f32 %v3903_v5, %v1222_v0  ;;  %v3904_v10 = vpop.f32.mrb[8].mxu1 }
 0x18c   : > { %v3881_v11 = vpop.f32.mrb[9].mxu0  ;;  %v3905_v14 = vpop.f32.mrb[9].mxu1 }
 0x18d   : > { %v3882_v16 = vadd.f32 %v3881_v11, %v3880_v8  ;;  %v4248_v17 = vpack.c.bf16 %v1375_v7, %v1374_v6  ;;  %v3906_v18 = vadd.f32 %v3905_v14, %v3904_v10  ;;  %v4264_v19 = vpack.c.bf16 %v1383_v9, %v1382_v4  ;;  %v1389_v8 = vld [vmem:[%s5183_s20 + $0x8] sm:$0xff]  ;;  %v1390_v9 = vld [vmem:[%s5183_s20 + $0x10] sm:$0xff]  ;;  %v1391_v10 = vld [vmem:[%s5183_s20 + $0x18] sm:$0xff] }
 0x18e   : > { %v1392_v11 = vld [vmem:[%s5183_s20 + $0x20] sm:$0xff]  ;;  %v1394_v14 = vld [vmem:[%s5183_s20 + $0x30] sm:$0xff] }
 0x18f   : > { %v3883_v22 = vpop.f32.mrb[10].mxu0  ;;  %4249 = vmatprep.subr.bf16.mxu1 %v4248_v17  ;;  %v3907_v23 = vpop.f32.mrb[10].mxu1  ;;  %v1384_v33 = vmul.f32 %v3906_v18, %v1223_v20  ;;  %v1376_v36 = vmul.f32 %v3882_v16, %v1215_v24  ;;  %v1395_v16 = vld [vmem:[%s5183_s20 + $0x38] sm:$0xff]  ;;  %v1397_v18 = vld [vmem:[%s5183_s20 + $0x48] sm:$0xff]  ;;  %v1402_v24 = vld [vmem:[%s5183_s20 + $0x70] sm:$0xff] }
 0x190   : > { %v3884_v26 = vpop.f32.mrb[11].mxu0  ;;  %4251 = vmatpush3.bf16.msra.mxu1 %v4248_v17  ;;  %v3908_v29 = vpop.f32.mrb[11].mxu1  ;;  %v1396_v17 = vld [vmem:[%s5183_s20 + $0x40] sm:$0xff]  ;;  %v1399_v20 = vld [vmem:[%s5183_s20 + $0x58] sm:$0xff] }
 0x191   : > { %v3885_v30 = vadd.f32 %v3884_v26, %v3883_v22  ;;  %v3909_v34 = vadd.f32 %v3908_v29, %v3907_v23  ;;  %v1400_v22 = vld [vmem:[%s5183_s20 + $0x60] sm:$0xff]  ;;  %v1401_v23 = vld [vmem:[%s5183_s20 + $0x68] sm:$0xff]  ;;  %v1406_v29 = vld [vmem:[%s5183_s20 + $0x90] sm:$0xff] }
 0x192   : > { %v1404_v26 = vld [vmem:[%s5183_s20 + $0x80] sm:$0xff] }
 0x193   : > { %v1377_v37 = vmul.f32 %v3885_v30, %v1216_v25  ;;  %v3886_v39 = vpop.f32.mrb[12].mxu0  ;;  %v1385_v40 = vmul.f32 %v3909_v34, %v1224_v28  ;;  %v3910_v41 = vpop.f32.mrb[12].mxu1  ;;  %v1403_v25 = vld [vmem:[%s5183_s20 + $0x78] sm:$0xff]  ;;  %v1405_v28 = vld [vmem:[%s5183_s20 + $0x88] sm:$0xff] }
 0x194   : > { %v3887_v42 = vpop.f32.mrb[13].mxu0  ;;  %v3911_v43 = vpop.f32.mrb[13].mxu1  ;;  %v1407_v30 = vld [vmem:[%s5183_s20 + $0x98] sm:$0xff]  ;;  %v1409_v34 = vld [vmem:[%s5183_s20 + $0xa8] sm:$0xff] }
 0x195   : > { %v3888_v46 = vadd.f32 %v3887_v42, %v3886_v39  ;;  %v4252_v47 = vpack.c.bf16 %v1377_v37, %v1376_v36  ;;  %v3912_v48 = vadd.f32 %v3911_v43, %v3910_v41  ;;  %v4268_v49 = vpack.c.bf16 %v1385_v40, %v1384_v33  ;;  %v1408_v33 = vld [vmem:[%s5183_s20 + $0xa0] sm:$0xff]  ;;  %v1410_v36 = vld [vmem:[%s5183_s20 + $0xb0] sm:$0xff]  ;;  %v1411_v37 = vld [vmem:[%s5183_s20 + $0xb8] sm:$0xff] }
 0x196   : > { %v1412_v39 = vld [vmem:[%s5183_s20 + $0xc0] sm:$0xff]  ;;  %v1413_v40 = vld [vmem:[%s5183_s20 + $0xc8] sm:$0xff]  ;;  %v1414_v41 = vld [vmem:[%s5183_s20 + $0xd0] sm:$0xff] }
 0x197   : > { %v3889_v52 = vpop.f32.mrb[14].mxu0  ;;  %4253 = vmatprep.subr.bf16.mxu1 %v4252_v47  ;;  %v3913_v53 = vpop.f32.mrb[14].mxu1  ;;  %v1386_v0 = vmul.f32 %v3912_v48, %v1225_v51  ;;  %v1378_v3 = vmul.f32 %v3888_v46, %v1217_v55  ;;  %v1415_v42 = vld [vmem:[%s5183_s20 + $0xd8] sm:$0xff]  ;;  %v1416_v43 = vld [vmem:[%s5183_s20 + $0xe0] sm:$0xff]  ;;  %v1417_v46 = vld [vmem:[%s5183_s20 + $0xe8] sm:$0xff] }
 0x198   : > { %v3890_v57 = vpop.f32.mrb[15].mxu0  ;;  %4255 = vmatpush3.bf16.msra.mxu1 %v4252_v47  ;;  %v3914_v59 = vpop.f32.mrb[15].mxu1  ;;  %v1418_v47 = vld [vmem:[%s5183_s20 + $0xf0] sm:$0xff]  ;;  %v1419_v48 = vld [vmem:[%s5183_s20 + $0xf8] sm:$0xff] }
 0x199   : > { %v3891_v61 = vadd.f32 %v3890_v57, %v3889_v52  ;;  %v3915_v1 = vadd.f32 %v3914_v59, %v3913_v53  ;;  %v4356_v52 = vld [vmem:[%s6513_s3 + $0x20] sm:$0xff]   ;;  %v4355_v59 = vld [vmem:[%s6513_s3 + $0x8] sm:$0xff]  }
 0x19b   : > { %v1379_v4 = vmul.f32 %v3891_v61, %v1218_v56  ;;  %v1387_v5 = vmul.f32 %v3915_v1, %v1226_v58 }
 0x19d   : > { %v4256_v6 = vpack.c.bf16 %v1379_v4, %v1378_v3  ;;  %v4272_v7 = vpack.c.bf16 %v1387_v5, %v1386_v0 }
 0x19f   : > { %4257 = vmatprep.subr.bf16.mxu1 %v4256_v6 }
 0x1a0   : > { %4259 = vmatpush3.bf16.msra.mxu1 %v4256_v6 }
 0x1a1   : > { %4261 = vmatprep.subr.bf16.mxu1 %v5196_v54 }
 0x1a4   : > { %4263 = vmatpush3.bf16.msra.mxu1 %v5196_v54  ;;  %v1393_v54 = vld [vmem:[%s5183_s20 + $0x28] sm:$0xff] }
 0x1a5   : > { %4265 = vmatprep.subr.bf16.mxu1 %v4264_v19 }
 0x1a8   : > { %4267 = vmatpush3.bf16.msra.mxu1 %v4264_v19  ;;  %v1398_v19 = vld [vmem:[%s5183_s20 + $0x50] sm:$0xff] }
 0x1a9   : > { %4269 = vmatprep.subr.bf16.mxu1 %v4268_v49 }
 0x1ac   : > { %4271 = vmatpush3.bf16.msra.mxu1 %v4268_v49  ;;  %v4354_v49 = vld [vmem:[%s6513_s3] sm:$0xff]  }
 0x1ad   : > { %4273 = vmatprep.subr.bf16.mxu1 %v4272_v7  ;;  %4136 = vmatprep.subr.bf16.mxu0 %v4354_v49 }
 0x1b0   : > { %4275 = vmatpush3.bf16.msra.mxu1 %v4272_v7 }
 0x1b1   : > { %4172 = vmatprep.subr.bf16.mxu1 %v4356_v52 }
 0x1b3   : > { %4053 = vmatmul.mubr.f32.vlgmr.msra.gmra.mrb[16].mxu1 %v1389_v8 }
 0x1b4   : > { %4055 = vmatprep.mubr.f32.mxu1 %v1390_v9  ;;  %4173 = vmatpush3.bf16.msra.mxu1 %v4356_v52 }
 0x1b7   : > { %4056 = vmatmul.mubr.f32.gmra.mrb[18].mxu1 %v1391_v10 }
 0x1b8   : > { %4058 = vmatprep.mubr.f32.mxu1 %v1392_v11 }
 0x1bb   : > { %4059 = vmatmul.mubr.f32.gmra.mrb[20].mxu1 %v1393_v54 }
 0x1bc   : > { %4061 = vmatprep.mubr.f32.mxu1 %v1394_v14 }
 0x1bf   : > { %4062 = vmatmul.mubr.f32.gmra.mrb[22].mxu1 %v1395_v16 }
 0x1c0   : > { %4064 = vmatprep.mubr.f32.mxu1 %v1396_v17 }
 0x1c3   : > { %4065 = vmatmul.mubr.f32.gmra.mrb[24].mxu1 %v1397_v18 }
 0x1c4   : > { %4067 = vmatprep.mubr.f32.mxu1 %v1398_v19 }
 0x1c7   : > { %4068 = vmatmul.mubr.f32.gmra.mrb[26].mxu1 %v1399_v20 }
 0x1c8   : > { %4070 = vmatprep.mubr.f32.mxu1 %v1400_v22 }
 0x1cb   : > { %4071 = vmatmul.mubr.f32.gmra.mrb[28].mxu1 %v1401_v23 }
 0x1cc   : > { %4073 = vmatprep.mubr.f32.mxu1 %v1402_v24 }
 0x1cf   : > { %4074 = vmatmul.mubr.f32.gmra.mrb[30].mxu1 %v1403_v25 }
 0x1d0   : > { %4076 = vmatprep.mubr.f32.mxu1 %v1404_v26 }
 0x1d3   : > { %4077 = vmatmul.mubr.f32.gmra.mrb[32].mxu1 %v1405_v28 }
 0x1d4   : > { %4079 = vmatprep.mubr.f32.mxu1 %v1406_v29 }
 0x1d7   : > { %4080 = vmatmul.mubr.f32.gmra.mrb[34].mxu1 %v1407_v30 }
 0x1d8   : > { %4082 = vmatprep.mubr.f32.mxu1 %v1408_v33 }
 0x1db   : > { %4083 = vmatmul.mubr.f32.gmra.mrb[36].mxu1 %v1409_v34 }
 0x1dc   : > { %4085 = vmatprep.mubr.f32.mxu1 %v1410_v36 }
 0x1df   : > { %4086 = vmatmul.mubr.f32.gmra.mrb[38].mxu1 %v1411_v37 }
 0x1e0   : > { %4088 = vmatprep.mubr.f32.mxu1 %v1412_v39 }
 0x1e3   : > { %4089 = vmatmul.mubr.f32.gmra.mrb[40].mxu1 %v1413_v40 }
 0x1e4   : > { %4091 = vmatprep.mubr.f32.mxu1 %v1414_v41 }
 0x1e7   : > { %4092 = vmatmul.mubr.f32.gmra.mrb[42].mxu1 %v1415_v42 }
 0x1e8   : > { %4094 = vmatprep.mubr.f32.mxu1 %v1416_v43 }
 0x1eb   : > { %4095 = vmatmul.mubr.f32.gmra.mrb[44].mxu1 %v1417_v46 }
 0x1ec   : > { %4097 = vmatprep.mubr.f32.mxu1 %v1418_v47 }
 0x1ef   : > { %4098 = vmatmul.mubr.f32.gmra.mrb[46].mxu1 %v1419_v48 }
 0x286   : > { %v4054_v51 = vpop.f32.mrb[16].mxu1 }
 0x287   : > { %v1486_v53 = vpop.f32.mrb[17].mxu1 }
 0x288   : > { %v1681_v55 = vpack.c.bf16 %v4054_v51, %v1486_v53 }
 0x28a   : > { %v4057_v56 = vpop.f32.mrb[18].mxu1  ;;  %4104 = vmatprep.mubr.msk.bf16.mxu0 %vm1709_vm0, %v1681_v55 }
 0x28b   : > { %v1496_v57 = vpop.f32.mrb[19].mxu1 }
 0x28c   : > { %v1682_v58 = vpack.c.bf16 %v4057_v56, %v1496_v57 }
 0x28e   : > { %v4060_v61 = vpop.f32.mrb[20].mxu1  ;;  %4105 = vmatmul.mubr.msk.bf16.vlgmr.msra.gmra.mrb[16].mxu0 %vm1709_vm0, %v1682_v58 }
 0x28f   : > { %v1506_v0 = vpop.f32.mrb[21].mxu1  ;;  %4137 = vmatpush3.bf16.msra.mxu0 %v4354_v49 }
 0x290   : > { %v1683_v1 = vpack.c.bf16 %v4060_v61, %v1506_v0  ;;  %4138 = vmatprep.subr.bf16.mxu0 %v4355_v59 }
 0x292   : > { %v4063_v3 = vpop.f32.mrb[22].mxu1  ;;  %4108 = vmatprep.mubr.msk.bf16.mxu0 %vm1709_vm0, %v1683_v1 }
 0x293   : > { %v1516_v4 = vpop.f32.mrb[23].mxu1  ;;  %4139 = vmatpush3.bf16.msra.mxu0 %v4355_v59 }
 0x294   : > { %v1684_v5 = vpack.c.bf16 %v4063_v3, %v1516_v4 }
 0x296   : > { %v4066_v6 = vpop.f32.mrb[24].mxu1  ;;  %4109 = vmatmul.mubr.msk.bf16.gmra.mrb[20].mxu0 %vm1709_vm0, %v1684_v5 }
 0x297   : > { %v1526_v7 = vpop.f32.mrb[25].mxu1 }
 0x298   : > { %v1685_v8 = vpack.c.bf16 %v4066_v6, %v1526_v7 }
 0x29a   : > { %v4069_v9 = vpop.f32.mrb[26].mxu1  ;;  %4112 = vmatprep.mubr.msk.bf16.mxu0 %vm1709_vm0, %v1685_v8 }
 0x29b   : > { %v1536_v10 = vpop.f32.mrb[27].mxu1 }
 0x29c   : > { %v1686_v11 = vpack.c.bf16 %v4069_v9, %v1536_v10 }
 0x29e   : > { %v4072_v54 = vpop.f32.mrb[28].mxu1  ;;  %4113 = vmatmul.mubr.msk.bf16.gmra.mrb[24].mxu0 %vm1709_vm0, %v1686_v11 }
 0x29f   : > { %v1546_v14 = vpop.f32.mrb[29].mxu1 }
 0x2a0   : > { %v1687_v16 = vpack.c.bf16 %v4072_v54, %v1546_v14 }
 0x2a2   : > { %v4075_v17 = vpop.f32.mrb[30].mxu1  ;;  %4116 = vmatprep.mubr.msk.bf16.mxu0 %vm1709_vm0, %v1687_v16 }
 0x2a3   : > { %v1556_v18 = vpop.f32.mrb[31].mxu1 }
 0x2a4   : > { %v1688_v19 = vpack.c.bf16 %v4075_v17, %v1556_v18 }
 0x2a6   : > { %v4078_v20 = vpop.f32.mrb[32].mxu1  ;;  %4117 = vmatmul.mubr.msk.bf16.gmra.mrb[28].mxu0 %vm1709_vm0, %v1688_v19 }
 0x2a7   : > { %v1566_v22 = vpop.f32.mrb[33].mxu1 }
 0x2a8   : > { %v1689_v23 = vpack.c.bf16 %v4078_v20, %v1566_v22 }
 0x2aa   : > { %v4081_v24 = vpop.f32.mrb[34].mxu1  ;;  %4120 = vmatprep.mubr.msk.bf16.mxu0 %vm1709_vm0, %v1689_v23 }
 0x2ab   : > { %v1576_v25 = vpop.f32.mrb[35].mxu1 }
 0x2ac   : > { %v1690_v26 = vpack.c.bf16 %v4081_v24, %v1576_v25  ;;  %v4359_v24 = vld [vmem:[%s6513_s3 + $0x38] sm:$0xff]  }
 0x2ae   : > { %v4084_v28 = vpop.f32.mrb[36].mxu1  ;;  %4121 = vmatmul.mubr.msk.bf16.gmra.mrb[32].mxu0 %vm1709_vm0, %v1690_v26 }
 0x2af   : > { %v1586_v29 = vpop.f32.mrb[37].mxu1 }
 0x2b0   : > { %v1691_v30 = vpack.c.bf16 %v4084_v28, %v1586_v29 }
 0x2b2   : > { %v4087_v33 = vpop.f32.mrb[38].mxu1  ;;  %4124 = vmatprep.mubr.msk.bf16.mxu0 %vm1709_vm0, %v1691_v30 }
 0x2b3   : > { %v1596_v34 = vpop.f32.mrb[39].mxu1 }
 0x2b4   : > { %v1692_v36 = vpack.c.bf16 %v4087_v33, %v1596_v34 }
 0x2b6   : > { %v4090_v37 = vpop.f32.mrb[40].mxu1  ;;  %4125 = vmatmul.mubr.msk.bf16.gmra.mrb[36].mxu0 %vm1709_vm0, %v1692_v36 }
 0x2b7   : > { %v1606_v39 = vpop.f32.mrb[41].mxu1 }
 0x2b8   : > { %v1693_v40 = vpack.c.bf16 %v4090_v37, %v1606_v39 }
 0x2ba   : > { %v4093_v41 = vpop.f32.mrb[42].mxu1  ;;  %4128 = vmatprep.mubr.msk.bf16.mxu0 %vm1709_vm0, %v1693_v40 }
 0x2bb   : > { %v1616_v42 = vpop.f32.mrb[43].mxu1 }
 0x2bc   : > { %v1694_v43 = vpack.c.bf16 %v4093_v41, %v1616_v42 }
 0x2be   : > { %v4096_v46 = vpop.f32.mrb[44].mxu1  ;;  %4129 = vmatmul.mubr.msk.bf16.gmra.mrb[40].mxu0 %vm1709_vm0, %v1694_v43 }
 0x2bf   : > { %v1626_v47 = vpop.f32.mrb[45].mxu1 }
 0x2c0   : > { %v1695_v48 = vpack.c.bf16 %v4096_v46, %v1626_v47 }
 0x2c2   : > { %v4099_v49 = vpop.f32.mrb[46].mxu1  ;;  %4132 = vmatprep.mubr.msk.bf16.mxu0 %vm1709_vm0, %v1695_v48 }
 0x2c3   : > { %v1636_v51 = vpop.f32.mrb[47].mxu1 }
 0x2c4   : > { %v1696_v52 = vpack.c.bf16 %v4099_v49, %v1636_v51 }
 0x2c6   : > { %4133 = vmatmul.mubr.msk.bf16.gmra.mrb[44].mxu0 %vm1709_vm0, %v1696_v52 }
 0x2c7   : > { %4140 = vmatprep.mubr.msk.bf16.mxu0 %vm1709_vm0, %v4967_v15  ;;  %v4358_v15 = vld [vmem:[%s6513_s3 + $0x30] sm:$0xff]  }
 0x2ce   : > { %4141 = vmatmul.mubr.msk.bf16.vlgmr.msra.gmra.mrb[16].mxu0 %vm1709_vm0, %v4989_v44 }
 0x2cf   : > { %4144 = vmatprep.mubr.msk.bf16.mxu0 %vm1709_vm0, %v5016_v13 }
 0x2d6   : > { %4145 = vmatmul.mubr.msk.bf16.gmra.mrb[20].mxu0 %vm1709_vm0, %v5043_v45 }
 0x2d7   : > { %4148 = vmatprep.mubr.msk.bf16.mxu0 %vm1709_vm0, %v5066_v12 }
 0x2de   : > { %4149 = vmatmul.mubr.msk.bf16.gmra.mrb[24].mxu0 %vm1709_vm0, %v5099_v50 }
 0x2df   : > { %4152 = vmatprep.mubr.msk.bf16.mxu0 %vm1709_vm0, %v5127_v21 }
 0x2e6   : > { %4153 = vmatmul.mubr.msk.bf16.gmra.mrb[28].mxu0 %vm1709_vm0, %v5138_v38 }
 0x2e7   : > { %4156 = vmatprep.mubr.msk.bf16.mxu0 %vm1709_vm0, %v4954_v63  ;;  %v4357_v63 = vld [vmem:[%s6513_s3 + $0x28] sm:$0xff]  }
 0x2e8   : > { %4174 = vmatprep.subr.bf16.mxu1 %v4357_v63 }
 0x2e9   : > { %4175 = vmatpush3.bf16.msra.mxu1 %v4357_v63 }
 0x2ea   : > { %4176 = vmatprep.subr.bf16.mxu1 %v4358_v15 }
 0x2ed   : > { %4177 = vmatpush3.bf16.msra.mxu1 %v4358_v15 }
 0x2ee   : > { %4157 = vmatmul.mubr.msk.bf16.gmra.mrb[32].mxu0 %vm1709_vm0, %v4980_v31  ;;  %v2140_v31 = vlaneseq  ;;  %4178 = vmatprep.subr.bf16.mxu1 %v4359_v24 }
 0x2ef   : > { %4160 = vmatprep.mubr.msk.bf16.mxu0 %vm1709_vm0, %v5003_v60  ;;  %v1661_v60 = vld [vmem:[%s6513_s3 + $0x40] sm:$0x1] }
 0x2f0   : > { %v5306_v44 = vshrl.u32 %v2140_v31, 7  ;;  %v1662_v13 = vunpack.c.l.bf16 %v1661_v60 }
 0x2f1   : > { %4179 = vmatpush3.bf16.msra.mxu1 %v4359_v24 }
 0x2f2   : > { %6523 = vst [vmem:[#allocation3_spill] sm:$0xff] %v5306_v44 }
 0x2f6   : > { %4161 = vmatmul.mubr.msk.bf16.gmra.mrb[36].mxu0 %vm1709_vm0, %v5025_v27  ;;  %v6515_v27 = vsub.s32 0, %v5306_v44 }
 0x2f7   : > { %4164 = vmatprep.mubr.msk.bf16.mxu0 %vm1709_vm0, %v5057_v62 }
 0x2f8   : > { %v5314_v45 = vrot.slane %v1662_v13, %v6515_v27 }
 0x2fe   : > { %4165 = vmatmul.mubr.msk.bf16.gmra.mrb[40].mxu0 %vm1709_vm0, %v5085_v32 }
 0x2ff   : > { %4168 = vmatprep.mubr.msk.bf16.mxu0 %vm1709_vm0, %v5108_v2 }
 0x306   : > { %4169 = vmatmul.mubr.msk.bf16.gmra.mrb[44].mxu0 %vm1709_vm0, %v5135_v35 }
 0x3a1   : > { %v4142_v62 = vpop.f32.mrb[16].mxu0 }
 0x3a2   : > { %v5317_v12 = vadd.f32 %v4142_v62, %v5314_v45  ;;  %v2013_v32 = vpop.f32.mrb[17].mxu0 }
 0x3a3   : > { %v5320_v50 = vadd.f32 %v5314_v45, %v2013_v32  ;;  %v4143_v2 = vpop.f32.mrb[18].mxu0 }
 0x3a4   : > { %v5323_v21 = vmul.f32 0.70710677, %v5317_v12  ;;  %v5326_v35 = vadd.f32 %v4143_v2, %v5314_v45  ;;  %v2016_v38 = vpop.f32.mrb[19].mxu0 }
 0x3a5   : > { %v5329_v53 = vmul.f32 0.70710677, %v5320_v50  ;;  %v5332_v55 = vadd.f32 %v5314_v45, %v2016_v38 }
 0x3a6   : > { %v2242_v56 = vand.u32 2147483647, %v5323_v21  ;;  %v5336_v57 = vmul.f32 0.70710677, %v5326_v35  ;;  %vm2882_vm1 = vcmp.lt.f32.partialorder %v5323_v21, 0.0 }
 0x3a7   : > { %v2240_v58 = vand.u32 2147483647, %v5329_v53  ;;  %v5340_v59 = vmul.f32 0.70710677, %v5332_v55  ;;  %vm2880_vm2 = vcmp.lt.f32.partialorder %v5329_v53, 0.0 }
 0x3a8   : > { %v2274_v61 = vmul.f32 0.3275911, %v2242_v56  ;;  %v2690_v0 = vsub.f32 0.0, %v2242_v56  ;;  %v2243_v1 = vand.u32 2147483647, %v5336_v57  ;;  %vm2883_vm3 = vcmp.lt.f32.partialorder %v5336_v57, 0.0 }
 0x3a9   : > { %v2272_v3 = vmul.f32 0.3275911, %v2240_v58  ;;  %v2688_v4 = vsub.f32 0.0, %v2240_v58  ;;  %v2241_v5 = vand.u32 2147483647, %v5340_v59  ;;  %v4146_v10 = vpop.f32.mrb[20].mxu0 }
 0x3aa   : > { %v2306_v6 = vadd.f32 1.0, %v2274_v61  ;;  %v2722_v7 = vmul.f32 %v2690_v0, %v2242_v56  ;;  %v2275_v8 = vmul.f32 0.3275911, %v2243_v1  ;;  %v2691_v9 = vsub.f32 0.0, %v2243_v1  ;;  %v2029_v17 = vpop.f32.mrb[21].mxu0 }
 0x3ab   : > { %v2304_v11 = vadd.f32 1.0, %v2272_v3  ;;  %v2720_v54 = vmul.f32 %v2688_v4, %v2240_v58  ;;  %v2273_v14 = vmul.f32 0.3275911, %v2241_v5  ;;  %v2689_v16 = vsub.f32 0.0, %v2241_v5  ;;  %v4147_v20 = vpop.f32.mrb[22].mxu0 }
 0x3ac   : > { %4360 = vrcp.f32 %v2306_v6  ;;  %v2307_v18 = vadd.f32 1.0, %v2275_v8  ;;  %v2723_v19 = vmul.f32 %v2691_v9, %v2243_v1  ;;  %v2756_v22 = vmul.f32 1.442695, %v2722_v7  ;;  %v2032_v23 = vpop.f32.mrb[23].mxu0 }
 0x3ad   : > { %4362 = vrcp.f32 %v2304_v11  ;;  %v2305_v25 = vadd.f32 1.0, %v2273_v14  ;;  %v2721_v26 = vmul.f32 %v2689_v16, %v2241_v5  ;;  %v5348_v28 = vadd.f32 %v4146_v10, %v5314_v45 }
 0x3ae   : > { %v5351_v29 = vadd.f32 %v5314_v45, %v2029_v17  ;;  %v2752_v30 = vmul.f32 1.442695, %v2720_v54  ;;  %v5354_v33 = vadd.f32 %v4147_v20, %v5314_v45  ;;  %4364 = vrcp.f32 %v2307_v18 }
 0x3af   : > { %v2758_v34 = vmul.f32 1.442695, %v2723_v19  ;;  %v5357_v36 = vmul.f32 0.70710677, %v5348_v28  ;;  %v5360_v37 = vadd.f32 %v5314_v45, %v2032_v23  ;;  %4366 = vpow2.f32 %v2756_v22 }
 0x3b0   : > { %v5363_v39 = vmul.f32 0.70710677, %v5351_v29  ;;  %v5366_v40 = vmul.f32 0.70710677, %v5354_v33  ;;  %4368 = vrcp.f32 %v2305_v25  ;;  %v2754_v42 = vmul.f32 1.442695, %v2721_v26 }
 0x3b1   : > { %v4150_v41 = vpop.f32.mrb[24].mxu0  ;;  %v2246_v43 = vand.u32 2147483647, %v5357_v36  ;;  %4370 = vpow2.f32 %v2752_v30  ;;  %v5376_v63 = vmul.f32 0.70710677, %v5360_v37  ;;  %vm2881_vm4 = vcmp.lt.f32.partialorder %v5340_v59, 0.0 }
 0x3b2   : > { %v5369_v46 = vpop.f32.mrb[25].mxu0  ;;  %v2244_v47 = vand.u32 2147483647, %v5363_v39  ;;  %v2247_v48 = vand.u32 2147483647, %v5366_v40  ;;  %4372 = vpow2.f32 %v2758_v34  ;;  %v5401_v26 = vadd.f32 %v4150_v41, %v5314_v45 }
 0x3b3   : > { %v5373_v49 = vpop.f32.mrb[26].mxu0  ;;  %v2278_v51 = vmul.f32 0.3275911, %v2246_v43  ;;  %v2694_v52 = vsub.f32 0.0, %v2246_v43  ;;  %4374 = vpow2.f32 %v2754_v42  ;;  %v2245_v38 = vand.u32 2147483647, %v5376_v63 }
 0x3b4   : > { %v2276_v15 = vmul.f32 0.3275911, %v2244_v47  ;;  %v2692_v31 = vsub.f32 0.0, %v2244_v47  ;;  %v2279_v60 = vmul.f32 0.3275911, %v2247_v48  ;;  %v2695_v13 = vsub.f32 0.0, %v2247_v48 }
 0x3b5   : > { %v2310_v32 = vadd.f32 1.0, %v2278_v51  ;;  %v2726_v2 = vmul.f32 %v2694_v52, %v2246_v43  ;;  %v5381_v56 = vpop.f32.mrb[27].mxu0  ;;  %v2277_v9 = vmul.f32 0.3275911, %v2245_v38  ;;  %v2693_v54 = vsub.f32 0.0, %v2245_v38 }
 0x3b6   : > { %v5378_v62 = vpop.eup %4360  ;;  %v2308_v0 = vadd.f32 1.0, %v2276_v15  ;;  %v2724_v1 = vmul.f32 %v2692_v31, %v2244_v47  ;;  %v2311_v3 = vadd.f32 1.0, %v2279_v60  ;;  %v2727_v6 = vmul.f32 %v2695_v13, %v2247_v48 }
 0x3b7   : > { %v5383_v58 = vpop.eup %4362  ;;  %v2402_v61 = vmul.f32 1.0614054, %v5378_v62  ;;  %4376 = vrcp.f32 %v2310_v32  ;;  %v2764_v5 = vmul.f32 1.442695, %v2726_v2  ;;  %v2309_v20 = vadd.f32 1.0, %v2277_v9 }
 0x3b8   : > { %v2400_v4 = vmul.f32 1.0614054, %v5383_v58  ;;  %4378 = vrcp.f32 %v2308_v0  ;;  %v2760_v8 = vmul.f32 1.442695, %v2724_v1  ;;  %v5387_v10 = vpop.eup %4364  ;;  %v2766_v19 = vmul.f32 1.442695, %v2727_v6 }
 0x3b9   : > { %v2434_v7 = vadd.f32 -1.4531521, %v2402_v61  ;;  %4380 = vpow2.f32 %v2764_v5  ;;  %v5389_v14 = vpop.f32.mrb[28].mxu0  ;;  %v5391_v16 = vpop.eup %4366  ;;  %v2403_v18 = vmul.f32 1.0614054, %v5387_v10  ;;  %v2725_v25 = vmul.f32 %v2693_v54, %v2245_v38 }
 0x3ba   : > { %v2432_v11 = vadd.f32 -1.4531521, %v2400_v4  ;;  %v5395_v22 = vpop.f32.mrb[29].mxu0  ;;  %v5397_v23 = vpop.eup %4368  ;;  %4382 = vrcp.f32 %v2311_v3  ;;  %v5415_v13 = vmul.f32 0.70710677, %v5401_v26  ;;  %v5420_v2 = vmul.f32 0.5, %v5317_v12 }
 0x3bb   : > { %v2466_v17 = vmul.f32 %v5378_v62, %v2434_v7  ;;  %v5403_v30 = vpop.f32.mrb[30].mxu0  ;;  %v5405_v34 = vpop.eup %4370  ;;  %v2435_v43 = vadd.f32 -1.4531521, %v2403_v18  ;;  %v2401_v47 = vmul.f32 1.0614054, %v5397_v23  ;;  %4384 = vpow2.f32 %v2760_v8 }
 0x3bc   : > { %v2464_v24 = vmul.f32 %v5383_v58, %v2432_v11  ;;  %v5408_v48 = vpop.eup %4372  ;;  %4386 = vrcp.f32 %v2309_v20  ;;  %v2762_v52 = vmul.f32 1.442695, %v2725_v25  ;;  %v5410_v15 = vpop.f32.mrb[31].mxu0  ;;  %v5423_v38 = vmul.f32 0.5, %v5320_v50 }
 0x3bd   : > { %v2498_v42 = vadd.f32 1.4214138, %v2466_v17  ;;  %v2467_v41 = vmul.f32 %v5387_v10, %v2435_v43  ;;  %v2433_v60 = vadd.f32 -1.4531521, %v2401_v47  ;;  %v5417_v32 = vpop.eup %4374  ;;  %4388 = vpow2.f32 %v2766_v19 }
 0x3be   : > { %v2496_v51 = vadd.f32 1.4214138, %v2464_v24  ;;  %v5428_v4 = vand.u32 2147483647, %v5415_v13  ;;  %v5433_v7 = vmul.f32 0.5, %v5326_v35  ;;  %v5436_v12 = vmul.f32 0.5, %v5332_v55 }
 0x3bf   : > { %v2530_v31 = vmul.f32 %v5378_v62, %v2498_v42  ;;  %v2499_v1 = vadd.f32 1.4214138, %v2467_v41  ;;  %v2465_v3 = vmul.f32 %v5397_v23, %v2433_v60  ;;  %4390 = vpow2.f32 %v2762_v52 }
 0x3c0   : > { %v2528_v61 = vmul.f32 %v5383_v58, %v2496_v51  ;;  %v2282_v55 = vmul.f32 0.3275911, %v5428_v4  ;;  %v5459_v60 = vadd.f32 %v5314_v45, %v5369_v46  ;;  %v6526_v53 = vsub.f32 0.0, %v5428_v4 }
 0x3c1   : > { %v2562_v0 = vadd.f32 -0.28449672, %v2530_v31  ;;  %v5430_v5 = vpop.eup %4376  ;;  %v2531_v9 = vmul.f32 %v5387_v10, %v2499_v1  ;;  %v2497_v11 = vadd.f32 1.4214138, %v2465_v3  ;;  %v5443_v17 = vpop.f32.mrb[32].mxu0  ;;  %vm2886_vm5 = vcmp.lt.f32.partialorder %v5357_v36, 0.0 }
 0x3c2   : > { %v2560_v6 = vadd.f32 -0.28449672, %v2528_v61  ;;  %v5438_v50 = vpop.eup %4378  ;;  %v2406_v54 = vmul.f32 1.0614054, %v5430_v5  ;;  %v5451_v24 = vpop.f32.mrb[33].mxu0  ;;  %v2314_v41 = vadd.f32 1.0, %v2282_v55 }
 0x3c3   : > { %v2594_v8 = vmul.f32 %v5378_v62, %v2562_v0  ;;  %v5445_v18 = vpop.eup %4380  ;;  %v2404_v19 = vmul.f32 1.0614054, %v5438_v50  ;;  %v2563_v42 = vadd.f32 -0.28449672, %v2531_v9  ;;  %v2529_v43 = vmul.f32 %v5397_v23, %v2497_v11  ;;  %v5461_v61 = vpop.f32.mrb[34].mxu0 }
 0x3c4   : > { %v2592_v35 = vmul.f32 %v5383_v58, %v2560_v6  ;;  %v2438_v47 = vadd.f32 -1.4531521, %v2406_v54  ;;  %v5454_v51 = vpop.eup %4382  ;;  %v5469_v9 = vpop.f32.mrb[35].mxu0  ;;  %4392 = vrcp.f32 %v2314_v41  ;;  %vm2884_vm6 = vcmp.lt.f32.partialorder %v5363_v39, 0.0 }
 0x3c5   : > { %v2626_v25 = vadd.f32 0.2548296, %v2594_v8  ;;  %v2436_v31 = vadd.f32 -1.4531521, %v2404_v19  ;;  %v5463_v0 = vpop.eup %4384  ;;  %v2595_v3 = vmul.f32 %v5387_v10, %v2563_v42  ;;  %v2561_v6 = vadd.f32 -0.28449672, %v2529_v43 }
 0x3c6   : > { %v2624_v52 = vadd.f32 0.2548296, %v2592_v35  ;;  %v2470_v8 = vmul.f32 %v5430_v5, %v2438_v47  ;;  %v5471_v11 = vpop.eup %4386  ;;  %v2407_v35 = vmul.f32 1.0614054, %v5454_v51  ;;  %vm2887_vm7 = vcmp.lt.f32.partialorder %v5366_v40, 0.0 }
 0x3c7   : > { %v2658_v1 = vmul.f32 %v5378_v62, %v2626_v25  ;;  %v2468_v54 = vmul.f32 %v5438_v50, %v2436_v31  ;;  %v2627_v19 = vadd.f32 0.2548296, %v2595_v3  ;;  %v2593_v55 = vmul.f32 %v5397_v23, %v2561_v6  ;;  %v5480_v43 = vpop.eup %4388 }
 0x3c8   : > { %v2656_v46 = vmul.f32 %v5383_v58, %v2624_v52  ;;  %v2502_v25 = vadd.f32 1.4214138, %v2470_v8  ;;  %v2439_v52 = vadd.f32 -1.4531521, %v2407_v35  ;;  %v2405_v31 = vmul.f32 1.0614054, %v5471_v11 }
 0x3c9   : > { %v2818_v62 = vmul.f32 %v5391_v16, %v2658_v1  ;;  %v5478_v42 = vpop.f32.mrb[36].mxu0  ;;  %v2500_v58 = vadd.f32 1.4214138, %v2468_v54  ;;  %v2659_v41 = vmul.f32 %v5387_v10, %v2627_v19  ;;  %v2625_v16 = vadd.f32 0.2548296, %v2593_v55  ;;  %v5489_v6 = vpop.eup %4390 }
 0x3ca   : > { %v2816_v47 = vmul.f32 %v5405_v34, %v2656_v46  ;;  %v2534_v1 = vmul.f32 %v5430_v5, %v2502_v25  ;;  %v5487_v3 = vpop.f32.mrb[37].mxu0  ;;  %v2471_v46 = vmul.f32 %v5454_v51, %v2439_v52  ;;  %v2437_v54 = vadd.f32 -1.4531521, %v2405_v31 }
 0x3cb   : > { %v2850_v27 = vsub.f32 1.0, %v2818_v62  ;;  %6524 = vst [vmem:[#allocation4_spill] sm:$0xff] %v5487_v3  ;;  %v2532_v34 = vmul.f32 %v5438_v50, %v2500_v58  ;;  %v5494_v35 = vpop.f32.mrb[38].mxu0  ;;  %v2819_v10 = vmul.f32 %v5408_v48, %v2659_v41  ;;  %v2657_v19 = vmul.f32 %v5397_v23, %v2625_v16 }
 0x3cc   : > { %v2848_v8 = vsub.f32 1.0, %v2816_v47  ;;  %6525 = vst [vmem:[#allocation5_spill] sm:$0xff] %v5494_v35  ;;  %v2566_v55 = vadd.f32 -0.28449672, %v2534_v1  ;;  %v5498_v25 = vpop.f32.mrb[39].mxu0  ;;  %v2469_v3 = vmul.f32 %v5471_v11, %v2437_v54  ;;  %v5586_v40 = vadd.f32 %v5389_v14, %v5314_v45 }
 0x3cd   : > { %v2914_v62 = vsub.f32 0.0, %v2850_v27  ;;  %v2564_v44 = vadd.f32 -0.28449672, %v2532_v34  ;;  %v2503_v47 = vadd.f32 1.4214138, %v2471_v46  ;;  %v2851_v52 = vsub.f32 1.0, %v2819_v10 }
 0x3ce   : > { %v2912_v20 = vsub.f32 0.0, %v2848_v8  ;;  %v2817_v31 = vmul.f32 %v5417_v32, %v2657_v19  ;;  %v2598_v35 = vmul.f32 %v5430_v5, %v2566_v55  ;;  %v5510_v16 = vmul.f32 0.70710677, %v5459_v60  ;;  %v5514_v54 = vpop.eup %4392 }
 0x3cf   : > { %v2946_v58 = vsel %vm2882_vm1, %v2914_v62, %v2850_v27  ;;  %v2596_v23 = vmul.f32 %v5438_v50, %v2564_v44  ;;  %v2535_v41 = vmul.f32 %v5454_v51, %v2503_v47  ;;  %v2915_v34 = vsub.f32 0.0, %v2851_v52 }
 0x3d0   : > { %v2944_v48 = vsel %vm2880_vm2, %v2912_v20, %v2848_v8  ;;  %v2978_v1 = vadd.f32 1.0, %v2946_v58  ;;  %v2849_v46 = vsub.f32 1.0, %v2817_v31  ;;  %v2630_v21 = vadd.f32 0.2548296, %v2598_v35 }
 0x3d1   : > { %v5512_v27 = vpop.f32.mrb[40].mxu0  ;;  %v2628_v32 = vadd.f32 0.2548296, %v2596_v23  ;;  %v2567_v62 = vadd.f32 -0.28449672, %v2535_v41  ;;  %v2730_v44 = vmul.f32 %v6526_v53, %v5428_v4  ;;  %v2976_v20 = vadd.f32 1.0, %v2944_v48 }
 0x3d2   : > { %v2501_v10 = vadd.f32 1.4214138, %v2469_v3  ;;  %v2947_v8 = vsel %vm2883_vm3, %v2915_v34, %v2851_v52  ;;  %v2913_v19 = vsub.f32 0.0, %v2849_v46  ;;  %v2662_v55 = vmul.f32 %v5430_v5, %v2630_v21  ;;  %v5522_v47 = vpop.f32.mrb[41].mxu0 }
 0x3d3   : > { %v2979_v35 = vadd.f32 1.0, %v2947_v8  ;;  %v2660_v58 = vmul.f32 %v5438_v50, %v2628_v32  ;;  %v2599_v31 = vmul.f32 %v5454_v51, %v2567_v62  ;;  %v5527_v23 = vpop.f32.mrb[42].mxu0  ;;  %v5530_v4 = vmul.f32 %v2978_v1, %v5420_v2 }
 0x3d4   : > { %v2533_v3 = vmul.f32 %v5471_v11, %v2501_v10  ;;  %v2945_v57 = vsel %vm2881_vm4, %v2913_v19, %v2849_v46  ;;  %v2822_v52 = vmul.f32 %v5445_v18, %v2662_v55  ;;  %v2410_v5 = vmul.f32 1.0614054, %v5514_v54  ;;  %v5536_v48 = vpop.f32.mrb[43].mxu0 }
 0x3d5   : > { %6527 = vst [vmem:[#allocation6_spill] sm:$0xff] %v5530_v4  ;;  %v5539_v50 = vmul.f32 %v2979_v35, %v5433_v7  ;;  %v2977_v41 = vadd.f32 1.0, %v2945_v57  ;;  %v2820_v34 = vmul.f32 %v5463_v0, %v2660_v58  ;;  %v2631_v21 = vadd.f32 0.2548296, %v2599_v31 }
 0x3d6   : > { %v5543_v32 = vmul.f32 %v2976_v20, %v5423_v38  ;;  %v2854_v2 = vsub.f32 1.0, %v2822_v52  ;;  %v2565_v1 = vadd.f32 -0.28449672, %v2533_v3  ;;  %v2442_v59 = vadd.f32 -1.4531521, %v2410_v5 }
 0x3d7   : > { %v5548_v46 = vmul.f32 %v2977_v41, %v5436_v12  ;;  %v2852_v62 = vsub.f32 1.0, %v2820_v34  ;;  %v2663_v7 = vmul.f32 %v5454_v51, %v2631_v21  ;;  %v5554_v38 = vand.u32 2147483647, %v5510_v16 }
 0x3d8   : > { %v2918_v10 = vsub.f32 0.0, %v2854_v2  ;;  %v2597_v53 = vmul.f32 %v5471_v11, %v2565_v1  ;;  %v2474_v0 = vmul.f32 %v5514_v54, %v2442_v59  ;;  %v2772_v19 = vmul.f32 1.442695, %v2730_v44 }
 0x3d9   : > { %v5556_v20 = vpop.f32.mrb[44].mxu0  ;;  %v2823_v12 = vmul.f32 %v5480_v43, %v2663_v7  ;;  %v2280_v58 = vmul.f32 0.3275911, %v5554_v38  ;;  %v2182_v31 = vmul.f32 0.5, %v5348_v28  ;;  %v2916_v3 = vsub.f32 0.0, %v2852_v62 }
 0x3da   : > { %v2950_v55 = vsel %vm2886_vm5, %v2918_v10, %v2854_v2  ;;  %v2629_v51 = vadd.f32 0.2548296, %v2597_v53  ;;  %v2506_v35 = vadd.f32 1.4214138, %v2474_v0  ;;  %v5566_v52 = vadd.f32 %v5373_v49, %v5314_v45  ;;  %v5581_v1 = vpop.f32.mrb[45].mxu0 }
 0x3db   : > { %v2855_v57 = vsub.f32 1.0, %v2823_v12  ;;  %v2183_v5 = vmul.f32 0.5, %v5354_v33  ;;  %v2312_v44 = vadd.f32 1.0, %v2280_v58  ;;  %v2982_v41 = vadd.f32 1.0, %v2950_v55 }
 0x3dc   : > { %v2661_v36 = vmul.f32 %v5471_v11, %v2629_v51  ;;  %v2538_v43 = vmul.f32 %v5514_v54, %v2506_v35  ;;  %4394 = vpow2.f32 %v2772_v19  ;;  %v2948_v49 = vsel %vm2884_vm6, %v2916_v3, %v2852_v62 }
 0x3dd   : > { %v2919_v34 = vsub.f32 0.0, %v2855_v57  ;;  %4396 = vrcp.f32 %v2312_v44  ;;  %v5575_v33 = vmul.f32 0.70710677, %v5566_v52  ;;  %v5579_v11 = vadd.f32 %v5314_v45, %v5381_v56 }
 0x3de   : > { %v2821_v28 = vmul.f32 %v5489_v6, %v2661_v36  ;;  %v2570_v21 = vadd.f32 -0.28449672, %v2538_v43  ;;  %v5588_v6 = vpop.f32.mrb[46].mxu0  ;;  %v5590_v62 = vmul.f32 %v2982_v41, %v2182_v31  ;;  %v2180_v10 = vmul.f32 0.5, %v5351_v29 }
 0x3df   : > { %v2951_v2 = vsel %vm2887_vm7, %v2919_v34, %v2855_v57  ;;  %6528 = vst [vmem:[#allocation7_spill] sm:$0xff] %v5588_v6  ;;  %vm2885_vm8 = vcmp.lt.f32.partialorder %v5376_v63, 0.0  ;;  %v2251_v56 = vand.u32 2147483647, %v5575_v33  ;;  %v5595_v53 = vpop.f32.mrb[47].mxu0  ;;  %v2980_v14 = vadd.f32 1.0, %v2948_v49 }
 0x3e0   : > { %v2983_v39 = vadd.f32 1.0, %v2951_v2  ;;  %v2853_v59 = vsub.f32 1.0, %v2821_v28  ;;  %v2602_v7 = vmul.f32 %v5514_v54, %v2570_v21  ;;  %6529 = vst [vmem:[#allocation8_spill] sm:$0xff] %v5590_v62  ;;  %6530 = vst [vmem:[#allocation9_spill] sm:$0xff] %v5595_v53  ;;  %v5600_v55 = vmul.f32 0.70710677, %v5579_v11 }
 0x3e1   : > { %v2696_v51 = vsub.f32 0.0, %v5554_v38  ;;  %v2283_v35 = vmul.f32 0.3275911, %v2251_v56  ;;  %v5604_v58 = vmul.f32 0.70710677, %v5586_v40  ;;  %v2181_v57 = vmul.f32 0.5, %v5360_v37 }
 0x3e2   : > { %v5597_v0 = vmul.f32 %v2983_v39, %v2183_v5  ;;  %v2917_v12 = vsub.f32 0.0, %v2853_v59  ;;  %v2634_v19 = vadd.f32 0.2548296, %v2602_v7  ;;  %v2249_v3 = vand.u32 2147483647, %v5600_v55 }
 0x3e3   : > { %v2315_v36 = vadd.f32 1.0, %v2283_v35  ;;  %v2699_v43 = vsub.f32 0.0, %v2251_v56  ;;  %v2254_v41 = vand.u32 2147483647, %v5604_v58  ;;  %v5612_v28 = vmul.f32 %v2980_v14, %v2180_v10 }
 0x3e4   : > { %6531 = vst [vmem:[#allocation10_spill] sm:$0xff] %v5597_v0  ;;  %v2949_v63 = vsel %vm2885_vm8, %v2917_v12, %v2853_v59  ;;  %v2666_v31 = vmul.f32 %v5514_v54, %v2634_v19  ;;  %v2281_v44 = vmul.f32 0.3275911, %v2249_v3  ;;  %v2728_v54 = vmul.f32 %v2696_v51, %v5554_v38 }
 0x3e5   : > { %v2981_v5 = vadd.f32 1.0, %v2949_v63  ;;  %6532 = vst [vmem:[#allocation11_spill] sm:$0xff] %v5612_v28  ;;  %4398 = vrcp.f32 %v2315_v36  ;;  %v2286_v59 = vmul.f32 0.3275911, %v2254_v41  ;;  %v2731_v12 = vmul.f32 %v2699_v43, %v2251_v56 }
 0x3e6   : > { %v4395_v34 = vpop.eup %4394  ;;  %v2313_v39 = vadd.f32 1.0, %v2281_v44  ;;  %v2697_v19 = vsub.f32 0.0, %v2249_v3  ;;  %v5624_v35 = vadd.f32 %v5314_v45, %v5395_v22  ;;  %v5628_v63 = vadd.f32 %v5403_v30, %v5314_v45 }
 0x3e7   : > { %v5614_v21 = vmul.f32 %v2981_v5, %v2181_v57  ;;  %v5616_v49 = vpop.eup %4396  ;;  %v2826_v2 = vmul.f32 %v4395_v34, %v2666_v31  ;;  %v2318_v10 = vadd.f32 1.0, %v2286_v59  ;;  %v5631_v38 = vmul.f32 0.5, %v5401_v26 }
 0x3e8   : > { %v2408_v7 = vmul.f32 1.0614054, %v5616_v49  ;;  %4400 = vrcp.f32 %v2313_v39  ;;  %v2768_v31 = vmul.f32 1.442695, %v2728_v54  ;;  %v2774_v56 = vmul.f32 1.442695, %v2731_v12 }
 0x3e9   : > { %6533 = vst [vmem:[#allocation12_spill] sm:$0xff] %v5614_v21  ;;  %v2858_v51 = vsub.f32 1.0, %v2826_v2  ;;  %4402 = vrcp.f32 %v2318_v10  ;;  %v5636_v5 = vadd.f32 %v5314_v45, %v5410_v15  ;;  %vm2890_vm9 = vcmp.lt.f32.partialorder %v5415_v13, 0.0 }
 0x3ea   : > { %v2440_v14 = vadd.f32 -1.4531521, %v2408_v7  ;;  %v2729_v22 = vmul.f32 %v2697_v19, %v2249_v3  ;;  %v5640_v36 = vmul.f32 0.70710677, %v5624_v35  ;;  %v5643_v30 = vmul.f32 0.70710677, %v5628_v63 }
 0x3eb   : > { %v5646_v26 = vmul.f32 0.5, %v5459_v60  ;;  %v5649_v44 = vmul.f32 0.5, %v5566_v52  ;;  %v2702_v34 = vsub.f32 0.0, %v2254_v41  ;;  %v2922_v2 = vsub.f32 0.0, %v2858_v51 }
 0x3ec   : > { %v2472_v57 = vmul.f32 %v5616_v49, %v2440_v14  ;;  %4404 = vpow2.f32 %v2768_v31  ;;  %v2252_v15 = vand.u32 2147483647, %v5640_v36  ;;  %v2255_v3 = vand.u32 2147483647, %v5643_v30 }
 0x3ed   : > { %4406 = vpow2.f32 %v2774_v56  ;;  %v5657_v59 = vmul.f32 0.5, %v5579_v11  ;;  %v5660_v60 = vmul.f32 0.70710677, %v5636_v5  ;;  %v2770_v7 = vmul.f32 1.442695, %v2729_v22 }
 0x3ee   : > { %v2504_v43 = vadd.f32 1.4214138, %v2472_v57  ;;  %v2284_v12 = vmul.f32 0.3275911, %v2252_v15  ;;  %v5665_v19 = vadd.f32 %v5443_v17, %v5314_v45  ;;  %v2734_v14 = vmul.f32 %v2702_v34, %v2254_v41 }
 0x3ef   : > { %v5653_v54 = vpop.eup %4398  ;;  %v2287_v31 = vmul.f32 0.3275911, %v2255_v3  ;;  %v2253_v57 = vand.u32 2147483647, %v5660_v60  ;;  %v2954_v11 = vsel %vm2890_vm9, %v2922_v2, %v2858_v51  ;;  %v2700_v37 = vsub.f32 0.0, %v2252_v15 }
 0x3f0   : > { %v2536_v39 = vmul.f32 %v5616_v49, %v2504_v43  ;;  %v2411_v52 = vmul.f32 1.0614054, %v5653_v54  ;;  %v2316_v29 = vadd.f32 1.0, %v2284_v12  ;;  %v2703_v41 = vsub.f32 0.0, %v2255_v3 }
 0x3f1   : > { %v2319_v8 = vadd.f32 1.0, %v2287_v31  ;;  %v2285_v17 = vmul.f32 0.3275911, %v2253_v57  ;;  %v5676_v34 = vmul.f32 0.70710677, %v5665_v19  ;;  %v2701_v0 = vsub.f32 0.0, %v2253_v57 }
 0x3f2   : > { %v2568_v10 = vadd.f32 -0.28449672, %v2536_v39  ;;  %v5668_v56 = vpop.eup %4400  ;;  %v2443_v43 = vadd.f32 -1.4531521, %v2411_v52  ;;  %4408 = vrcp.f32 %v2316_v29  ;;  %v2986_v31 = vadd.f32 1.0, %v2954_v11 }
 0x3f3   : > { %v2409_v18 = vmul.f32 1.0614054, %v5668_v56  ;;  %v5678_v62 = vpop.eup %4402  ;;  %4410 = vrcp.f32 %v2319_v8  ;;  %v2317_v2 = vadd.f32 1.0, %v2285_v17  ;;  %v2780_v17 = vmul.f32 1.442695, %v2734_v14 }
 0x3f4   : > { %v2600_v22 = vmul.f32 %v5616_v49, %v2568_v10  ;;  %v2475_v39 = vmul.f32 %v5653_v54, %v2443_v43  ;;  %v2414_v12 = vmul.f32 1.0614054, %v5678_v62  ;;  %v2732_v10 = vmul.f32 %v2700_v37, %v2252_v15 }
 0x3f5   : > { %v2441_v51 = vadd.f32 -1.4531521, %v2409_v18  ;;  %4412 = vpow2.f32 %v2770_v7  ;;  %v5686_v18 = vadd.f32 %v5314_v45, %v5451_v24  ;;  %v2735_v37 = vmul.f32 %v2703_v41, %v2255_v3 }
 0x3f6   : > { %v2632_v13 = vadd.f32 0.2548296, %v2600_v22  ;;  %v2507_v52 = vadd.f32 1.4214138, %v2475_v39  ;;  %v4405_v43 = vpop.eup %4404  ;;  %v2446_v53 = vadd.f32 -1.4531521, %v2414_v12  ;;  %4414 = vrcp.f32 %v2317_v2 }
 0x3f7   : > { %v2473_v29 = vmul.f32 %v5668_v56, %v2441_v51  ;;  %v4407_v8 = vpop.eup %4406  ;;  %v2258_v15 = vand.u32 2147483647, %v5676_v34  ;;  %v2776_v39 = vmul.f32 1.442695, %v2732_v10  ;;  %v2733_v7 = vmul.f32 %v2701_v0, %v2253_v57 }
 0x3f8   : > { %v2664_v28 = vmul.f32 %v5616_v49, %v2632_v13  ;;  %v2539_v21 = vmul.f32 %v5653_v54, %v2507_v52  ;;  %v2478_v49 = vmul.f32 %v5678_v62, %v2446_v53  ;;  %v5692_v2 = vmul.f32 0.5, %v5586_v40 }
 0x3f9   : > { %v2505_v22 = vadd.f32 1.4214138, %v2473_v29  ;;  %v2290_v52 = vmul.f32 0.3275911, %v2258_v15  ;;  %v5695_v24 = vmul.f32 %v2986_v31, %v5631_v38  ;;  %v5699_v41 = vmul.f32 0.70710677, %v5686_v18 }
 0x3fa   : > { %v2571_v11 = vadd.f32 -0.28449672, %v2539_v21  ;;  %v2824_v13 = vmul.f32 %v4405_v43, %v2664_v28  ;;  %v2510_v3 = vadd.f32 1.4214138, %v2478_v49  ;;  %4416 = vpow2.f32 %v2780_v17 }
 0x3fb   : > { %v2537_v51 = vmul.f32 %v5668_v56, %v2505_v22  ;;  %v2782_v53 = vmul.f32 1.442695, %v2735_v37  ;;  %v2322_v0 = vadd.f32 1.0, %v2290_v52  ;;  %vm2888_vm10 = vcmp.lt.f32.partialorder %v5510_v16, 0.0 }
 0x3fc   : > { %v2603_v14 = vmul.f32 %v5653_v54, %v2571_v11  ;;  %v5701_v28 = vpop.eup %4408  ;;  %v2542_v57 = vmul.f32 %v5678_v62, %v2510_v3  ;;  %4418 = vpow2.f32 %v2776_v39  ;;  %v2778_v38 = vmul.f32 1.442695, %v2733_v7 }
 0x3fd   : > { %v2569_v21 = vadd.f32 -0.28449672, %v2537_v51  ;;  %v5705_v12 = vpop.eup %4410  ;;  %v2856_v10 = vsub.f32 1.0, %v2824_v13  ;;  %vm2891_vm11 = vcmp.lt.f32.partialorder %v5575_v33, 0.0  ;;  %v2412_v29 = vmul.f32 1.0614054, %v5701_v28 }
 0x3fe   : > { %v2635_v40 = vadd.f32 0.2548296, %v2603_v14  ;;  %4420 = vrcp.f32 %v2322_v0  ;;  %v2574_v22 = vadd.f32 -0.28449672, %v2542_v57  ;;  %v2415_v17 = vmul.f32 1.0614054, %v5705_v12 }
 0x3ff   : > { %v2601_v31 = vmul.f32 %v5668_v56, %v2569_v21  ;;  %v5713_v37 = vand.u32 2147483647, %v5699_v41  ;;  %v4413_v11 = vpop.eup %4412  ;;  %v2444_v39 = vadd.f32 -1.4531521, %v2412_v29  ;;  %4422 = vpow2.f32 %v2782_v53 }
 0x400   : > { %v2667_v43 = vmul.f32 %v5653_v54, %v2635_v40  ;;  %v2706_v7 = vsub.f32 0.0, %v2258_v15  ;;  %v5715_v13 = vpop.eup %4414  ;;  %vm2889_vm12 = vcmp.lt.f32.partialorder %v5600_v55, 0.0  ;;  %v2606_v52 = vmul.f32 %v5678_v62, %v2574_v22 }
 0x401   : > { %v2633_v49 = vadd.f32 0.2548296, %v2601_v31  ;;  %v2447_v14 = vadd.f32 -1.4531521, %v2415_v17  ;;  %4424 = vpow2.f32 %v2778_v38  ;;  %v2920_v54 = vsub.f32 0.0, %v2856_v10 }
 0x402   : > { %v2827_v51 = vmul.f32 %v4407_v8, %v2667_v43  ;;  %v2476_v21 = vmul.f32 %v5701_v28, %v2444_v39  ;;  %v2413_v0 = vmul.f32 1.0614054, %v5715_v13  ;;  %v2638_v57 = vadd.f32 0.2548296, %v2606_v52 }
 0x403   : > { %v2665_v3 = vmul.f32 %v5668_v56, %v2633_v49  ;;  %v2479_v53 = vmul.f32 %v5705_v12, %v2447_v14  ;;  %v2288_v31 = vmul.f32 0.3275911, %v5713_v37  ;;  %v2738_v6 = vmul.f32 %v2706_v7, %v2258_v15 }
 0x404   : > { %v2859_v40 = vsub.f32 1.0, %v2827_v51  ;;  %v2508_v29 = vadd.f32 1.4214138, %v2476_v21  ;;  %v2445_v43 = vadd.f32 -1.4531521, %v2413_v0  ;;  %v2670_v38 = vmul.f32 %v5678_v62, %v2638_v57  ;;  %v4417_v56 = vpop.eup %4416 }
 0x405   : > { %v2825_v8 = vmul.f32 %v4413_v11, %v2665_v3  ;;  %v2511_v17 = vadd.f32 1.4214138, %v2479_v53  ;;  %v2320_v4 = vadd.f32 1.0, %v2288_v31  ;;  %v2952_v49 = vsel %vm2888_vm10, %v2920_v54, %v2856_v10 }
 0x406   : > { %v2923_v22 = vsub.f32 0.0, %v2859_v40  ;;  %v2540_v51 = vmul.f32 %v5701_v28, %v2508_v29  ;;  %v2477_v52 = vmul.f32 %v5715_v13, %v2445_v43  ;;  %v4419_v14 = vpop.eup %4418  ;;  %v2830_v3 = vmul.f32 %v4417_v56, %v2670_v38 }
 0x407   : > { %v2857_v39 = vsub.f32 1.0, %v2825_v8  ;;  %v2543_v15 = vmul.f32 %v5705_v12, %v2511_v17  ;;  %4426 = vrcp.f32 %v2320_v4  ;;  %v2984_v10 = vadd.f32 1.0, %v2952_v49 }
 0x408   : > { %v2955_v11 = vsel %vm2891_vm11, %v2923_v22, %v2859_v40  ;;  %v5732_v62 = vpop.eup %4420  ;;  %v2572_v0 = vadd.f32 -0.28449672, %v2540_v51  ;;  %v2509_v16 = vadd.f32 1.4214138, %v2477_v52  ;;  %v2862_v54 = vsub.f32 1.0, %v2830_v3 }
 0x409   : > { %v2987_v7 = vadd.f32 1.0, %v2955_v11  ;;  %v2921_v21 = vsub.f32 0.0, %v2857_v39  ;;  %vm2894_vm13 = vcmp.lt.f32.partialorder %v5604_v58, 0.0  ;;  %v2575_v57 = vadd.f32 -0.28449672, %v2543_v15  ;;  %v4423_v31 = vpop.eup %4422 }
 0x40a   : > { %v2418_v53 = vmul.f32 1.0614054, %v5732_v62  ;;  %v2604_v40 = vmul.f32 %v5701_v28, %v2572_v0  ;;  %v2541_v8 = vmul.f32 %v5715_v13, %v2509_v16  ;;  %v5746_v17 = vadd.f32 %v5461_v61, %v5314_v45 }
 0x40b   : > { %v5737_v33 = vmul.f32 %v2987_v7, %v5649_v44  ;;  %v2953_v4 = vsel %vm2889_vm12, %v2921_v21, %v2857_v39  ;;  %v4425_v29 = vpop.eup %4424  ;;  %v2607_v22 = vmul.f32 %v5705_v12, %v2575_v57  ;;  %v2788_v55 = vmul.f32 1.442695, %v2738_v6 }
 0x40c   : > { %v2985_v43 = vadd.f32 1.0, %v2953_v4  ;;  %v2450_v38 = vadd.f32 -1.4531521, %v2418_v53  ;;  %v2636_v56 = vadd.f32 0.2548296, %v2604_v40  ;;  %v5751_v39 = vmul.f32 %v2984_v10, %v5646_v26 }
 0x40d   : > { %v2573_v49 = vadd.f32 -0.28449672, %v2541_v8  ;;  %vm2892_vm14 = vcmp.lt.f32.partialorder %v5640_v36, 0.0  ;;  %v2639_v52 = vadd.f32 0.2548296, %v2607_v22  ;;  %v2926_v3 = vsub.f32 0.0, %v2862_v54 }
 0x40e   : > { %v5754_v51 = vmul.f32 %v2985_v43, %v5657_v59  ;;  %v2482_v11 = vmul.f32 %v5732_v62, %v2450_v38  ;;  %v2668_v61 = vmul.f32 %v5701_v28, %v2636_v56  ;;  %v2704_v7 = vsub.f32 0.0, %v5713_v37 }
 0x40f   : > { %v2605_v15 = vmul.f32 %v5715_v13, %v2573_v49  ;;  %v2671_v26 = vmul.f32 %v5705_v12, %v2639_v52  ;;  %v5765_v59 = vmul.f32 0.70710677, %v5746_v17  ;;  %vm2895_vm15 = vcmp.lt.f32.partialorder %v5643_v30, 0.0 }
 0x410   : > { %v2514_v21 = vadd.f32 1.4214138, %v2482_v11  ;;  %v2828_v0 = vmul.f32 %v4419_v14, %v2668_v61  ;;  %v5770_v28 = vadd.f32 %v5314_v45, %v5469_v9  ;;  %4428 = vpow2.f32 %v2788_v55 }
 0x411   : > { %v2637_v16 = vadd.f32 0.2548296, %v2605_v15  ;;  %v5772_v10 = vpop.eup %4426  ;;  %v2831_v57 = vmul.f32 %v4423_v31, %v2671_v26  ;;  %v2259_v12 = vand.u32 2147483647, %v5765_v59  ;;  %v2958_v4 = vsel %vm2894_vm13, %v2926_v3, %v2862_v54 }
 0x412   : > { %v2546_v53 = vmul.f32 %v5732_v62, %v2514_v21  ;;  %v2860_v40 = vsub.f32 1.0, %v2828_v0  ;;  %v2416_v8 = vmul.f32 1.0614054, %v5772_v10  ;;  %v2736_v9 = vmul.f32 %v2704_v7, %v5713_v37 }
 0x413   : > { %v2669_v14 = vmul.f32 %v5715_v13, %v2637_v16  ;;  %v2863_v43 = vsub.f32 1.0, %v2831_v57  ;;  %v2291_v38 = vmul.f32 0.3275911, %v2259_v12  ;;  %v5782_v55 = vmul.f32 0.70710677, %v5770_v28 }
 0x414   : > { %v2578_v22 = vadd.f32 -0.28449672, %v2546_v53  ;;  %v2924_v56 = vsub.f32 0.0, %v2860_v40  ;;  %v2448_v49 = vadd.f32 -1.4531521, %v2416_v8  ;;  %v2990_v52 = vadd.f32 1.0, %v2958_v4 }
 0x415   : > { %v2829_v31 = vmul.f32 %v4425_v29, %v2669_v14  ;;  %v2927_v11 = vsub.f32 0.0, %v2863_v43  ;;  %v2323_v54 = vadd.f32 1.0, %v2291_v38  ;;  %v2257_v37 = vand.u32 2147483647, %v5782_v55 }
 0x416   : > { %v2610_v58 = vmul.f32 %v5732_v62, %v2578_v22  ;;  %v2956_v13 = vsel %vm2892_vm14, %v2924_v56, %v2860_v40  ;;  %v2480_v61 = vmul.f32 %v5772_v10, %v2448_v49  ;;  %v2191_v15 = vmul.f32 0.5, %v5628_v63  ;;  %v6534_v49 = vld [vmem:[#allocation4_spill] sm:$0xff] }
 0x417   : > { %v2861_v3 = vsub.f32 1.0, %v2829_v31  ;;  %v2959_v29 = vsel %vm2895_vm15, %v2927_v11, %v2863_v43  ;;  %4430 = vrcp.f32 %v2323_v54  ;;  %v2784_v16 = vmul.f32 1.442695, %v2736_v9 }
 0x418   : > { %v2642_v7 = vadd.f32 0.2548296, %v2610_v58  ;;  %v2991_v26 = vadd.f32 1.0, %v2959_v29  ;;  %v2512_v0 = vadd.f32 1.4214138, %v2480_v61  ;;  %v2188_v57 = vmul.f32 0.5, %v5624_v35 }
 0x419   : > { %v2925_v21 = vsub.f32 0.0, %v2861_v3  ;;  %v2988_v36 = vadd.f32 1.0, %v2956_v13  ;;  %vm2893_vm1 = vcmp.lt.f32.partialorder %v5660_v60, 0.0  ;;  %v2289_v53 = vmul.f32 0.3275911, %v2257_v37  ;;  %v6535_v58 = vld [vmem:[#allocation5_spill] sm:$0xff] }
 0x41a   : > { %v5795_v4 = vmul.f32 %v2990_v52, %v5692_v2  ;;  %v5797_v40 = vmul.f32 %v2991_v26, %v2191_v15  ;;  %v2544_v30 = vmul.f32 %v5772_v10, %v2512_v0  ;;  %v4429_v14 = vpop.eup %4428  ;;  %v2189_v8 = vmul.f32 0.5, %v5636_v5 }
 0x41b   : > { %v2957_v63 = vsel %vm2893_vm1, %v2925_v21, %v2861_v3  ;;  %v2674_v22 = vmul.f32 %v5732_v62, %v2642_v7  ;;  %v2321_v9 = vadd.f32 1.0, %v2289_v53  ;;  %4432 = vpow2.f32 %v2784_v16 }
 0x41c   : > { %v2989_v43 = vadd.f32 1.0, %v2957_v63  ;;  %v2576_v60 = vadd.f32 -0.28449672, %v2544_v30  ;;  %v5806_v2 = vadd.f32 %v5478_v42, %v5314_v45  ;;  %v5808_v38 = vmul.f32 %v2988_v36, %v2188_v57 }
 0x41d   : > { %v2707_v31 = vsub.f32 0.0, %v2259_v12  ;;  %4434 = vrcp.f32 %v2321_v9  ;;  %v5818_v52 = vadd.f32 %v5314_v45, %v6534_v49  ;;  %v2834_v42 = vmul.f32 %v4429_v14, %v2674_v22 }
 0x41e   : > { %v5810_v56 = vmul.f32 %v2989_v43, %v2189_v8  ;;  %v2608_v5 = vmul.f32 %v5772_v10, %v2576_v60  ;;  %v5814_v62 = vmul.f32 0.70710677, %v5806_v2  ;;  %v5824_v54 = vadd.f32 %v6535_v58, %v5314_v45 }
 0x41f   : > { %v2739_v15 = vmul.f32 %v2707_v31, %v2259_v12  ;;  %v2705_v29 = vsub.f32 0.0, %v2257_v37  ;;  %v5830_v7 = vmul.f32 0.70710677, %v5818_v52  ;;  %v2866_v16 = vsub.f32 1.0, %v2834_v42 }
 0x420   : > { %v2640_v13 = vadd.f32 0.2548296, %v2608_v5  ;;  %v2262_v3 = vand.u32 2147483647, %v5814_v62  ;;  %v5833_v26 = vmul.f32 0.70710677, %v5824_v54 }
 0x421   : > { %v5827_v61 = vpop.eup %4430  ;;  %v2260_v36 = vand.u32 2147483647, %v5830_v7  ;;  %v2790_v30 = vmul.f32 1.442695, %v2739_v15  ;;  %v2737_v14 = vmul.f32 %v2705_v29, %v2257_v37  ;;  %v2194_v9 = vmul.f32 0.5, %v5665_v19 }
 0x422   : > { %v2419_v21 = vmul.f32 1.0614054, %v5827_v61  ;;  %v2294_v0 = vmul.f32 0.3275911, %v2262_v3  ;;  %v2672_v57 = vmul.f32 %v5772_v10, %v2640_v13  ;;  %v5839_v53 = vand.u32 2147483647, %v5833_v26 }
 0x423   : > { %v2292_v8 = vmul.f32 0.3275911, %v2260_v36  ;;  %v2930_v10 = vsub.f32 0.0, %v2866_v16  ;;  %v2710_v49 = vsub.f32 0.0, %v2262_v3  ;;  %vm2898_vm2 = vcmp.lt.f32.partialorder %v5676_v34, 0.0 }
 0x424   : > { %v2451_v63 = vadd.f32 -1.4531521, %v2419_v21  ;;  %v2326_v12 = vadd.f32 1.0, %v2294_v0  ;;  %v2295_v43 = vmul.f32 0.3275911, %v5839_v53  ;;  %v2708_v29 = vsub.f32 0.0, %v2260_v36 }
 0x425   : > { %v4433_v22 = vpop.eup %4432  ;;  %v2324_v42 = vadd.f32 1.0, %v2292_v8  ;;  %v2786_v15 = vmul.f32 1.442695, %v2737_v14  ;;  %v5850_v19 = vadd.f32 %v5314_v45, %v5498_v25  ;;  %v5853_v21 = vmul.f32 0.5, %v5686_v18 }
 0x426   : > { %v2483_v60 = vmul.f32 %v5827_v61, %v2451_v63  ;;  %4436 = vrcp.f32 %v2326_v12  ;;  %v2832_v5 = vmul.f32 %v4433_v22, %v2672_v57  ;;  %v2327_v13 = vadd.f32 1.0, %v2295_v43 }
 0x427   : > { %v5844_v31 = vpop.eup %4434  ;;  %4438 = vpow2.f32 %v2790_v30  ;;  %v2962_v63 = vsel %vm2898_vm2, %v2930_v10, %v2866_v16  ;;  %v5857_v12 = vmul.f32 0.5, %v5746_v17  ;;  %v2742_v8 = vmul.f32 %v2710_v49, %v2262_v3 }
 0x428   : > { %v2515_v58 = vadd.f32 1.4214138, %v2483_v60  ;;  %v2417_v37 = vmul.f32 1.0614054, %v5844_v31  ;;  %4440 = vrcp.f32 %v2324_v42  ;;  %v2864_v34 = vsub.f32 1.0, %v2832_v5 }
 0x429   : > { %vm2896_vm3 = vcmp.lt.f32.partialorder %v5699_v41, 0.0  ;;  %4442 = vrcp.f32 %v2327_v13  ;;  %v5862_v25 = vmul.f32 0.70710677, %v5850_v19  ;;  %v5865_v18 = vmul.f32 0.5, %v5770_v28 }
 0x42a   : > { %v2547_v0 = vmul.f32 %v5827_v61, %v2515_v58  ;;  %v2449_v57 = vadd.f32 -1.4531521, %v2417_v37  ;;  %4444 = vpow2.f32 %v2786_v15  ;;  %v2740_v43 = vmul.f32 %v2708_v29, %v2260_v36 }
 0x42b   : > { %v5869_v16 = vadd.f32 %v5512_v27, %v5314_v45  ;;  %v2261_v22 = vand.u32 2147483647, %v5862_v25  ;;  %v5875_v60 = vadd.f32 %v5314_v45, %v5522_v47  ;;  %v2994_v10 = vadd.f32 1.0, %v2962_v63 }
 0x42c   : > { %v2579_v30 = vadd.f32 -0.28449672, %v2547_v0  ;;  %v2481_v14 = vmul.f32 %v5844_v31, %v2449_v57  ;;  %v2796_v5 = vmul.f32 1.442695, %v2742_v8  ;;  %v2711_v28 = vsub.f32 0.0, %v5839_v53 }
 0x42d   : > { %6536 = vst [vmem:[#allocation4_spill] sm:$0xff] %v5875_v60  ;;  %v5879_v49 = vmul.f32 0.70710677, %v5869_v16  ;;  %v2928_v27 = vsub.f32 0.0, %v2864_v34  ;;  %v2293_v37 = vmul.f32 0.3275911, %v2261_v22 }
 0x42e   : > { %v2611_v17 = vmul.f32 %v5827_v61, %v2579_v30  ;;  %v2513_v3 = vadd.f32 1.4214138, %v2481_v14  ;;  %vm2899_vm4 = vcmp.lt.f32.partialorder %v5765_v59, 0.0  ;;  %v2792_v47 = vmul.f32 1.442695, %v2740_v43 }
 0x42f   : > { %v5887_v15 = vand.u32 2147483647, %v5879_v49  ;;  %v2325_v57 = vadd.f32 1.0, %v2293_v37  ;;  %v5891_v63 = vmul.f32 0.70710677, %v5875_v60  ;;  %v5893_v30 = vmul.f32 %v2994_v10, %v2194_v9 }
 0x430   : > { %v5881_v36 = vpop.eup %4436  ;;  %v2643_v42 = vadd.f32 0.2548296, %v2611_v17  ;;  %v2545_v58 = vmul.f32 %v5844_v31, %v2513_v3  ;;  %4446 = vpow2.f32 %v2796_v5  ;;  %v2743_v11 = vmul.f32 %v2711_v28, %v5839_v53 }
 0x431   : > { %v2422_v13 = vmul.f32 1.0614054, %v5881_v36  ;;  %v4439_v8 = vpop.eup %4438  ;;  %v2298_v17 = vmul.f32 0.3275911, %v5887_v15  ;;  %4448 = vrcp.f32 %v2325_v57  ;;  %vm2897_vm5 = vcmp.lt.f32.partialorder %v5782_v55, 0.0 }
 0x432   : > { %v2675_v29 = vmul.f32 %v5827_v61, %v2643_v42  ;;  %v2577_v0 = vadd.f32 -0.28449672, %v2545_v58  ;;  %v5896_v3 = vpop.eup %4440  ;;  %v2960_v61 = vsel %vm2896_vm3, %v2928_v27, %v2864_v34  ;;  %4450 = vpow2.f32 %v2792_v47 }
 0x433   : > { %v2454_v14 = vadd.f32 -1.4531521, %v2422_v13  ;;  %v2420_v9 = vmul.f32 1.0614054, %v5896_v3  ;;  %v2330_v10 = vadd.f32 1.0, %v2298_v17  ;;  %v5904_v58 = vpop.eup %4442  ;;  %v2992_v6 = vadd.f32 1.0, %v2960_v61 }
 0x434   : > { %v2835_v43 = vmul.f32 %v4439_v8, %v2675_v29  ;;  %v2609_v35 = vmul.f32 %v5844_v31, %v2577_v0  ;;  %v5907_v13 = vand.u32 2147483647, %v5891_v63  ;;  %v4445_v29 = vpop.eup %4444  ;;  %v2423_v41 = vmul.f32 1.0614054, %v5904_v58 }
 0x435   : > { %v2486_v42 = vmul.f32 %v5881_v36, %v2454_v14  ;;  %v2452_v28 = vadd.f32 -1.4531521, %v2420_v9  ;;  %4452 = vrcp.f32 %v2330_v10  ;;  %v2709_v0 = vsub.f32 0.0, %v2261_v22 }
 0x436   : > { %v2867_v5 = vsub.f32 1.0, %v2835_v43  ;;  %v2641_v37 = vadd.f32 0.2548296, %v2609_v35  ;;  %v2296_v57 = vmul.f32 0.3275911, %v5907_v13  ;;  %v5919_v9 = vadd.f32 %v5527_v23, %v5314_v45 }
 0x437   : > { %v2518_v53 = vadd.f32 1.4214138, %v2486_v42  ;;  %v2484_v47 = vmul.f32 %v5896_v3, %v2452_v28  ;;  %v2455_v8 = vadd.f32 -1.4531521, %v2423_v41  ;;  %v2798_v14 = vmul.f32 1.442695, %v2743_v11 }
 0x438   : > { %v2931_v34 = vsub.f32 0.0, %v2867_v5  ;;  %v2673_v27 = vmul.f32 %v5844_v31, %v2641_v37  ;;  %v2328_v42 = vadd.f32 1.0, %v2296_v57  ;;  %v2741_v60 = vmul.f32 %v2709_v0, %v2261_v22 }
 0x439   : > { %v2550_v35 = vmul.f32 %v5881_v36, %v2518_v53  ;;  %v2516_v37 = vadd.f32 1.4214138, %v2484_v47  ;;  %v2487_v44 = vmul.f32 %v5904_v58, %v2455_v8  ;;  %v5931_v61 = vmul.f32 0.70710677, %v5919_v9 }
 0x43a   : > { %v2963_v17 = vsel %vm2899_vm4, %v2931_v34, %v2867_v5  ;;  %v2833_v43 = vmul.f32 %v4445_v29, %v2673_v27  ;;  %4454 = vrcp.f32 %v2328_v42  ;;  %v4447_v28 = vpop.eup %4446  ;;  %v2714_v34 = vsub.f32 0.0, %v5887_v15 }
 0x43b   : > { %v2995_v10 = vadd.f32 1.0, %v2963_v17  ;;  %v2582_v31 = vadd.f32 -0.28449672, %v2550_v35  ;;  %v2548_v5 = vmul.f32 %v5896_v3, %v2516_v37  ;;  %v2519_v29 = vadd.f32 1.4214138, %v2487_v44  ;;  %v5927_v23 = vpop.eup %4448 }
 0x43c   : > { %v2865_v53 = vsub.f32 1.0, %v2833_v43  ;;  %4456 = vpow2.f32 %v2798_v14  ;;  %v4451_v57 = vpop.eup %4450  ;;  %v2421_v35 = vmul.f32 1.0614054, %v5927_v23  ;;  %v2794_v47 = vmul.f32 1.442695, %v2741_v60 }
 0x43d   : > { %v5923_v11 = vmul.f32 %v2995_v10, %v5857_v12  ;;  %v2614_v59 = vmul.f32 %v5881_v36, %v2582_v31  ;;  %v2580_v12 = vadd.f32 -0.28449672, %v2548_v5  ;;  %v2551_v0 = vmul.f32 %v5904_v58, %v2519_v29 }
 0x43e   : > { %v2929_v41 = vsub.f32 0.0, %v2865_v53  ;;  %v5940_v8 = vand.u32 2147483647, %v5931_v61  ;;  %v5947_v31 = vmul.f32 %v2992_v6, %v5853_v21  ;;  %v2453_v37 = vadd.f32 -1.4531521, %v2421_v35 }
 0x43f   : > { %v3049_v22 = vpack.c.bf16 %v5923_v11, %v5893_v30  ;;  %v2646_v27 = vadd.f32 0.2548296, %v2614_v59  ;;  %v5942_v14 = vpop.eup %4452  ;;  %v2612_v42 = vmul.f32 %v5896_v3, %v2580_v12  ;;  %v2583_v10 = vadd.f32 -0.28449672, %v2551_v0 }
 0x440   : > { %v2961_v44 = vsel %vm2897_vm5, %v2929_v41, %v2865_v53  ;;  %v2426_v55 = vmul.f32 1.0614054, %v5942_v14  ;;  %v2299_v53 = vmul.f32 0.3275911, %v5940_v8  ;;  %vm2902_vm6 = vcmp.lt.f32.partialorder %v5814_v62, 0.0 }
 0x441   : > { %v2993_v17 = vadd.f32 1.0, %v2961_v44  ;;  %v2678_v43 = vmul.f32 %v5881_v36, %v2646_v27  ;;  %v2644_v5 = vadd.f32 0.2548296, %v2612_v42  ;;  %v2615_v29 = vmul.f32 %v5904_v58, %v2583_v10 }
 0x442   : > { %v2485_v36 = vmul.f32 %v5927_v23, %v2453_v37  ;;  %v2458_v41 = vadd.f32 -1.4531521, %v2426_v55  ;;  %v2746_v27 = vmul.f32 %v2714_v34, %v5887_v15  ;;  %v2331_v12 = vadd.f32 1.0, %v2299_v53 }
 0x443   : > { %v5952_v60 = vmul.f32 %v2993_v17, %v5865_v18  ;;  %v2838_v59 = vmul.f32 %v4447_v28, %v2678_v43  ;;  %v2676_v0 = vmul.f32 %v5896_v3, %v2644_v5  ;;  %v2647_v44 = vadd.f32 0.2548296, %v2615_v29 }
 0x444   : > { %v5960_v35 = vpop.eup %4454  ;;  %v2198_v18 = vmul.f32 0.5, %v5806_v2  ;;  %v2517_v28 = vadd.f32 1.4214138, %v2485_v36  ;;  %v2490_v17 = vmul.f32 %v5942_v14, %v2458_v41  ;;  %4458 = vrcp.f32 %v2331_v12 }
 0x445   : > { %v3048_v6 = vpack.c.bf16 %v5952_v60, %v5947_v31  ;;  %v2870_v21 = vsub.f32 1.0, %v2838_v59  ;;  %v2679_v42 = vmul.f32 %v5904_v58, %v2647_v44  ;;  %4460 = vpow2.f32 %v2794_v47 }
 0x446   : > { %v2424_v15 = vmul.f32 1.0614054, %v5960_v35  ;;  %v4457_v34 = vpop.eup %4456  ;;  %v2836_v10 = vmul.f32 %v4451_v57, %v2676_v0  ;;  %v2549_v37 = vmul.f32 %v5927_v23, %v2517_v28  ;;  %v2522_v3 = vadd.f32 1.4214138, %v2490_v17 }
 0x447   : > { %v2934_v43 = vsub.f32 0.0, %v2870_v21  ;;  %v5969_v55 = vadd.f32 %v5314_v45, %v5536_v48  ;;  %v2839_v2 = vmul.f32 %v4457_v34, %v2679_v42  ;;  %v2804_v53 = vmul.f32 1.442695, %v2746_v27 }
 0x448   : > { %v2456_v59 = vadd.f32 -1.4531521, %v2424_v15  ;;  %v2199_v5 = vmul.f32 0.5, %v5824_v54  ;;  %v2581_v58 = vadd.f32 -0.28449672, %v2549_v37  ;;  %v2554_v47 = vmul.f32 %v5942_v14, %v2522_v3 }
 0x449   : > { %v5976_v57 = vadd.f32 %v5556_v20, %v5314_v45  ;;  %v2966_v29 = vsel %vm2902_vm6, %v2934_v43, %v2870_v21  ;;  %v2871_v36 = vsub.f32 1.0, %v2839_v2  ;;  %v2715_v48 = vsub.f32 0.0, %v5940_v8 }
 0x44a   : > { %v2488_v41 = vmul.f32 %v5960_v35, %v2456_v59  ;;  %v2868_v12 = vsub.f32 1.0, %v2836_v10  ;;  %v2613_v62 = vmul.f32 %v5927_v23, %v2581_v58  ;;  %v2586_v27 = vadd.f32 -0.28449672, %v2554_v47 }
 0x44b   : > { %v5982_v0 = vmul.f32 0.70710677, %v5969_v55  ;;  %vm2903_vm7 = vcmp.lt.f32.partialorder %v5833_v26, 0.0  ;;  %v2935_v54 = vsub.f32 0.0, %v2871_v36  ;;  %4462 = vpow2.f32 %v2804_v53 }
 0x44c   : > { %v2712_v20 = vsub.f32 0.0, %v5907_v13  ;;  %v2998_v44 = vadd.f32 1.0, %v2966_v29  ;;  %v2645_v21 = vadd.f32 0.2548296, %v2613_v62  ;;  %v2618_v28 = vmul.f32 %v5942_v14, %v2586_v27 }
 0x44d   : > { %v5988_v17 = vand.u32 2147483647, %v5982_v0  ;;  %vm2900_vm8 = vcmp.lt.f32.partialorder %v5830_v7, 0.0  ;;  %v2967_v43 = vsel %vm2903_vm7, %v2935_v54, %v2871_v36  ;;  %v2520_v42 = vadd.f32 1.4214138, %v2488_v41 }
 0x44e   : > { %v5992_v15 = vmul.f32 0.70710677, %v5976_v57  ;;  %v5994_v34 = vpop.eup %4458  ;;  %v2932_v26 = vsub.f32 0.0, %v2868_v12  ;;  %v2999_v10 = vadd.f32 1.0, %v2967_v43  ;;  %v2677_v37 = vmul.f32 %v5927_v23, %v2645_v21 }
 0x44f   : > { %v2747_v3 = vmul.f32 %v2715_v48, %v5940_v8  ;;  %v4461_v2 = vpop.eup %4460  ;;  %v2650_v53 = vadd.f32 0.2548296, %v2618_v28  ;;  %v2427_v59 = vmul.f32 1.0614054, %v5994_v34  ;;  %v2297_v58 = vmul.f32 0.3275911, %v5988_v17 }
 0x450   : > { %v6000_v47 = vmul.f32 %v2998_v44, %v2198_v18  ;;  %v6002_v29 = vmul.f32 %v2999_v10, %v2199_v5  ;;  %v2837_v36 = vmul.f32 %v4461_v2, %v2677_v37  ;;  %v2744_v41 = vmul.f32 %v2712_v20, %v5907_v13 }
 0x451   : > { %v2552_v62 = vmul.f32 %v5960_v35, %v2520_v42  ;;  %v2459_v27 = vadd.f32 -1.4531521, %v2427_v59  ;;  %v2329_v54 = vadd.f32 1.0, %v2297_v58  ;;  %v6007_v23 = vand.u32 2147483647, %v5992_v15 }
 0x452   : > { %v2964_v8 = vsel %vm2900_vm8, %v2932_v26, %v2868_v12  ;;  %v3051_v48 = vpack.c.bf16 %v6002_v29, %v6000_v47  ;;  %v2869_v18 = vsub.f32 1.0, %v2837_v36  ;;  %v2806_v44 = vmul.f32 1.442695, %v2747_v3 }
 0x453   : > { %v2682_v5 = vmul.f32 %v5942_v14, %v2650_v53  ;;  %v2491_v21 = vmul.f32 %v5994_v34, %v2459_v27  ;;  %4464 = vrcp.f32 %v2329_v54  ;;  %v2302_v13 = vmul.f32 0.3275911, %v6007_v23  ;;  %v6540_v54 = vld [vmem:[#allocation7_spill] sm:$0xff] }
 0x454   : > { %v2196_v20 = vmul.f32 0.5, %v5818_v52  ;;  %v2197_v28 = vmul.f32 0.5, %v5850_v19  ;;  %vm2901_vm9 = vcmp.lt.f32.partialorder %v5862_v25, 0.0  ;;  %v2933_v7 = vsub.f32 0.0, %v2869_v18 }
 0x455   : > { %v4463_v12 = vpop.eup %4462  ;;  %v2996_v43 = vadd.f32 1.0, %v2964_v8  ;;  %v2584_v42 = vadd.f32 -0.28449672, %v2552_v62  ;;  %v2523_v26 = vadd.f32 1.4214138, %v2491_v21  ;;  %v2334_v10 = vadd.f32 1.0, %v2302_v13 }
 0x456   : > { %v2965_v37 = vsel %vm2901_vm9, %v2933_v7, %v2869_v18  ;;  %v2800_v3 = vmul.f32 1.442695, %v2744_v41  ;;  %4466 = vpow2.f32 %v2806_v44  ;;  %v6021_v14 = vadd.f32 %v5314_v45, %v5581_v1  ;;  %v6538_v62 = vld [vmem:[#allocation6_spill] sm:$0xff]  ;;  %v6541_v18 = vld [vmem:[#allocation9_spill] sm:$0xff]  ;;  %v6542_v21 = vld [vmem:[#allocation12_spill] sm:$0xff] }
 0x457   : > { %v2997_v2 = vadd.f32 1.0, %v2965_v37  ;;  %v2842_v53 = vmul.f32 %v4463_v12, %v2682_v5  ;;  %v2555_v52 = vmul.f32 %v5994_v34, %v2523_v26  ;;  %4468 = vrcp.f32 %v2334_v10  ;;  %v6543_v13 = vld [vmem:[#allocation11_spill] sm:$0xff] }
 0x458   : > { %v2713_v19 = vsub.f32 0.0, %v5988_v17  ;;  %vm3084_vm10 = vcmask 523264   ;;  %v6025_v25 = vmul.f32 %v2996_v43, %v2196_v20  ;;  %v2616_v58 = vmul.f32 %v5960_v35, %v2584_v42 }
 0x459   : > { %v6027_v59 = vmul.f32 %v2997_v2, %v2197_v28  ;;  %v2587_v36 = vadd.f32 -0.28449672, %v2555_v52  ;;  %v6537_v41 = vpack.c.bf16 %v5548_v46, %v5543_v32  ;;  %4470 = vpow2.f32 %v2800_v3 }
 0x45a   : > { %v6035_v1 = vmul.f32 0.70710677, %v6021_v14  ;;  %v6539_v27 = vpack.c.bf16 %v5539_v50, %v6538_v62  ;;  %v6043_v8 = vadd.f32 %v6540_v54, %v5314_v45  ;;  %v6047_v44 = vadd.f32 %v5314_v45, %v6541_v18 }
 0x45b   : > { %4180 = vmatprep.mubr.msk.bf16.mxu1 %vm3084_vm10, %v6537_v41  ;;  %v3050_v32 = vpack.c.bf16 %v6027_v59, %v6025_v25  ;;  %v2874_v46 = vsub.f32 1.0, %v2842_v53  ;;  %v2619_v5 = vmul.f32 %v5994_v34, %v2587_v36  ;;  %v6544_v20 = vpack.c.bf16 %v6542_v21, %v6543_v13  ;;  %v6545_v21 = vld [vmem:[#allocation10_spill] sm:$0xff]  ;;  %v6546_v13 = vld [vmem:[#allocation8_spill] sm:$0xff] }
 0x45c   : > { %4181 = vmatmul.mubr.msk.bf16.vlgmr.msra.gmra.mrb[48].mxu1 %vm3084_vm10, %v6539_v27  ;;  %v2745_v50 = vmul.f32 %v2713_v19, %v5988_v17  ;;  %v2268_v28 = vand.u32 2147483647, %v6035_v1  ;;  %v6059_v7 = vmul.f32 0.70710677, %v6043_v8  ;;  %v2648_v12 = vadd.f32 0.2548296, %v2616_v58 }
 0x45d   : > { %4184 = vmatprep.mubr.msk.bf16.mxu1 %vm3084_vm10, %v6544_v20  ;;  %v6061_v45 = vpop.eup %4464  ;;  %v2651_v43 = vadd.f32 0.2548296, %v2619_v5  ;;  %v6064_v42 = vmul.f32 0.70710677, %v6047_v44  ;;  %v2938_v37 = vsub.f32 0.0, %v2874_v46  ;;  %v2718_v58 = vsub.f32 0.0, %v6007_v23 }
 0x45e   : > { %v2425_v26 = vmul.f32 1.0614054, %v6061_v45  ;;  %v2300_v10 = vmul.f32 0.3275911, %v2268_v28  ;;  %v6069_v17 = vand.u32 2147483647, %v6059_v7  ;;  %v2680_v62 = vmul.f32 %v5960_v35, %v2648_v12 }
 0x45f   : > { %v2683_v3 = vmul.f32 %v5994_v34, %v2651_v43  ;;  %v6072_v2 = vand.u32 2147483647, %v6064_v42  ;;  %v2802_v19 = vmul.f32 1.442695, %v2745_v50  ;;  %vm2906_vm11 = vcmp.lt.f32.partialorder %v5879_v49, 0.0 }
 0x460   : > { %v4467_v53 = vpop.eup %4466  ;;  %v2457_v52 = vadd.f32 -1.4531521, %v2425_v26  ;;  %v2332_v36 = vadd.f32 1.0, %v2300_v10  ;;  %v2303_v54 = vmul.f32 0.3275911, %v6069_v17  ;;  %v6547_v20 = vpack.c.bf16 %v6545_v21, %v6546_v13 }
 0x461   : > { %v6075_v41 = vpop.eup %4468  ;;  %v2843_v27 = vmul.f32 %v4467_v53, %v2683_v3  ;;  %v2301_v34 = vmul.f32 0.3275911, %v6072_v2  ;;  %v2970_v50 = vsel %vm2906_vm11, %v2938_v37, %v2874_v46  ;;  %v6548_v26 = vpack.c.bf16 %v5754_v51, %v5751_v39 }
 0x462   : > { %v2489_v18 = vmul.f32 %v6061_v45, %v2457_v52  ;;  %v2430_v5 = vmul.f32 1.0614054, %v6075_v41  ;;  %4472 = vrcp.f32 %v2332_v36  ;;  %v2335_v35 = vadd.f32 1.0, %v2303_v54 }
 0x463   : > { %v2875_v43 = vsub.f32 1.0, %v2843_v27  ;;  %v2333_v12 = vadd.f32 1.0, %v2301_v34  ;;  %v4471_v49 = vpop.eup %4470  ;;  %vm2907_vm12 = vcmp.lt.f32.partialorder %v5931_v61, 0.0  ;;  %4474 = vpow2.f32 %v2802_v19 }
 0x464   : > { %4185 = vmatmul.mubr.msk.bf16.gmra.mrb[52].mxu1 %vm3084_vm10, %v6547_v20  ;;  %v2521_v10 = vadd.f32 1.4214138, %v2489_v18  ;;  %v2462_v3 = vadd.f32 -1.4531521, %v2430_v5  ;;  %v2840_v53 = vmul.f32 %v4471_v49, %v2680_v62  ;;  %v2750_v36 = vmul.f32 %v2718_v58, %v6007_v23 }
 0x465   : > { %4188 = vmatprep.mubr.msk.bf16.mxu1 %vm3084_vm10, %v6548_v26  ;;  %v2939_v52 = vsub.f32 0.0, %v2875_v43  ;;  %4476 = vrcp.f32 %v2335_v35  ;;  %v3002_v46 = vadd.f32 1.0, %v2970_v50  ;;  %v2202_v39 = vmul.f32 0.5, %v5869_v16 }
 0x466   : > { %v2553_v37 = vmul.f32 %v6061_v45, %v2521_v10  ;;  %v2494_v27 = vmul.f32 %v6075_v41, %v2462_v3  ;;  %4478 = vrcp.f32 %v2333_v12  ;;  %v2716_v54 = vsub.f32 0.0, %v2268_v28 }
 0x467   : > { %v2971_v51 = vsel %vm2907_vm12, %v2939_v52, %v2875_v43  ;;  %v2203_v61 = vmul.f32 0.5, %v5919_v9  ;;  %v2872_v62 = vsub.f32 1.0, %v2840_v53  ;;  %v2812_v5 = vmul.f32 1.442695, %v2750_v36 }
 0x468   : > { %v3003_v34 = vadd.f32 1.0, %v2971_v51  ;;  %v2585_v19 = vadd.f32 -0.28449672, %v2553_v37  ;;  %v2526_v18 = vadd.f32 1.4214138, %v2494_v27  ;;  %v6097_v21 = vmul.f32 %v3002_v46, %v2202_v39 }
 0x469   : > { %v6549_v16 = vpack.c.bf16 %v5737_v33, %v5695_v24  ;;  %v2748_v20 = vmul.f32 %v2716_v54, %v2268_v28  ;;  %v2719_v9 = vsub.f32 0.0, %v6069_v17  ;;  %v6550_v50 = vpack.c.bf16 %v5810_v56, %v5808_v38 }
 0x46a   : > { %v6099_v23 = vmul.f32 %v3003_v34, %v2203_v61  ;;  %v2617_v58 = vmul.f32 %v6061_v45, %v2585_v19  ;;  %v2558_v13 = vmul.f32 %v6075_v41, %v2526_v18  ;;  %v2717_v49 = vsub.f32 0.0, %v6072_v2 }
 0x46b   : > { %4480 = vpow2.f32 %v2812_v5  ;;  %v2936_v28 = vsub.f32 0.0, %v2872_v62  ;;  %v2808_v53 = vmul.f32 1.442695, %v2748_v20  ;;  %v2751_v52 = vmul.f32 %v2719_v9, %v6069_v17 }
 0x46c   : > { %4189 = vmatmul.mubr.msk.bf16.gmra.mrb[56].mxu1 %vm3084_vm10, %v6549_v16  ;;  %v6112_v43 = vpop.eup %4472  ;;  %v3053_v35 = vpack.c.bf16 %v6099_v23, %v6097_v21  ;;  %v2649_v12 = vadd.f32 0.2548296, %v2617_v58  ;;  %v2590_v26 = vadd.f32 -0.28449672, %v2558_v13  ;;  %v2749_v39 = vmul.f32 %v2717_v49, %v6072_v2  ;;  %v6552_v16 = vld [vmem:[#allocation4_spill] sm:$0xff] }
 0x46d   : > { %4192 = vmatprep.mubr.msk.bf16.mxu1 %vm3084_vm10, %v6550_v50  ;;  %v2428_v24 = vmul.f32 1.0614054, %v6112_v43  ;;  %v4475_v33 = vpop.eup %4474  ;;  %vm2904_vm13 = vcmp.lt.f32.partialorder %v5891_v63, 0.0  ;;  %v6551_v19 = vpack.c.bf16 %v5797_v40, %v5795_v4  ;;  %4482 = vpow2.f32 %v2808_v53 }
 0x46e   : > { %v2681_v10 = vmul.f32 %v6061_v45, %v2649_v12  ;;  %v2622_v38 = vmul.f32 %v6075_v41, %v2590_v26  ;;  %v2968_v61 = vsel %vm2904_vm13, %v2936_v28, %v2872_v62  ;;  %v2814_v18 = vmul.f32 1.442695, %v2751_v52 }
 0x46f   : > { %v4477_v56 = vpop.eup %4476  ;;  %v2460_v3 = vadd.f32 -1.4531521, %v2428_v24  ;;  %v2810_v58 = vmul.f32 1.442695, %v2749_v39  ;;  %v3000_v13 = vadd.f32 1.0, %v2968_v61  ;;  %vm2905_vm14 = vcmp.lt.f32.partialorder %v5982_v0, 0.0 }
 0x470   : > { %v4479_v36 = vpop.eup %4478  ;;  %v2841_v46 = vmul.f32 %v4475_v33, %v2681_v10  ;;  %v2654_v37 = vadd.f32 0.2548296, %v2622_v38  ;;  %v2431_v27 = vmul.f32 1.0614054, %v4477_v56  ;;  %v2200_v20 = vmul.f32 0.5, %v6552_v16 }
 0x471   : > { %v2492_v51 = vmul.f32 %v6112_v43, %v2460_v3  ;;  %v2429_v54 = vmul.f32 1.0614054, %v4479_v36  ;;  %v2201_v9 = vmul.f32 0.5, %v5969_v55  ;;  %4484 = vpow2.f32 %v2814_v18 }
 0x472   : > { %v2873_v45 = vsub.f32 1.0, %v2841_v46  ;;  %v2463_v34 = vadd.f32 -1.4531521, %v2431_v27  ;;  %v2686_v2 = vmul.f32 %v6075_v41, %v2654_v37  ;;  %4486 = vpow2.f32 %v2810_v58 }
 0x473   : > { %v2524_v17 = vadd.f32 1.4214138, %v2492_v51  ;;  %v2461_v5 = vadd.f32 -1.4531521, %v2429_v54  ;;  %v3032_v24 = vmul.f32 %v3000_v13, %v2200_v20  ;;  %vm2910_vm15 = vcmp.lt.f32.partialorder %v5992_v15, 0.0 }
 0x474   : > { %4193 = vmatmul.mubr.msk.bf16.gmra.mrb[60].mxu1 %vm3084_vm10, %v6551_v19  ;;  %v2937_v63 = vsub.f32 0.0, %v2873_v45  ;;  %v2495_v62 = vmul.f32 %v4477_v56, %v2463_v34  ;;  %vm2908_vm1 = vcmp.lt.f32.partialorder %v6035_v1, 0.0  ;;  %vm2911_vm2 = vcmp.lt.f32.partialorder %v6059_v7, 0.0 }
 0x475   : > { %4196 = vmatprep.mubr.msk.bf16.mxu1 %vm3084_vm10, %v3048_v6  ;;  %v2556_v4 = vmul.f32 %v6112_v43, %v2524_v17  ;;  %v2493_v40 = vmul.f32 %v4479_v36, %v2461_v5  ;;  %v4481_v31 = vpop.eup %4480  ;;  %vm2909_vm3 = vcmp.lt.f32.partialorder %v6064_v42, 0.0  ;;  %v2206_v15 = vmul.f32 0.5, %v5976_v57 }
 0x476   : > { %v2969_v50 = vsel %vm2905_vm14, %v2937_v63, %v2873_v45  ;;  %v2527_v12 = vadd.f32 1.4214138, %v2495_v62  ;;  %v2846_v41 = vmul.f32 %v4481_v31, %v2686_v2  ;;  %v2204_v1 = vmul.f32 0.5, %v6021_v14  ;;  %v1663_v14 = vld [vmem:[%s6513_s3 + $0x48] sm:$0x1] }
 0x477   : > { %v3001_v60 = vadd.f32 1.0, %v2969_v50  ;;  %v2588_v6 = vadd.f32 -0.28449672, %v2556_v4  ;;  %v2525_v26 = vadd.f32 1.4214138, %v2493_v40  ;;  %v4483_v46 = vpop.eup %4482  ;;  %v2205_v62 = vmul.f32 0.5, %v6047_v44 }
 0x478   : > { %v2559_v49 = vmul.f32 %v4477_v56, %v2527_v12  ;;  %v2878_v53 = vsub.f32 1.0, %v2846_v41  ;;  %v6553_v44 = vld [vmem:[#allocation3_spill] sm:$0xff] }
 0x479   : > { %v3033_v33 = vmul.f32 %v3001_v60, %v2201_v9  ;;  %v2620_v0 = vmul.f32 %v6112_v43, %v2588_v6  ;;  %v2557_v28 = vmul.f32 %v4479_v36, %v2525_v26  ;;  %v6554_v16 = vsub.s32 0, %v6553_v44 }
 0x47a   : > { %v2591_v10 = vadd.f32 -0.28449672, %v2559_v49  ;;  %v2942_v30 = vsub.f32 0.0, %v2878_v53 }
 0x47b   : > { %v3052_v55 = vpack.c.bf16 %v3033_v33, %v3032_v24  ;;  %v2652_v38 = vadd.f32 0.2548296, %v2620_v0  ;;  %v2589_v3 = vadd.f32 -0.28449672, %v2557_v28 }
 0x47c   : > { %4197 = vmatmul.mubr.msk.bf16.gmra.mrb[64].mxu1 %vm3084_vm10, %v3049_v22  ;;  %v2623_v52 = vmul.f32 %v4477_v56, %v2591_v10  ;;  %v4485_v22 = vpop.eup %4484 }
 0x47d   : > { %4200 = vmatprep.mubr.msk.bf16.mxu1 %vm3084_vm10, %v3050_v32  ;;  %v2684_v37 = vmul.f32 %v6112_v43, %v2652_v38  ;;  %v2621_v27 = vmul.f32 %v4479_v36, %v2589_v3  ;;  %v4487_v34 = vpop.eup %4486  ;;  %v2974_v32 = vsel %vm2910_vm15, %v2942_v30, %v2878_v53 }
 0x47e   : > { %v2655_v39 = vadd.f32 0.2548296, %v2623_v52  ;;  %v3006_v18 = vadd.f32 1.0, %v2974_v32 }
 0x47f   : > { %v2844_v51 = vmul.f32 %v4483_v46, %v2684_v37  ;;  %v2653_v54 = vadd.f32 0.2548296, %v2621_v27 }
 0x480   : > { %v2687_v11 = vmul.f32 %v4477_v56, %v2655_v39  ;;  %v3038_v7 = vmul.f32 %v3006_v18, %v2206_v15 }
 0x481   : > { %v2876_v61 = vsub.f32 1.0, %v2844_v51  ;;  %v2685_v45 = vmul.f32 %v4479_v36, %v2653_v54 }
 0x482   : > { %v2847_v19 = vmul.f32 %v4485_v22, %v2687_v11 }
 0x483   : > { %v2940_v25 = vsub.f32 0.0, %v2876_v61  ;;  %v2845_v59 = vmul.f32 %v4487_v34, %v2685_v45 }
 0x484   : > { %4201 = vmatmul.mubr.msk.bf16.gmra.mrb[68].mxu1 %vm3084_vm10, %v3051_v48  ;;  %v2879_v43 = vsub.f32 1.0, %v2847_v19  ;;  %v2207_v48 = vmul.f32 0.5, %v6043_v8  ;;  %v1664_v8 = vunpack.c.l.bf16 %v1663_v14 }
 0x485   : > { %4204 = vmatprep.mubr.msk.bf16.mxu1 %vm3084_vm10, %v3052_v55  ;;  %v2972_v56 = vsel %vm2908_vm1, %v2940_v25, %v2876_v61  ;;  %v2877_v17 = vsub.f32 1.0, %v2845_v59 }
 0x486   : > { %v2943_v36 = vsub.f32 0.0, %v2879_v43  ;;  %v3004_v47 = vadd.f32 1.0, %v2972_v56  ;;  %v6171_v21 = vrot.slane %v1664_v8, %v6554_v16 }
 0x487   : > { %v2941_v5 = vsub.f32 0.0, %v2877_v17 }
 0x488   : > { %v2975_v29 = vsel %vm2911_vm2, %v2943_v36, %v2879_v43  ;;  %v3036_v4 = vmul.f32 %v3004_v47, %v2204_v1 }
 0x489   : > { %v3007_v63 = vadd.f32 1.0, %v2975_v29  ;;  %v2973_v2 = vsel %vm2909_vm3, %v2941_v5, %v2877_v17 }
 0x48a   : > { %v3005_v58 = vadd.f32 1.0, %v2973_v2 }
 0x48b   : > { %v3039_v13 = vmul.f32 %v3007_v63, %v2207_v48 }
 0x48c   : > { %4205 = vmatmul.mubr.msk.bf16.gmra.mrb[72].mxu1 %vm3084_vm10, %v3053_v35  ;;  %v3037_v42 = vmul.f32 %v3005_v58, %v2205_v62 }
 0x48d   : > { %v3055_v40 = vpack.c.bf16 %v3039_v13, %v3038_v7 }
 0x48e   : > { %v3054_v57 = vpack.c.bf16 %v3037_v42, %v3036_v4 }
 0x490   : > { %4208 = vmatprep.mubr.msk.bf16.mxu1 %vm3084_vm10, %v3054_v57 }
 0x494   : > { %4209 = vmatmul.mubr.msk.bf16.gmra.mrb[76].mxu1 %vm3084_vm10, %v3055_v40 }
 0x52f   : > { %v4182_v23 = vpop.f32.mrb[48].mxu1 }
 0x530   : > { %v6174_v35 = vadd.f32 %v4182_v23, %v6171_v21  ;;  %v3167_v20 = vpop.f32.mrb[49].mxu1 }
 0x531   : > { %v6177_v9 = vadd.f32 %v3167_v20, %v6171_v21  ;;  %v4183_v50 = vpop.f32.mrb[50].mxu1  ;;  %v3747_v20 = vld [vmem:[%s4931_s6 + $0x410] sm:$0xff] }
 0x532   : > { %3362 = vrot.lane.b32.xlu1 %v6174_v35, %s4544_s21  ;;  %v3170_v12 = vpop.f32.mrb[51].mxu1  ;;  %v6184_v31 = vadd.f32 %v4183_v50, %v6171_v21  ;;  %v3745_v50 = vld [vmem:[%s4931_s6 + $0x400] sm:$0xff] }
 0x533   : > { %3358 = vrot.lane.b32.xlu0 %v6177_v9, %s4544_s21  ;;  %v6187_v60 = vadd.f32 %v3170_v12, %v6171_v21 }
 0x536   : > { %3364 = vrot.lane.b32.xlu1 %v6184_v31, %s4544_s21 }
 0x537   : > { %3360 = vrot.lane.b32.xlu0 %v6187_v60, %s4544_s21  ;;  %v4186_v6 = vpop.f32.mrb[52].mxu1 }
 0x538   : > { %v6194_v26 = vadd.f32 %v4186_v6, %v6171_v21  ;;  %v3183_v41 = vpop.f32.mrb[53].mxu1  ;;  %v4488_v6 = vld [vmem:[%s4931_s6 + $0x210] sm:$0xff] }
 0x539   : > { %v4187_v49 = vpop.f32.mrb[54].mxu1  ;;  %v6204_v0 = vadd.f32 %v3183_v41, %v6171_v21  ;;  %v3296_v41 = vmul.f32 %v4488_v6, %v6174_v35  ;;  %v3746_v35 = vld [vmem:[%s4931_s6 + $0x408] sm:$0xff]  ;;  %v4494_v6 = vld [vmem:[%s4931_s6 + $0x220] sm:$0xff] }
 0x53a   : > { %v6197_v24 = vadd.f32 %v4187_v49, %v6171_v21  ;;  %v3186_v33 = vpop.f32.mrb[55].mxu1 }
 0x53b   : > { %3370 = vrot.lane.b32.xlu0 %v6194_v26, %s4544_s21  ;;  %v6207_v28 = vadd.f32 %v3186_v33, %v6171_v21  ;;  %v4489_v33 = vld [vmem:[%s4931_s6 + $0x200] sm:$0xff] }
 0x53c   : > { %3372 = vrot.lane.b32.xlu1 %v6197_v24, %s4544_s21 }
 0x53f   : > { %3366 = vrot.lane.b32.xlu0 %v6204_v0, %s4544_s21  ;;  %v4190_v10 = vpop.f32.mrb[56].mxu1 }
 0x540   : > { %v6212_v55 = vadd.f32 %v4190_v10, %v6171_v21  ;;  %3368 = vrot.lane.b32.xlu1 %v6207_v28, %s4544_s21  ;;  %v3199_v38 = vpop.f32.mrb[57].mxu1  ;;  %v3294_v10 = vmul.f32 %v4489_v33, %v6177_v9  ;;  %v4491_v9 = vld [vmem:[%s4931_s6 + $0x208] sm:$0xff] }
 0x541   : > { %v4191_v3 = vpop.f32.mrb[58].mxu1  ;;  %v6224_v46 = vadd.f32 %v3199_v38, %v6171_v21 }
 0x542   : > { %v6217_v53 = vadd.f32 %v4191_v3, %v6171_v21  ;;  %v3202_v52 = vpop.f32.mrb[59].mxu1  ;;  %v3748_v3 = vld [vmem:[%s4931_s6 + $0x418] sm:$0xff] }
 0x543   : > { %3378 = vrot.lane.b32.xlu0 %v6212_v55, %s4544_s21  ;;  %v6227_v37 = vadd.f32 %v3202_v52, %v6171_v21 }
 0x544   : > { %3380 = vrot.lane.b32.xlu1 %v6217_v53, %s4544_s21 }
 0x547   : > { %3374 = vrot.lane.b32.xlu0 %v6224_v46, %s4544_s21  ;;  %v4194_v27 = vpop.f32.mrb[60].mxu1 }
 0x548   : > { %v6232_v39 = vadd.f32 %v4194_v27, %v6171_v21  ;;  %3376 = vrot.lane.b32.xlu1 %v6227_v37, %s4544_s21  ;;  %v3215_v51 = vpop.f32.mrb[61].mxu1 }
 0x549   : > { %v4195_v54 = vpop.f32.mrb[62].mxu1  ;;  %v6244_v22 = vadd.f32 %v3215_v51, %v6171_v21 }
 0x54a   : > { %v6237_v30 = vadd.f32 %v4195_v54, %v6171_v21  ;;  %v3218_v11 = vpop.f32.mrb[63].mxu1  ;;  %v4490_v54 = vld [vmem:[%s4931_s6 + $0x218] sm:$0xff] }
 0x54b   : > { %3386 = vrot.lane.b32.xlu0 %v6232_v39, %s4544_s21  ;;  %v6247_v61 = vadd.f32 %v3218_v11, %v6171_v21  ;;  %v3297_v11 = vmul.f32 %v4490_v54, %v6184_v31  ;;  %v4497_v54 = vld [vmem:[%s4931_s6 + $0x258] sm:$0xff] }
 0x54c   : > { %3388 = vrot.lane.b32.xlu1 %v6237_v30, %s4544_s21 }
 0x54f   : > { %3382 = vrot.lane.b32.xlu0 %v6244_v22, %s4544_s21  ;;  %v4198_v45 = vpop.f32.mrb[64].mxu1 }
 0x550   : > { %v6252_v34 = vadd.f32 %v4198_v45, %v6171_v21  ;;  %3384 = vrot.lane.b32.xlu1 %v6247_v61, %s4544_s21  ;;  %v3231_v19 = vpop.f32.mrb[65].mxu1 }
 0x551   : > { %v4199_v25 = vpop.f32.mrb[66].mxu1  ;;  %v6264_v43 = vadd.f32 %v3231_v19, %v6171_v21 }
 0x552   : > { %v6257_v59 = vadd.f32 %v4199_v25, %v6171_v21  ;;  %v3234_v32 = vpop.f32.mrb[67].mxu1  ;;  %v3295_v25 = vmul.f32 %v4491_v9, %v6187_v60 }
 0x553   : > { %3394 = vrot.lane.b32.xlu0 %v6252_v34, %s4544_s21  ;;  %v6267_v56 = vadd.f32 %v3234_v32, %v6171_v21 }
 0x554   : > { %3396 = vrot.lane.b32.xlu1 %v6257_v59, %s4544_s21 }
 0x557   : > { %3390 = vrot.lane.b32.xlu0 %v6264_v43, %s4544_s21  ;;  %v4202_v17 = vpop.f32.mrb[68].mxu1 }
 0x558   : > { %v6272_v36 = vadd.f32 %v4202_v17, %v6171_v21  ;;  %3392 = vrot.lane.b32.xlu1 %v6267_v56, %s4544_s21  ;;  %v3247_v18 = vpop.f32.mrb[69].mxu1 }
 0x559   : > { %v4203_v5 = vpop.f32.mrb[70].mxu1  ;;  %v6284_v15 = vadd.f32 %v3247_v18, %v6171_v21  ;;  %v3751_v18 = vld [vmem:[%s4931_s6 + $0x430] sm:$0xff] }
 0x55a   : > { %v6277_v47 = vadd.f32 %v4203_v5, %v6171_v21  ;;  %v3250_v29 = vpop.f32.mrb[71].mxu1 }
 0x55b   : > { %3402 = vrot.lane.b32.xlu0 %v6272_v36, %s4544_s21  ;;  %v6287_v48 = vadd.f32 %v3250_v29, %v6171_v21  ;;  %v3752_v29 = vld [vmem:[%s4931_s6 + $0x438] sm:$0xff] }
 0x55c   : > { %3404 = vrot.lane.b32.xlu1 %v6277_v47, %s4544_s21 }
 0x55f   : > { %3398 = vrot.lane.b32.xlu0 %v6284_v15, %s4544_s21  ;;  %v4206_v63 = vpop.f32.mrb[72].mxu1 }
 0x560   : > { %v6292_v2 = vadd.f32 %v4206_v63, %v6171_v21  ;;  %3400 = vrot.lane.b32.xlu1 %v6287_v48, %s4544_s21  ;;  %v3263_v1 = vpop.f32.mrb[73].mxu1  ;;  %v4492_v63 = vld [vmem:[%s4931_s6 + $0x230] sm:$0xff] }
 0x561   : > { %v4207_v62 = vpop.f32.mrb[74].mxu1  ;;  %v6304_v13 = vadd.f32 %v3263_v1, %v6171_v21  ;;  %v3300_v1 = vmul.f32 %v4492_v63, %v6194_v26  ;;  %v3298_v26 = vmul.f32 %v4494_v6, %v6204_v0 }
 0x562   : > { %v6297_v58 = vadd.f32 %v4207_v62, %v6171_v21  ;;  %v3266_v7 = vpop.f32.mrb[75].mxu1 }
 0x563   : > { %3410 = vrot.lane.b32.xlu0 %v6292_v2, %s4544_s21  ;;  %v6307_v4 = vadd.f32 %v3266_v7, %v6171_v21  ;;  %v4493_v7 = vld [vmem:[%s4931_s6 + $0x238] sm:$0xff] }
 0x564   : > { %3412 = vrot.lane.b32.xlu1 %v6297_v58, %s4544_s21 }
 0x567   : > { %3406 = vrot.lane.b32.xlu0 %v6304_v13, %s4544_s21  ;;  %v4210_v42 = vpop.f32.mrb[76].mxu1 }
 0x568   : > { %3408 = vrot.lane.b32.xlu1 %v6307_v4, %s4544_s21  ;;  %v3279_v40 = vpop.f32.mrb[77].mxu1  ;;  %v6325_v23 = vadd.f32 %v4210_v42, %v6171_v21  ;;  %v3301_v42 = vmul.f32 %v4493_v7, %v6197_v24 }
 0x569   : > { %v6314_v57 = vadd.f32 %v3279_v40, %v6171_v21  ;;  %v4211_v14 = vpop.f32.mrb[78].mxu1 }
 0x56a   : > { %v6317_v8 = vadd.f32 %v4211_v14, %v6171_v21  ;;  %v3282_v44 = vpop.f32.mrb[79].mxu1  ;;  %v3749_v14 = vld [vmem:[%s4931_s6 + $0x420] sm:$0xff] }
 0x56b   : > { %v6320_v16 = vadd.f32 %v3282_v44, %v6171_v21  ;;  %3414 = vrot.lane.b32.xlu0 %v6314_v57, %s4544_s21 }
 0x56d   : > { %3416 = vrot.lane.b32.xlu1 %v6320_v16, %s4544_s21 }
 0x56f   : > { %3418 = vrot.lane.b32.xlu0 %v6325_v23, %s4544_s21 }
 0x571   : > { %3420 = vrot.lane.b32.xlu1 %v6317_v8, %s4544_s21 }
 0x5a4   : > { %v3363_v12 = vpop.permute.xlu1 %3362 }
 0x5a5   : > { %v3456_v49 = vmul.f32 %v3747_v20, %v3363_v12  ;;  %v3359_v21 = vpop.permute.xlu0 %3358  ;;  %v3750_v20 = vld [vmem:[%s4931_s6 + $0x428] sm:$0xff] }
 0x5a6   : > { %v3454_v38 = vmul.f32 %v3745_v50, %v3359_v21  ;;  %v4495_v21 = vld [vmem:[%s4931_s6 + $0x228] sm:$0xff] }
 0x5a7   : > { %v3488_v52 = vadd.f32 %v3456_v49, %v3296_v41  ;;  %v3299_v24 = vmul.f32 %v4495_v21, %v6207_v28 }
 0x5a8   : > { %v3486_v27 = vadd.f32 %v3454_v38, %v3294_v10  ;;  %v3365_v51 = vpop.permute.xlu1 %3364  ;;  %v3755_v10 = vld [vmem:[%s4931_s6 + $0x450] sm:$0xff] }
 0x5a9   : > { %3520 = vst.msk [vmem:[%s6342_s18 + $0x10] sm:$0xff] %vm1709_vm0, %v3488_v52  ;;  %v3457_v45 = vmul.f32 %v3748_v3, %v3365_v51  ;;  %v3361_v19 = vpop.permute.xlu0 %3360  ;;  %v3756_v3 = vld [vmem:[%s4931_s6 + $0x458] sm:$0xff] }
 0x5aa   : > { %3518 = vst.msk [vmem:[%s6342_s18] sm:$0xff] %vm1709_vm0, %v3486_v27  ;;  %v3455_v32 = vmul.f32 %v3746_v35, %v3361_v19  ;;  %v4496_v35 = vld [vmem:[%s4931_s6 + $0x250] sm:$0xff]  ;;  %v3753_v19 = vld [vmem:[%s4931_s6 + $0x440] sm:$0xff] }
 0x5ab   : > { %v3489_v17 = vadd.f32 %v3457_v45, %v3297_v11  ;;  %v3304_v27 = vmul.f32 %v4496_v35, %v6212_v55  ;;  %v3305_v11 = vmul.f32 %v4497_v54, %v6217_v53  ;;  %v4505_v54 = vld [vmem:[%s4931_s6 + $0x298] sm:$0xff] }
 0x5ac   : > { %v3487_v5 = vadd.f32 %v3455_v32, %v3295_v25  ;;  %v3754_v25 = vld [vmem:[%s4931_s6 + $0x448] sm:$0xff] }
 0x5ad   : > { %3521 = vst.msk [vmem:[%s6342_s18 + $0x18] sm:$0xff] %vm1709_vm0, %v3489_v17  ;;  %v3371_v31 = vpop.permute.xlu0 %3370  ;;  %v4498_v17 = vld [vmem:[%s4931_s6 + $0x240] sm:$0xff] }
 0x5ae   : > { %3519 = vst.msk [vmem:[%s6342_s18 + $0x8] sm:$0xff] %vm1709_vm0, %v3487_v5  ;;  %v3460_v60 = vmul.f32 %v3751_v18, %v3371_v31  ;;  %v3373_v62 = vpop.permute.xlu1 %3372  ;;  %v3302_v18 = vmul.f32 %v4498_v17, %v6224_v46 }
 0x5af   : > { %v3461_v40 = vmul.f32 %v3752_v29, %v3373_v62  ;;  %v4499_v29 = vld [vmem:[%s4931_s6 + $0x248] sm:$0xff]  ;;  %v3760_v62 = vld [vmem:[%s4931_s6 + $0x478] sm:$0xff] }
 0x5b0   : > { %v3492_v44 = vadd.f32 %v3460_v60, %v3300_v1  ;;  %v3303_v31 = vmul.f32 %v4499_v29, %v6227_v37  ;;  %v3759_v1 = vld [vmem:[%s4931_s6 + $0x470] sm:$0xff] }
 0x5b1   : > { %v3493_v50 = vadd.f32 %v3461_v40, %v3301_v42  ;;  %v3367_v12 = vpop.permute.xlu0 %3366  ;;  %v4500_v42 = vld [vmem:[%s4931_s6 + $0x270] sm:$0xff] }
 0x5b2   : > { %3524 = vst.msk [vmem:[%s6342_s18 + $0x30] sm:$0xff] %vm1709_vm0, %v3492_v44  ;;  %v3458_v41 = vmul.f32 %v3749_v14, %v3367_v12  ;;  %v3369_v49 = vpop.permute.xlu1 %3368  ;;  %v3308_v40 = vmul.f32 %v4500_v42, %v6232_v39  ;;  %v4501_v44 = vld [vmem:[%s4931_s6 + $0x278] sm:$0xff]  ;;  %v3757_v12 = vld [vmem:[%s4931_s6 + $0x460] sm:$0xff] }
 0x5b3   : > { %3525 = vst.msk [vmem:[%s6342_s18 + $0x38] sm:$0xff] %vm1709_vm0, %v3493_v50  ;;  %v3459_v33 = vmul.f32 %v3750_v20, %v3369_v49  ;;  %v3309_v20 = vmul.f32 %v4501_v44, %v6237_v30  ;;  %v4502_v49 = vld [vmem:[%s4931_s6 + $0x260] sm:$0xff]  ;;  %v4509_v42 = vld [vmem:[%s4931_s6 + $0x2b8] sm:$0xff] }
 0x5b4   : > { %v3490_v38 = vadd.f32 %v3458_v41, %v3298_v26  ;;  %v3758_v26 = vld [vmem:[%s4931_s6 + $0x468] sm:$0xff]  ;;  %v3306_v21 = vmul.f32 %v4502_v49, %v6244_v22 }
 0x5b5   : > { %v3491_v52 = vadd.f32 %v3459_v33, %v3299_v24  ;;  %v3379_v0 = vpop.permute.xlu0 %3378  ;;  %v4503_v33 = vld [vmem:[%s4931_s6 + $0x268] sm:$0xff] }
 0x5b6   : > { %3522 = vst.msk [vmem:[%s6342_s18 + $0x20] sm:$0xff] %vm1709_vm0, %v3490_v38  ;;  %v3464_v51 = vmul.f32 %v3755_v10, %v3379_v0  ;;  %v3381_v28 = vpop.permute.xlu1 %3380  ;;  %v3307_v10 = vmul.f32 %v4503_v33, %v6247_v61  ;;  %v3764_v0 = vld [vmem:[%s4931_s6 + $0x498] sm:$0xff] }
 0x5b7   : > { %3523 = vst.msk [vmem:[%s6342_s18 + $0x28] sm:$0xff] %vm1709_vm0, %v3491_v52  ;;  %v3465_v45 = vmul.f32 %v3756_v3, %v3381_v28  ;;  %v3763_v3 = vld [vmem:[%s4931_s6 + $0x490] sm:$0xff] }
 0x5b8   : > { %v3496_v9 = vadd.f32 %v3464_v51, %v3304_v27  ;;  %v4504_v27 = vld [vmem:[%s4931_s6 + $0x290] sm:$0xff] }
 0x5b9   : > { %v3497_v32 = vadd.f32 %v3465_v45, %v3305_v11  ;;  %v3375_v55 = vpop.permute.xlu0 %3374  ;;  %v3312_v51 = vmul.f32 %v4504_v27, %v6252_v34  ;;  %v3313_v11 = vmul.f32 %v4505_v54, %v6257_v59 }
 0x5ba   : > { %3528 = vst.msk [vmem:[%s6342_s18 + $0x50] sm:$0xff] %vm1709_vm0, %v3496_v9  ;;  %v3462_v5 = vmul.f32 %v3753_v19, %v3375_v55  ;;  %v3377_v53 = vpop.permute.xlu1 %3376  ;;  %v3761_v19 = vld [vmem:[%s4931_s6 + $0x480] sm:$0xff] }
 0x5bb   : > { %3529 = vst.msk [vmem:[%s6342_s18 + $0x58] sm:$0xff] %vm1709_vm0, %v3497_v32  ;;  %v3463_v63 = vmul.f32 %v3754_v25, %v3377_v53  ;;  %v3762_v25 = vld [vmem:[%s4931_s6 + $0x488] sm:$0xff]  ;;  %v4506_v55 = vld [vmem:[%s4931_s6 + $0x280] sm:$0xff] }
 0x5bc   : > { %v3494_v60 = vadd.f32 %v3462_v5, %v3302_v18  ;;  %v3310_v17 = vmul.f32 %v4506_v55, %v6264_v43  ;;  %v4507_v5 = vld [vmem:[%s4931_s6 + $0x288] sm:$0xff] }
 0x5bd   : > { %v3495_v7 = vadd.f32 %v3463_v63, %v3303_v31  ;;  %v3387_v46 = vpop.permute.xlu0 %3386  ;;  %v3311_v53 = vmul.f32 %v4507_v5, %v6267_v56  ;;  %v3767_v31 = vld [vmem:[%s4931_s6 + $0x4b0] sm:$0xff] }
 0x5be   : > { %3526 = vst.msk [vmem:[%s6342_s18 + $0x40] sm:$0xff] %vm1709_vm0, %v3494_v60  ;;  %v3468_v14 = vmul.f32 %v3759_v1, %v3387_v46  ;;  %v3389_v37 = vpop.permute.xlu1 %3388  ;;  %v3768_v1 = vld [vmem:[%s4931_s6 + $0x4b8] sm:$0xff]  ;;  %v3775_v5 = vld [vmem:[%s4931_s6 + $0x4f0] sm:$0xff] }
 0x5bf   : > { %3527 = vst.msk [vmem:[%s6342_s18 + $0x48] sm:$0xff] %vm1709_vm0, %v3495_v7  ;;  %v3469_v50 = vmul.f32 %v3760_v62, %v3389_v37  ;;  %v4508_v62 = vld [vmem:[%s4931_s6 + $0x2b0] sm:$0xff]  ;;  %v3765_v37 = vld [vmem:[%s4931_s6 + $0x4a0] sm:$0xff] }
 0x5c0   : > { %v3500_v6 = vadd.f32 %v3468_v14, %v3308_v40  ;;  %v3316_v7 = vmul.f32 %v4508_v62, %v6272_v36  ;;  %v3317_v40 = vmul.f32 %v4509_v42, %v6277_v47 }
 0x5c1   : > { %v3501_v41 = vadd.f32 %v3469_v50, %v3309_v20  ;;  %v3383_v39 = vpop.permute.xlu0 %3382  ;;  %v3766_v20 = vld [vmem:[%s4931_s6 + $0x4a8] sm:$0xff] }
 0x5c2   : > { %3532 = vst.msk [vmem:[%s6342_s18 + $0x70] sm:$0xff] %vm1709_vm0, %v3500_v6  ;;  %v3466_v24 = vmul.f32 %v3757_v12, %v3383_v39  ;;  %v3385_v30 = vpop.permute.xlu1 %3384  ;;  %v4510_v12 = vld [vmem:[%s4931_s6 + $0x2a0] sm:$0xff] }
 0x5c3   : > { %3533 = vst.msk [vmem:[%s6342_s18 + $0x78] sm:$0xff] %vm1709_vm0, %v3501_v41  ;;  %v3467_v38 = vmul.f32 %v3758_v26, %v3385_v30  ;;  %v3314_v6 = vmul.f32 %v4510_v12, %v6284_v15  ;;  %v4511_v41 = vld [vmem:[%s4931_s6 + $0x2a8] sm:$0xff]  ;;  %v3772_v30 = vld [vmem:[%s4931_s6 + $0x4d8] sm:$0xff] }
 0x5c4   : > { %v3498_v52 = vadd.f32 %v3466_v24, %v3306_v21  ;;  %v3315_v39 = vmul.f32 %v4511_v41, %v6287_v48  ;;  %v3771_v21 = vld [vmem:[%s4931_s6 + $0x4d0] sm:$0xff] }
 0x5c5   : > { %v3499_v35 = vadd.f32 %v3467_v38, %v3307_v10  ;;  %v3395_v22 = vpop.permute.xlu0 %3394  ;;  %v4512_v10 = vld [vmem:[%s4931_s6 + $0x2d0] sm:$0xff] }
 0x5c6   : > { %3530 = vst.msk [vmem:[%s6342_s18 + $0x60] sm:$0xff] %vm1709_vm0, %v3498_v52  ;;  %v3472_v28 = vmul.f32 %v3763_v3, %v3395_v22  ;;  %v3397_v61 = vpop.permute.xlu1 %3396  ;;  %v3320_v38 = vmul.f32 %v4512_v10, %v6292_v2  ;;  %v4513_v52 = vld [vmem:[%s4931_s6 + $0x2d8] sm:$0xff]  ;;  %v3769_v22 = vld [vmem:[%s4931_s6 + $0x4c0] sm:$0xff] }
 0x5c7   : > { %3531 = vst.msk [vmem:[%s6342_s18 + $0x68] sm:$0xff] %vm1709_vm0, %v3499_v35  ;;  %v3473_v45 = vmul.f32 %v3764_v0, %v3397_v61  ;;  %v3321_v0 = vmul.f32 %v4513_v52, %v6297_v58  ;;  %v4514_v61 = vld [vmem:[%s4931_s6 + $0x2c0] sm:$0xff] }
 0x5c8   : > { %v3504_v9 = vadd.f32 %v3472_v28, %v3312_v51  ;;  %v3770_v51 = vld [vmem:[%s4931_s6 + $0x4c8] sm:$0xff]  ;;  %v3318_v54 = vmul.f32 %v4514_v61, %v6304_v13 }
 0x5c9   : > { %v3505_v32 = vadd.f32 %v3473_v45, %v3313_v11  ;;  %v3391_v34 = vpop.permute.xlu0 %3390  ;;  %v4515_v45 = vld [vmem:[%s4931_s6 + $0x2c8] sm:$0xff] }
 0x5ca   : > { %3536 = vst.msk [vmem:[%s6342_s18 + $0x90] sm:$0xff] %vm1709_vm0, %v3504_v9  ;;  %v3470_v18 = vmul.f32 %v3761_v19, %v3391_v34  ;;  %v3393_v59 = vpop.permute.xlu1 %3392  ;;  %v3319_v19 = vmul.f32 %v4515_v45, %v6307_v4  ;;  %v3774_v13 = vld [vmem:[%s4931_s6 + $0x4e8] sm:$0xff] }
 0x5cb   : > { %3537 = vst.msk [vmem:[%s6342_s18 + $0x98] sm:$0xff] %vm1709_vm0, %v3505_v32  ;;  %v3471_v29 = vmul.f32 %v3762_v25, %v3393_v59  ;;  %v3773_v25 = vld [vmem:[%s4931_s6 + $0x4e0] sm:$0xff] }
 0x5cc   : > { %v3502_v63 = vadd.f32 %v3470_v18, %v3310_v17  ;;  %v4516_v17 = vld [vmem:[%s4931_s6 + $0x2e0] sm:$0xff] }
 0x5cd   : > { %v3503_v60 = vadd.f32 %v3471_v29, %v3311_v53  ;;  %v3403_v43 = vpop.permute.xlu0 %3402  ;;  %v3322_v18 = vmul.f32 %v4516_v17, %v6314_v57  ;;  %v4517_v53 = vld [vmem:[%s4931_s6 + $0x2e8] sm:$0xff] }
 0x5ce   : > { %3534 = vst.msk [vmem:[%s6342_s18 + $0x80] sm:$0xff] %vm1709_vm0, %v3502_v63  ;;  %v3476_v46 = vmul.f32 %v3767_v31, %v3403_v43  ;;  %v3405_v56 = vpop.permute.xlu1 %3404  ;;  %v3323_v29 = vmul.f32 %v4517_v53, %v6320_v16  ;;  %v4518_v43 = vld [vmem:[%s4931_s6 + $0x2f0] sm:$0xff] }
 0x5cf   : > { %3535 = vst.msk [vmem:[%s6342_s18 + $0x88] sm:$0xff] %vm1709_vm0, %v3503_v60  ;;  %v3477_v14 = vmul.f32 %v3768_v1, %v3405_v56  ;;  %v3776_v60 = vld [vmem:[%s4931_s6 + $0x4f8] sm:$0xff]  ;;  %v3324_v57 = vmul.f32 %v4518_v43, %v6325_v23 }
 0x5d0   : > { %v3508_v44 = vadd.f32 %v3476_v46, %v3316_v7  ;;  %v4519_v56 = vld [vmem:[%s4931_s6 + $0x2f8] sm:$0xff] }
 0x5d1   : > { %v3509_v50 = vadd.f32 %v3477_v14, %v3317_v40  ;;  %v3399_v36 = vpop.permute.xlu0 %3398  ;;  %v3325_v42 = vmul.f32 %v4519_v56, %v6317_v8 }
 0x5d2   : > { %3540 = vst.msk [vmem:[%s6342_s18 + $0xb0] sm:$0xff] %vm1709_vm0, %v3508_v44  ;;  %v3474_v26 = vmul.f32 %v3765_v37, %v3399_v36  ;;  %v3401_v47 = vpop.permute.xlu1 %3400 }
 0x5d3   : > { %3541 = vst.msk [vmem:[%s6342_s18 + $0xb8] sm:$0xff] %vm1709_vm0, %v3509_v50  ;;  %v3475_v49 = vmul.f32 %v3766_v20, %v3401_v47 }
 0x5d4   : > { %v3506_v24 = vadd.f32 %v3474_v26, %v3314_v6 }
 0x5d5   : > { %v3507_v33 = vadd.f32 %v3475_v49, %v3315_v39  ;;  %v3411_v15 = vpop.permute.xlu0 %3410 }
 0x5d6   : > { %3538 = vst.msk [vmem:[%s6342_s18 + $0xa0] sm:$0xff] %vm1709_vm0, %v3506_v24  ;;  %v3480_v3 = vmul.f32 %v3771_v21, %v3411_v15  ;;  %v3413_v48 = vpop.permute.xlu1 %3412 }
 0x5d7   : > { %3539 = vst.msk [vmem:[%s6342_s18 + $0xa8] sm:$0xff] %vm1709_vm0, %v3507_v33  ;;  %v3481_v35 = vmul.f32 %v3772_v30, %v3413_v48 }
 0x5d8   : > { %v3512_v27 = vadd.f32 %v3480_v3, %v3320_v38 }
 0x5d9   : > { %v3513_v28 = vadd.f32 %v3481_v35, %v3321_v0  ;;  %v3407_v2 = vpop.permute.xlu0 %3406 }
 0x5da   : > { %3544 = vst.msk [vmem:[%s6342_s18 + $0xd0] sm:$0xff] %vm1709_vm0, %v3512_v27  ;;  %v3478_v11 = vmul.f32 %v3769_v22, %v3407_v2  ;;  %v3409_v58 = vpop.permute.xlu1 %3408 }
 0x5db   : > { %3545 = vst.msk [vmem:[%s6342_s18 + $0xd8] sm:$0xff] %vm1709_vm0, %v3513_v28  ;;  %v3479_v9 = vmul.f32 %v3770_v51, %v3409_v58 }
 0x5dc   : > { %v3510_v32 = vadd.f32 %v3478_v11, %v3318_v54 }
 0x5dd   : > { %v3511_v34 = vadd.f32 %v3479_v9, %v3319_v19  ;;  %v3415_v55 = vpop.permute.xlu0 %3414 }
 0x5de   : > { %3542 = vst.msk [vmem:[%s6342_s18 + $0xc0] sm:$0xff] %vm1709_vm0, %v3510_v32  ;;  %v3482_v59 = vmul.f32 %v3773_v25, %v3415_v55 }
 0x5df   : > { %3543 = vst.msk [vmem:[%s6342_s18 + $0xc8] sm:$0xff] %vm1709_vm0, %v3511_v34  ;;  %v3417_v4 = vpop.permute.xlu1 %3416 }
 0x5e0   : > { %v3514_v31 = vadd.f32 %v3482_v59, %v3322_v18  ;;  %v3483_v63 = vmul.f32 %v3774_v13, %v3417_v4 }
 0x5e1   : > { %v3419_v1 = vpop.permute.xlu0 %3418 }
 0x5e2   : > { %3546 = vst.msk [vmem:[%s6342_s18 + $0xe0] sm:$0xff] %vm1709_vm0, %v3514_v31  ;;  %v3515_v62 = vadd.f32 %v3483_v63, %v3323_v29  ;;  %v3484_v7 = vmul.f32 %v3775_v5, %v3419_v1 }
 0x5e3   : > { %v3421_v46 = vpop.permute.xlu1 %3420 }
 0x5e4   : > { %3547 = vst.msk [vmem:[%s6342_s18 + $0xe8] sm:$0xff] %vm1709_vm0, %v3515_v62  ;;  %v3516_v16 = vadd.f32 %v3484_v7, %v3324_v57  ;;  %v3485_v40 = vmul.f32 %v3776_v60, %v3421_v46 }
 0x5e6   : > { %3548 = vst.msk [vmem:[%s6342_s18 + $0xf0] sm:$0xff] %vm1709_vm0, %v3516_v16  ;;  %v3517_v14 = vadd.f32 %v3485_v40, %v3325_v42 }
 0x5e8   : > { %3549 = vst.msk [vmem:[%s6342_s18 + $0xf8] sm:$0xff] %vm1709_vm0, %v3517_v14 }
 0x5e9 PF: > { %p11_p10 = scmp.ge.s32.totalorder %s4587_s19, 6   ;;  %s6555_s15 = smov %s4538_s16 }
 0x5ea   : > { %s6556_s16 = smov %s4596_s22  ;;  %s6557_s17 = smov %s4587_s19 }
 0x5eb   :  { %13 = sbr.rel (!%p11_p10) target bundleno = 2 (0x2), region = 119 }

</bundles_post_ra>
